<compile_context>
chip_gen: v7x
topology: tpu7x:2x2x1
jax: 0.10.0
libtpu: 0.0.40
codegen_flags: <defaults>
</compile_context>

<pallas_src>
import math
import functools

import jax
import jax.numpy as jnp
from jax.experimental import pallas as pl
from jax.experimental.pallas import tpu as pltpu


# ----------------------------------------------------------------------------
# Pallas kernel: one transformer layer per grid step (plus final LayerNorm on
# the last layer step).  Residual stream kept in a (B_blk*T, C) f32 scratch.
# ----------------------------------------------------------------------------
def _vit_layer_kernel(x_ref,
                      ln1w_ref, ln1b_ref,
                      wqkv_ref, bqkv_ref, wproj_ref, bproj_ref,
                      ln2w_ref, ln2b_ref,
                      w1_ref, b1_ref, w2_ref, b2_ref,
                      lnfw_ref, lnfb_ref,
                      o_ref,
                      x_scr, y_scr,
                      *, n_head, head_dim, n_embd, b_blk, seq_t):
    l = pl.program_id(1)
    C, H, Dh = n_embd, n_head, head_dim
    M = b_blk * seq_t

    @pl.when(l == 0)
    def _():
        x_scr[...] = x_ref[...]

    def layer_norm(z, w, b):
        mu = jnp.mean(z, axis=-1, keepdims=True)
        var = jnp.mean(jnp.square(z - mu), axis=-1, keepdims=True)
        return (z - mu) * jax.lax.rsqrt(var + 1e-5) * w + b

    def gelu(z):
        # tanh-approx GELU: single EUP tanh, ~1e-3 abs deviation from exact
        # torch.nn.GELU() (erf); acceptable for inference.
        return 0.5 * z * (1.0 + jnp.tanh(0.7978845608028654 *
                                         (z + 0.044715 * z * z * z)))

    x = x_scr[...]                                            # (M, C) f32

    # ---- attention sub-block ------------------------------------------------
    h = layer_norm(x, ln1w_ref[0], ln1b_ref[0])
    # NOTE: 1/sqrt(head_dim) is pre-folded into the q columns of w_qkv/b_qkv.
    # NOTE: K = C = 128 half-fills the 256-deep v6e/v7x MXU; this is a model
    #       dim ceiling (K=128 is a perfect fit on v5e's 128-deep MXU).
    qkv = jnp.dot(h.astype(jnp.bfloat16), wqkv_ref[0],
                  preferred_element_type=jnp.float32) + bqkv_ref[0]   # (M, 3C)
    qkv = qkv.reshape(b_blk, seq_t, 3 * C)

    for hd in range(H):                                       # unrolled, H small
        q_h = qkv[:, :, hd * Dh:(hd + 1) * Dh].astype(jnp.bfloat16)          # (B,T,Dh)
        k_h = qkv[:, :, C + hd * Dh:C + (hd + 1) * Dh].astype(jnp.bfloat16)
        v_h = qkv[:, :, 2 * C + hd * Dh:2 * C + (hd + 1) * Dh].astype(jnp.bfloat16)
        att = jnp.einsum('btd,bsd->bts', q_h, k_h,
                         preferred_element_type=jnp.float32)                 # (B,T,T)
        att = jnp.exp(att - jnp.max(att, axis=-1, keepdims=True))
        inv = pl.reciprocal(jnp.sum(att, axis=-1, keepdims=True), approx=True)
        att = att * inv
        y_h = jnp.einsum('bts,bsd->btd', att.astype(jnp.bfloat16), v_h,
                         preferred_element_type=jnp.float32)                 # (B,T,Dh)
        # Assemble heads in a VMEM slab at static lane offsets (no concatenate).
        y_scr[:, hd * Dh:(hd + 1) * Dh] = y_h.reshape(M, Dh)

    y = jnp.dot(y_scr[...].astype(jnp.bfloat16), wproj_ref[0],
                preferred_element_type=jnp.float32) + bproj_ref[0]
    x = x + y

    # ---- MLP sub-block ------------------------------------------------------
    h2 = layer_norm(x, ln2w_ref[0], ln2b_ref[0])
    m = jnp.dot(h2.astype(jnp.bfloat16), w1_ref[0],
                preferred_element_type=jnp.float32) + b1_ref[0]
    m = gelu(m)
    m = jnp.dot(m.astype(jnp.bfloat16), w2_ref[0],
                preferred_element_type=jnp.float32) + b2_ref[0]
    x = x + m

    x_scr[...] = x

    @pl.when(l == pl.num_programs(1) - 1)
    def _():
        o_ref[...] = layer_norm(x, lnfw_ref[...], lnfb_ref[...])


def transformer_pallas(tokens, params, *, n_layer, n_head, batch_block=None):
    B, T, C = tokens.shape
    assert C % n_head == 0
    head_dim = C // n_head
    if batch_block is None:
        batch_block = B          # fold the whole batch: activations are tiny
    assert B % batch_block == 0
    nb = B // batch_block
    M = batch_block * T

    kernel = functools.partial(_vit_layer_kernel,
                               n_head=n_head, head_dim=head_dim, n_embd=C,
                               b_blk=batch_block, seq_t=T)

    weight_args = [
        params["ln1_w"], params["ln1_b"],
        params["w_qkv"], params["b_qkv"], params["w_proj"], params["b_proj"],
        params["ln2_w"], params["ln2_b"],
        params["w1"], params["b1"], params["w2"], params["b2"],
        params["lnf_w"], params["lnf_b"],
    ]

    x2d = tokens.reshape(B * T, C)                 # lane-dense 2-D slab
    in_specs = [pl.BlockSpec((M, C), lambda b, l: (b, 0))]
    for a in weight_args:
        if a.ndim == 3:       # per-layer stacked weight: stream one layer slice
            in_specs.append(pl.BlockSpec((1,) + a.shape[1:],
                                         lambda b, l: (l, 0, 0)))
        else:                 # final LayerNorm params: shared across the grid
            in_specs.append(pl.BlockSpec(a.shape, lambda b, l: (0, 0)))
    out_specs = pl.BlockSpec((M, C), lambda b, l: (b, 0))

    out = pl.pallas_call(
        kernel,
        out_shape=jax.ShapeDtypeStruct((B * T, C), jnp.float32),
        grid=(nb, n_layer),                        # layer axis innermost!
        in_specs=in_specs,
        out_specs=out_specs,
        scratch_shapes=[pltpu.VMEM((M, C), jnp.float32),    # residual stream
                        pltpu.VMEM((M, C), jnp.float32)],   # head-output slab
        compiler_params=pltpu.CompilerParams(
            dimension_semantics=("parallel", "arbitrary")),
    )(x2d, *weight_args)
    return out.reshape(B, T, C)


# ----------------------------------------------------------------------------
# Plain-JAX glue: unfold/fold, sine position embedding, linear interpolation
# ----------------------------------------------------------------------------
def unfold(x, d):
    # nn.Unfold((d, d), stride=d): (N, c, w, h) -> (N, c*d*d, (w//d)*(h//d))
    N, c, w, h = x.shape
    x = x.reshape(N, c, w // d, d, h // d, d)
    x = jnp.transpose(x, (0, 1, 3, 5, 2, 4))
    return x.reshape(N, c * d * d, (w // d) * (h // d))


def fold(x, d, w, h, c):
    # nn.Fold(output_size=(w,h), kernel=(d,d), stride=d), non-overlapping inverse
    N = x.shape[0]
    x = x.reshape(N, c, d, d, w // d, h // d)
    x = jnp.transpose(x, (0, 1, 4, 2, 5, 3))
    return x.reshape(N, c, w, h)


def position_embedding_sine(b, seq, Wp, Hp, num_pos_feats, temperature=10000.0):
    mask = jnp.ones((b, seq, Wp, Hp), jnp.float32)
    t_embed = jnp.cumsum(mask, axis=1)
    y_embed = jnp.cumsum(mask, axis=2)
    x_embed = jnp.cumsum(mask, axis=3)
    dim_t = jnp.arange(num_pos_feats, dtype=jnp.float32)
    dim_t = temperature ** (2.0 * jnp.floor(dim_t / 2.0) / num_pos_feats)

    def enc(e):
        p = e[..., None] / dim_t                       # (b, seq, Wp, Hp, F)
        sin = jnp.sin(p[..., 0::2])
        cos = jnp.cos(p[..., 1::2])
        return jnp.stack((sin, cos), axis=5).reshape(p.shape[:-1] + (num_pos_feats,))

    return jnp.concatenate((enc(t_embed), enc(y_embed), enc(x_embed)), axis=4)


def linear_interpolate_last(x, out_size):
    # F.interpolate(mode='linear', align_corners=False) along last axis
    L_in = x.shape[-1]
    scale = L_in / out_size
    i = jnp.arange(out_size, dtype=jnp.float32)
    src = jnp.maximum(scale * (i + 0.5) - 0.5, 0.0)
    i0 = jnp.clip(jnp.floor(src).astype(jnp.int32), 0, L_in - 1)
    i1 = jnp.minimum(i0 + 1, L_in - 1)
    w1 = src - i0.astype(jnp.float32)
    return x[..., i0] * (1.0 - w1) + x[..., i1] * w1


# ----------------------------------------------------------------------------
# Parameter init (matches VIT._init_weights: Linear ~ N(0, 0.02), bias 0,
# LayerNorm weight 1, bias 0).  Matmul weights stored in bf16, fused per layer,
# with 1/sqrt(head_dim) folded into the q columns of the fused QKV weight.
# ----------------------------------------------------------------------------
def init_params(key, n_layer, n_embd, n_head):
    C, L = n_embd, n_layer
    Dh = C // n_head
    std = 0.02
    q_scale = 1.0 / math.sqrt(Dh)
    ks = jax.random.split(key, 6)

    def lin(k, fi, fo):
        return jax.random.normal(k, (L, fi, fo), jnp.float32) * std

    # Folding the softmax scale into the query projection (weights; the query
    # bias is zero so it needs no scaling) is exactly torch's `att * 1/sqrt(Dh)`.
    wq = lin(ks[0], C, C) * q_scale
    wk = lin(ks[1], C, C)
    wv = lin(ks[2], C, C)
    w_qkv = jnp.concatenate([wq, wk, wv], axis=-1).astype(jnp.bfloat16)  # (L,C,3C)
    w_proj = lin(ks[3], C, C).astype(jnp.bfloat16)
    w1 = lin(ks[4], C, 2 * C).astype(jnp.bfloat16)
    w2 = lin(ks[5], 2 * C, C).astype(jnp.bfloat16)

    zC = jnp.zeros((L, 1, C), jnp.float32)
    return dict(
        ln1_w=jnp.ones((L, 1, C), jnp.float32), ln1_b=zC,
        ln2_w=jnp.ones((L, 1, C), jnp.float32), ln2_b=zC,
        w_qkv=w_qkv, b_qkv=jnp.zeros((L, 1, 3 * C), jnp.float32),
        w_proj=w_proj, b_proj=zC,
        w1=w1, b1=jnp.zeros((L, 1, 2 * C), jnp.float32),
        w2=w2, b2=zC,
        lnf_w=jnp.ones((1, C), jnp.float32), lnf_b=jnp.zeros((1, C), jnp.float32),
    )


# ----------------------------------------------------------------------------
# Full VIT forward
# ----------------------------------------------------------------------------
def vit_forward(x, params, *, n_layer, n_head, down, num_pos_feats):
    b, seq_len, c, w, h = x.shape
    xu = unfold(x.reshape(b * seq_len, c, w, h), down)        # (b*seq, c*d*d, L)
    C, Lsp = xu.shape[-2], xu.shape[-1]
    tokens = xu.reshape(b, seq_len, C, Lsp)
    tokens = jnp.transpose(tokens, (0, 1, 3, 2)).reshape(b, seq_len * Lsp, C)

    pos = position_embedding_sine(b, seq_len, w // down, h // down, num_pos_feats)
    pos = pos.reshape(b, -1, pos.shape[-1])                    # (b, T, 3*F)
    pos = linear_interpolate_last(pos, C)                      # (b, T, C)

    tokens = tokens + pos                                      # embd dropout = identity

    y = transformer_pallas(tokens, params, n_layer=n_layer, n_head=n_head)

    y = y.reshape(b, seq_len, Lsp, C)
    y = jnp.transpose(y, (0, 1, 3, 2)).reshape(b * seq_len, C, Lsp)
    y = fold(y, down, w, h, c)
    return y.reshape(b, seq_len, c, w, h)


if __name__ == "__main__":
    key = jax.random.PRNGKey(0)
    kx, kp = jax.random.split(key)

    # lane-dense shapes: n_embd = c * down^2 = 128, T = seq * (w/d) * (h/d) = 32
    b, seq_len, c, w, h = 2, 2, 8, 16, 16
    down = 4
    n_embd = c * down * down          # 128
    n_head = 4                        # head_dim 32
    n_layer = 2
    num_pos_feats = 96                # module default 288 // 3; pos dim 288 -> interp to 128

    x = jax.random.normal(kx, (b, seq_len, c, w, h), jnp.float32)
    params = init_params(kp, n_layer, n_embd, n_head)

    out = vit_forward(x, params, n_layer=n_layer, n_head=n_head,
                      down=down, num_pos_feats=num_pos_feats)
    out = jax.block_until_ready(out)
    assert out.shape == (b, seq_len, c, w, h)
    assert bool(jnp.all(jnp.isfinite(out)))
    print("KERNEL_OK")
</pallas_src>

<mosaic_0001>
module attributes {stable_mosaic.version = 11 : i64} {
  func.func @_vit_layer_kernel(%arg0: i32, %arg1: i32, %arg2: memref<64x128xf32, #tpu.memory_space<vmem>>, %arg3: memref<1x1x128xf32, #tpu.memory_space<vmem>>, %arg4: memref<1x1x128xf32, #tpu.memory_space<vmem>>, %arg5: memref<1x128x384xbf16, #tpu.memory_space<vmem>>, %arg6: memref<1x1x384xf32, #tpu.memory_space<vmem>>, %arg7: memref<1x128x128xbf16, #tpu.memory_space<vmem>>, %arg8: memref<1x1x128xf32, #tpu.memory_space<vmem>>, %arg9: memref<1x1x128xf32, #tpu.memory_space<vmem>>, %arg10: memref<1x1x128xf32, #tpu.memory_space<vmem>>, %arg11: memref<1x128x256xbf16, #tpu.memory_space<vmem>>, %arg12: memref<1x1x256xf32, #tpu.memory_space<vmem>>, %arg13: memref<1x256x128xbf16, #tpu.memory_space<vmem>>, %arg14: memref<1x1x128xf32, #tpu.memory_space<vmem>>, %arg15: memref<1x128xf32, #tpu.memory_space<vmem>>, %arg16: memref<1x128xf32, #tpu.memory_space<vmem>>, %arg17: memref<64x128xf32, #tpu.memory_space<vmem>>, %arg18: memref<64x128xf32, #tpu.memory_space<vmem>>, %arg19: memref<64x128xf32, #tpu.memory_space<vmem>>) attributes {dimension_semantics = [#tpu.dimension_semantics<parallel>, #tpu.dimension_semantics<arbitrary>], iteration_bounds = array<i64: 1, 2>, scalar_prefetch = 0 : i64, scratch_operands = 2 : i64, tpu.core_type = #tpu.core_type<tc>, window_params = [{transform_indices = @transform_0, window_bounds = array<i64: 64, 128>}, {transform_indices = @transform_1, window_bounds = array<i64: 1, 1, 128>}, {transform_indices = @transform_2, window_bounds = array<i64: 1, 1, 128>}, {transform_indices = @transform_3, window_bounds = array<i64: 1, 128, 384>}, {transform_indices = @transform_4, window_bounds = array<i64: 1, 1, 384>}, {transform_indices = @transform_5, window_bounds = array<i64: 1, 128, 128>}, {transform_indices = @transform_6, window_bounds = array<i64: 1, 1, 128>}, {transform_indices = @transform_7, window_bounds = array<i64: 1, 1, 128>}, {transform_indices = @transform_8, window_bounds = array<i64: 1, 1, 128>}, {transform_indices = @transform_9, window_bounds = array<i64: 1, 128, 256>}, {transform_indices = @transform_10, window_bounds = array<i64: 1, 1, 256>}, {transform_indices = @transform_11, window_bounds = array<i64: 1, 256, 128>}, {transform_indices = @transform_12, window_bounds = array<i64: 1, 1, 128>}, {pipeline_mode = #tpu.pipeline_mode<synchronous>, transform_indices = @transform_13, window_bounds = array<i64: 1, 128>}, {pipeline_mode = #tpu.pipeline_mode<synchronous>, transform_indices = @transform_14, window_bounds = array<i64: 1, 128>}, {transform_indices = @transform_15, window_bounds = array<i64: 64, 128>}]} {
    %c0_i32 = arith.constant 0 : i32
    %0 = arith.cmpi eq, %arg1, %c0_i32 : i32
    %1 = arith.extui %0 : i1 to i32
    %c0_i32_0 = arith.constant 0 : i32
    %2 = arith.cmpi ne, %1, %c0_i32_0 : i32
    scf.if %2 {
      %c0_81 = arith.constant 0 : index
      %c0_82 = arith.constant 0 : index
      %193 = vector.load %arg2[%c0_81, %c0_82] : memref<64x128xf32, #tpu.memory_space<vmem>>, vector<64x128xf32>
      %c0_83 = arith.constant 0 : index
      %c0_84 = arith.constant 0 : index
      %194 = vector.load %arg18[%c0_83, %c0_84] : memref<64x128xf32, #tpu.memory_space<vmem>>, vector<64x128xf32>
      tpu.vector_store %arg18[%c0_83, %c0_84], %193 {strides = array<i32>} : memref<64x128xf32, #tpu.memory_space<vmem>>, vector<64x128xf32>,
    } else {
    }
    %c0 = arith.constant 0 : index
    %c0_1 = arith.constant 0 : index
    %3 = vector.load %arg18[%c0, %c0_1] : memref<64x128xf32, #tpu.memory_space<vmem>>, vector<64x128xf32>
    %c0_2 = arith.constant 0 : index
    %c0_3 = arith.constant 0 : index
    %c0_4 = arith.constant 0 : index
    %4 = vector.load %arg3[%c0_2, %c0_3, %c0_4] : memref<1x1x128xf32, #tpu.memory_space<vmem>>, vector<1x1x128xf32>
    %5 = vector.shape_cast %4 : vector<1x1x128xf32> to vector<1x128xf32>
    %c0_5 = arith.constant 0 : index
    %c0_6 = arith.constant 0 : index
    %c0_7 = arith.constant 0 : index
    %6 = vector.load %arg4[%c0_5, %c0_6, %c0_7] : memref<1x1x128xf32, #tpu.memory_space<vmem>>, vector<1x1x128xf32>
    %7 = vector.shape_cast %6 : vector<1x1x128xf32> to vector<1x128xf32>
    %cst = arith.constant dense<0.000000e+00> : vector<64xf32>
    %8 = vector.multi_reduction <add>, %3, %cst [1] : vector<64x128xf32> to vector<64xf32>
    %9 = vector.shape_cast %8 : vector<64xf32> to vector<64x1xf32>
    %cst_8 = arith.constant 1.280000e+02 : f32
    %10 = vector.broadcast %cst_8 : f32 to vector<64x1xf32>
    %11 = arith.divf %9, %10 : vector<64x1xf32>
    %12 = vector.broadcast %11 : vector<64x1xf32> to vector<64x128xf32>
    %13 = arith.subf %3, %12 : vector<64x128xf32>
    %14 = arith.mulf %13, %13 : vector<64x128xf32>
    %cst_9 = arith.constant dense<0.000000e+00> : vector<64xf32>
    %15 = vector.multi_reduction <add>, %14, %cst_9 [1] : vector<64x128xf32> to vector<64xf32>
    %16 = vector.shape_cast %15 : vector<64xf32> to vector<64x1xf32>
    %cst_10 = arith.constant 1.280000e+02 : f32
    %17 = vector.broadcast %cst_10 : f32 to vector<64x1xf32>
    %18 = arith.divf %16, %17 : vector<64x1xf32>
    %19 = vector.broadcast %11 : vector<64x1xf32> to vector<64x128xf32>
    %20 = arith.subf %3, %19 : vector<64x128xf32>
    %cst_11 = arith.constant 9.99999974E-6 : f32
    %21 = vector.broadcast %cst_11 : f32 to vector<64x1xf32>
    %22 = arith.addf %18, %21 : vector<64x1xf32>
    %23 = math.rsqrt %22 : vector<64x1xf32>
    %24 = vector.broadcast %23 : vector<64x1xf32> to vector<64x128xf32>
    %25 = arith.mulf %20, %24 : vector<64x128xf32>
    %26 = vector.broadcast %5 : vector<1x128xf32> to vector<64x128xf32>
    %27 = arith.mulf %25, %26 : vector<64x128xf32>
    %28 = vector.broadcast %7 : vector<1x128xf32> to vector<64x128xf32>
    %29 = arith.addf %27, %28 : vector<64x128xf32>
    %30 = arith.truncf %29 : vector<64x128xf32> to vector<64x128xbf16>
    %c0_12 = arith.constant 0 : index
    %c0_13 = arith.constant 0 : index
    %c0_14 = arith.constant 0 : index
    %31 = vector.load %arg5[%c0_12, %c0_13, %c0_14] : memref<1x128x384xbf16, #tpu.memory_space<vmem>>, vector<1x128x384xbf16>
    %32 = vector.shape_cast %31 : vector<1x128x384xbf16> to vector<128x384xbf16>
    %cst_15 = arith.constant dense<0.000000e+00> : vector<64x384xf32>
    %33 = tpu.matmul %30, %32, %cst_15 {dimension_numbers = #tpu.dot_dimension_numbers<[1], [0], [0], [1], [0, 0, 1, 1], [], []>} : vector<64x128xbf16>, vector<128x384xbf16>, vector<64x384xf32> -> vector<64x384xf32>
    %c0_16 = arith.constant 0 : index
    %c0_17 = arith.constant 0 : index
    %c0_18 = arith.constant 0 : index
    %34 = vector.load %arg6[%c0_16, %c0_17, %c0_18] : memref<1x1x384xf32, #tpu.memory_space<vmem>>, vector<1x1x384xf32>
    %35 = vector.shape_cast %34 : vector<1x1x384xf32> to vector<1x384xf32>
    %36 = vector.broadcast %35 : vector<1x384xf32> to vector<64x384xf32>
    %37 = arith.addf %33, %36 : vector<64x384xf32>
    %38 = vector.shape_cast %37 : vector<64x384xf32> to vector<2x32x384xf32>
    %39 = vector.extract_strided_slice %38 {offsets = [0, 0, 0], sizes = [2, 32, 32], strides = [1, 1, 1]} : vector<2x32x384xf32> to vector<2x32x32xf32>
    %40 = arith.truncf %39 : vector<2x32x32xf32> to vector<2x32x32xbf16>
    %41 = vector.extract_strided_slice %38 {offsets = [0, 0, 128], sizes = [2, 32, 32], strides = [1, 1, 1]} : vector<2x32x384xf32> to vector<2x32x32xf32>
    %42 = arith.truncf %41 : vector<2x32x32xf32> to vector<2x32x32xbf16>
    %43 = vector.extract_strided_slice %38 {offsets = [0, 0, 256], sizes = [2, 32, 32], strides = [1, 1, 1]} : vector<2x32x384xf32> to vector<2x32x32xf32>
    %44 = arith.truncf %43 : vector<2x32x32xf32> to vector<2x32x32xbf16>
    "tpu.trace_start"() <{level = 10 : i32, message = "btd,bsd->bts"}> : () -> ()
    %cst_19 = arith.constant dense<0.000000e+00> : vector<2x32x32xf32>
    %45 = tpu.matmul %40, %42, %cst_19 {dimension_numbers = #tpu.dot_dimension_numbers<[2], [2], [1], [1], [0, 0, 0, 1, 1, 1], [0], [0]>} : vector<2x32x32xbf16>, vector<2x32x32xbf16>, vector<2x32x32xf32> -> vector<2x32x32xf32>
    "tpu.trace_stop"() : () -> ()
    %cst_20 = arith.constant dense<0xFF800000> : vector<2x32xf32>
    %46 = vector.multi_reduction <maximumf>, %45, %cst_20 [2] : vector<2x32x32xf32> to vector<2x32xf32>
    %47 = vector.shape_cast %46 : vector<2x32xf32> to vector<2x32x1xf32>
    %48 = vector.broadcast %47 : vector<2x32x1xf32> to vector<2x32x32xf32>
    %49 = arith.subf %45, %48 : vector<2x32x32xf32>
    %50 = math.exp %49 : vector<2x32x32xf32>
    %cst_21 = arith.constant dense<0.000000e+00> : vector<2x32xf32>
    %51 = vector.multi_reduction <add>, %50, %cst_21 [2] : vector<2x32x32xf32> to vector<2x32xf32>
    %52 = vector.shape_cast %51 : vector<2x32xf32> to vector<2x32x1xf32>
    %53 = tpu.reciprocal %52 {approx = true} : vector<2x32x1xf32> -> vector<2x32x1xf32>
    %54 = vector.broadcast %53 : vector<2x32x1xf32> to vector<2x32x32xf32>
    %55 = arith.mulf %50, %54 : vector<2x32x32xf32>
    %56 = arith.truncf %55 : vector<2x32x32xf32> to vector<2x32x32xbf16>
    "tpu.trace_start"() <{level = 10 : i32, message = "bts,bsd->btd"}> : () -> ()
    %cst_22 = arith.constant dense<0.000000e+00> : vector<2x32x32xf32>
    %57 = tpu.matmul %56, %44, %cst_22 {dimension_numbers = #tpu.dot_dimension_numbers<[2], [1], [1], [2], [0, 0, 0, 1, 1, 2], [0], [0]>} : vector<2x32x32xbf16>, vector<2x32x32xbf16>, vector<2x32x32xf32> -> vector<2x32x32xf32>
    "tpu.trace_stop"() : () -> ()
    %58 = vector.shape_cast %57 : vector<2x32x32xf32> to vector<64x32xf32>
    %c0_23 = arith.constant 0 : index
    %c0_24 = arith.constant 0 : index
    %59 = vector.load %arg19[%c0_23, %c0_24] : memref<64x128xf32, #tpu.memory_space<vmem>>, vector<64x32xf32>
    tpu.vector_store %arg19[%c0_23, %c0_24], %58 {strides = array<i32>} : memref<64x128xf32, #tpu.memory_space<vmem>>, vector<64x32xf32>,
    %60 = vector.extract_strided_slice %38 {offsets = [0, 0, 32], sizes = [2, 32, 32], strides = [1, 1, 1]} : vector<2x32x384xf32> to vector<2x32x32xf32>
    %61 = arith.truncf %60 : vector<2x32x32xf32> to vector<2x32x32xbf16>
    %62 = vector.extract_strided_slice %38 {offsets = [0, 0, 160], sizes = [2, 32, 32], strides = [1, 1, 1]} : vector<2x32x384xf32> to vector<2x32x32xf32>
    %63 = arith.truncf %62 : vector<2x32x32xf32> to vector<2x32x32xbf16>
    %64 = vector.extract_strided_slice %38 {offsets = [0, 0, 288], sizes = [2, 32, 32], strides = [1, 1, 1]} : vector<2x32x384xf32> to vector<2x32x32xf32>
    %65 = arith.truncf %64 : vector<2x32x32xf32> to vector<2x32x32xbf16>
    "tpu.trace_start"() <{level = 10 : i32, message = "btd,bsd->bts"}> : () -> ()
    %cst_25 = arith.constant dense<0.000000e+00> : vector<2x32x32xf32>
    %66 = tpu.matmul %61, %63, %cst_25 {dimension_numbers = #tpu.dot_dimension_numbers<[2], [2], [1], [1], [0, 0, 0, 1, 1, 1], [0], [0]>} : vector<2x32x32xbf16>, vector<2x32x32xbf16>, vector<2x32x32xf32> -> vector<2x32x32xf32>
    "tpu.trace_stop"() : () -> ()
    %cst_26 = arith.constant dense<0xFF800000> : vector<2x32xf32>
    %67 = vector.multi_reduction <maximumf>, %66, %cst_26 [2] : vector<2x32x32xf32> to vector<2x32xf32>
    %68 = vector.shape_cast %67 : vector<2x32xf32> to vector<2x32x1xf32>
    %69 = vector.broadcast %68 : vector<2x32x1xf32> to vector<2x32x32xf32>
    %70 = arith.subf %66, %69 : vector<2x32x32xf32>
    %71 = math.exp %70 : vector<2x32x32xf32>
    %cst_27 = arith.constant dense<0.000000e+00> : vector<2x32xf32>
    %72 = vector.multi_reduction <add>, %71, %cst_27 [2] : vector<2x32x32xf32> to vector<2x32xf32>
    %73 = vector.shape_cast %72 : vector<2x32xf32> to vector<2x32x1xf32>
    %74 = tpu.reciprocal %73 {approx = true} : vector<2x32x1xf32> -> vector<2x32x1xf32>
    %75 = vector.broadcast %74 : vector<2x32x1xf32> to vector<2x32x32xf32>
    %76 = arith.mulf %71, %75 : vector<2x32x32xf32>
    %77 = arith.truncf %76 : vector<2x32x32xf32> to vector<2x32x32xbf16>
    "tpu.trace_start"() <{level = 10 : i32, message = "bts,bsd->btd"}> : () -> ()
    %cst_28 = arith.constant dense<0.000000e+00> : vector<2x32x32xf32>
    %78 = tpu.matmul %77, %65, %cst_28 {dimension_numbers = #tpu.dot_dimension_numbers<[2], [1], [1], [2], [0, 0, 0, 1, 1, 2], [0], [0]>} : vector<2x32x32xbf16>, vector<2x32x32xbf16>, vector<2x32x32xf32> -> vector<2x32x32xf32>
    "tpu.trace_stop"() : () -> ()
    %79 = vector.shape_cast %78 : vector<2x32x32xf32> to vector<64x32xf32>
    %c0_29 = arith.constant 0 : index
    %c32 = arith.constant 32 : index
    %80 = vector.load %arg19[%c0_29, %c32] : memref<64x128xf32, #tpu.memory_space<vmem>>, vector<64x32xf32>
    tpu.vector_store %arg19[%c0_29, %c32], %79 {strides = array<i32>} : memref<64x128xf32, #tpu.memory_space<vmem>>, vector<64x32xf32>,
    %81 = vector.extract_strided_slice %38 {offsets = [0, 0, 64], sizes = [2, 32, 32], strides = [1, 1, 1]} : vector<2x32x384xf32> to vector<2x32x32xf32>
    %82 = arith.truncf %81 : vector<2x32x32xf32> to vector<2x32x32xbf16>
    %83 = vector.extract_strided_slice %38 {offsets = [0, 0, 192], sizes = [2, 32, 32], strides = [1, 1, 1]} : vector<2x32x384xf32> to vector<2x32x32xf32>
    %84 = arith.truncf %83 : vector<2x32x32xf32> to vector<2x32x32xbf16>
    %85 = vector.extract_strided_slice %38 {offsets = [0, 0, 320], sizes = [2, 32, 32], strides = [1, 1, 1]} : vector<2x32x384xf32> to vector<2x32x32xf32>
    %86 = arith.truncf %85 : vector<2x32x32xf32> to vector<2x32x32xbf16>
    "tpu.trace_start"() <{level = 10 : i32, message = "btd,bsd->bts"}> : () -> ()
    %cst_30 = arith.constant dense<0.000000e+00> : vector<2x32x32xf32>
    %87 = tpu.matmul %82, %84, %cst_30 {dimension_numbers = #tpu.dot_dimension_numbers<[2], [2], [1], [1], [0, 0, 0, 1, 1, 1], [0], [0]>} : vector<2x32x32xbf16>, vector<2x32x32xbf16>, vector<2x32x32xf32> -> vector<2x32x32xf32>
    "tpu.trace_stop"() : () -> ()
    %cst_31 = arith.constant dense<0xFF800000> : vector<2x32xf32>
    %88 = vector.multi_reduction <maximumf>, %87, %cst_31 [2] : vector<2x32x32xf32> to vector<2x32xf32>
    %89 = vector.shape_cast %88 : vector<2x32xf32> to vector<2x32x1xf32>
    %90 = vector.broadcast %89 : vector<2x32x1xf32> to vector<2x32x32xf32>
    %91 = arith.subf %87, %90 : vector<2x32x32xf32>
    %92 = math.exp %91 : vector<2x32x32xf32>
    %cst_32 = arith.constant dense<0.000000e+00> : vector<2x32xf32>
    %93 = vector.multi_reduction <add>, %92, %cst_32 [2] : vector<2x32x32xf32> to vector<2x32xf32>
    %94 = vector.shape_cast %93 : vector<2x32xf32> to vector<2x32x1xf32>
    %95 = tpu.reciprocal %94 {approx = true} : vector<2x32x1xf32> -> vector<2x32x1xf32>
    %96 = vector.broadcast %95 : vector<2x32x1xf32> to vector<2x32x32xf32>
    %97 = arith.mulf %92, %96 : vector<2x32x32xf32>
    %98 = arith.truncf %97 : vector<2x32x32xf32> to vector<2x32x32xbf16>
    "tpu.trace_start"() <{level = 10 : i32, message = "bts,bsd->btd"}> : () -> ()
    %cst_33 = arith.constant dense<0.000000e+00> : vector<2x32x32xf32>
    %99 = tpu.matmul %98, %86, %cst_33 {dimension_numbers = #tpu.dot_dimension_numbers<[2], [1], [1], [2], [0, 0, 0, 1, 1, 2], [0], [0]>} : vector<2x32x32xbf16>, vector<2x32x32xbf16>, vector<2x32x32xf32> -> vector<2x32x32xf32>
    "tpu.trace_stop"() : () -> ()
    %100 = vector.shape_cast %99 : vector<2x32x32xf32> to vector<64x32xf32>
    %c0_34 = arith.constant 0 : index
    %c64 = arith.constant 64 : index
    %101 = vector.load %arg19[%c0_34, %c64] : memref<64x128xf32, #tpu.memory_space<vmem>>, vector<64x32xf32>
    tpu.vector_store %arg19[%c0_34, %c64], %100 {strides = array<i32>} : memref<64x128xf32, #tpu.memory_space<vmem>>, vector<64x32xf32>,
    %102 = vector.extract_strided_slice %38 {offsets = [0, 0, 96], sizes = [2, 32, 32], strides = [1, 1, 1]} : vector<2x32x384xf32> to vector<2x32x32xf32>
    %103 = arith.truncf %102 : vector<2x32x32xf32> to vector<2x32x32xbf16>
    %104 = vector.extract_strided_slice %38 {offsets = [0, 0, 224], sizes = [2, 32, 32], strides = [1, 1, 1]} : vector<2x32x384xf32> to vector<2x32x32xf32>
    %105 = arith.truncf %104 : vector<2x32x32xf32> to vector<2x32x32xbf16>
    %106 = vector.extract_strided_slice %38 {offsets = [0, 0, 352], sizes = [2, 32, 32], strides = [1, 1, 1]} : vector<2x32x384xf32> to vector<2x32x32xf32>
    %107 = arith.truncf %106 : vector<2x32x32xf32> to vector<2x32x32xbf16>
    "tpu.trace_start"() <{level = 10 : i32, message = "btd,bsd->bts"}> : () -> ()
    %cst_35 = arith.constant dense<0.000000e+00> : vector<2x32x32xf32>
    %108 = tpu.matmul %103, %105, %cst_35 {dimension_numbers = #tpu.dot_dimension_numbers<[2], [2], [1], [1], [0, 0, 0, 1, 1, 1], [0], [0]>} : vector<2x32x32xbf16>, vector<2x32x32xbf16>, vector<2x32x32xf32> -> vector<2x32x32xf32>
    "tpu.trace_stop"() : () -> ()
    %cst_36 = arith.constant dense<0xFF800000> : vector<2x32xf32>
    %109 = vector.multi_reduction <maximumf>, %108, %cst_36 [2] : vector<2x32x32xf32> to vector<2x32xf32>
    %110 = vector.shape_cast %109 : vector<2x32xf32> to vector<2x32x1xf32>
    %111 = vector.broadcast %110 : vector<2x32x1xf32> to vector<2x32x32xf32>
    %112 = arith.subf %108, %111 : vector<2x32x32xf32>
    %113 = math.exp %112 : vector<2x32x32xf32>
    %cst_37 = arith.constant dense<0.000000e+00> : vector<2x32xf32>
    %114 = vector.multi_reduction <add>, %113, %cst_37 [2] : vector<2x32x32xf32> to vector<2x32xf32>
    %115 = vector.shape_cast %114 : vector<2x32xf32> to vector<2x32x1xf32>
    %116 = tpu.reciprocal %115 {approx = true} : vector<2x32x1xf32> -> vector<2x32x1xf32>
    %117 = vector.broadcast %116 : vector<2x32x1xf32> to vector<2x32x32xf32>
    %118 = arith.mulf %113, %117 : vector<2x32x32xf32>
    %119 = arith.truncf %118 : vector<2x32x32xf32> to vector<2x32x32xbf16>
    "tpu.trace_start"() <{level = 10 : i32, message = "bts,bsd->btd"}> : () -> ()
    %cst_38 = arith.constant dense<0.000000e+00> : vector<2x32x32xf32>
    %120 = tpu.matmul %119, %107, %cst_38 {dimension_numbers = #tpu.dot_dimension_numbers<[2], [1], [1], [2], [0, 0, 0, 1, 1, 2], [0], [0]>} : vector<2x32x32xbf16>, vector<2x32x32xbf16>, vector<2x32x32xf32> -> vector<2x32x32xf32>
    "tpu.trace_stop"() : () -> ()
    %121 = vector.shape_cast %120 : vector<2x32x32xf32> to vector<64x32xf32>
    %c0_39 = arith.constant 0 : index
    %c96 = arith.constant 96 : index
    %122 = vector.load %arg19[%c0_39, %c96] : memref<64x128xf32, #tpu.memory_space<vmem>>, vector<64x32xf32>
    tpu.vector_store %arg19[%c0_39, %c96], %121 {strides = array<i32>} : memref<64x128xf32, #tpu.memory_space<vmem>>, vector<64x32xf32>,
    %c0_40 = arith.constant 0 : index
    %c0_41 = arith.constant 0 : index
    %123 = vector.load %arg19[%c0_40, %c0_41] : memref<64x128xf32, #tpu.memory_space<vmem>>, vector<64x128xf32>
    %124 = arith.truncf %123 : vector<64x128xf32> to vector<64x128xbf16>
    %c0_42 = arith.constant 0 : index
    %c0_43 = arith.constant 0 : index
    %c0_44 = arith.constant 0 : index
    %125 = vector.load %arg7[%c0_42, %c0_43, %c0_44] : memref<1x128x128xbf16, #tpu.memory_space<vmem>>, vector<1x128x128xbf16>
    %126 = vector.shape_cast %125 : vector<1x128x128xbf16> to vector<128x128xbf16>
    %cst_45 = arith.constant dense<0.000000e+00> : vector<64x128xf32>
    %127 = tpu.matmul %124, %126, %cst_45 {dimension_numbers = #tpu.dot_dimension_numbers<[1], [0], [0], [1], [0, 0, 1, 1], [], []>} : vector<64x128xbf16>, vector<128x128xbf16>, vector<64x128xf32> -> vector<64x128xf32>
    %c0_46 = arith.constant 0 : index
    %c0_47 = arith.constant 0 : index
    %c0_48 = arith.constant 0 : index
    %128 = vector.load %arg8[%c0_46, %c0_47, %c0_48] : memref<1x1x128xf32, #tpu.memory_space<vmem>>, vector<1x1x128xf32>
    %129 = vector.shape_cast %128 : vector<1x1x128xf32> to vector<1x128xf32>
    %130 = vector.broadcast %129 : vector<1x128xf32> to vector<64x128xf32>
    %131 = arith.addf %127, %130 : vector<64x128xf32>
    %132 = arith.addf %3, %131 : vector<64x128xf32>
    %c0_49 = arith.constant 0 : index
    %c0_50 = arith.constant 0 : index
    %c0_51 = arith.constant 0 : index
    %133 = vector.load %arg9[%c0_49, %c0_50, %c0_51] : memref<1x1x128xf32, #tpu.memory_space<vmem>>, vector<1x1x128xf32>
    %134 = vector.shape_cast %133 : vector<1x1x128xf32> to vector<1x128xf32>
    %c0_52 = arith.constant 0 : index
    %c0_53 = arith.constant 0 : index
    %c0_54 = arith.constant 0 : index
    %135 = vector.load %arg10[%c0_52, %c0_53, %c0_54] : memref<1x1x128xf32, #tpu.memory_space<vmem>>, vector<1x1x128xf32>
    %136 = vector.shape_cast %135 : vector<1x1x128xf32> to vector<1x128xf32>
    %cst_55 = arith.constant dense<0.000000e+00> : vector<64xf32>
    %137 = vector.multi_reduction <add>, %132, %cst_55 [1] : vector<64x128xf32> to vector<64xf32>
    %138 = vector.shape_cast %137 : vector<64xf32> to vector<64x1xf32>
    %cst_56 = arith.constant 1.280000e+02 : f32
    %139 = vector.broadcast %cst_56 : f32 to vector<64x1xf32>
    %140 = arith.divf %138, %139 : vector<64x1xf32>
    %141 = vector.broadcast %140 : vector<64x1xf32> to vector<64x128xf32>
    %142 = arith.subf %132, %141 : vector<64x128xf32>
    %143 = arith.mulf %142, %142 : vector<64x128xf32>
    %cst_57 = arith.constant dense<0.000000e+00> : vector<64xf32>
    %144 = vector.multi_reduction <add>, %143, %cst_57 [1] : vector<64x128xf32> to vector<64xf32>
    %145 = vector.shape_cast %144 : vector<64xf32> to vector<64x1xf32>
    %cst_58 = arith.constant 1.280000e+02 : f32
    %146 = vector.broadcast %cst_58 : f32 to vector<64x1xf32>
    %147 = arith.divf %145, %146 : vector<64x1xf32>
    %148 = vector.broadcast %140 : vector<64x1xf32> to vector<64x128xf32>
    %149 = arith.subf %132, %148 : vector<64x128xf32>
    %cst_59 = arith.constant 9.99999974E-6 : f32
    %150 = vector.broadcast %cst_59 : f32 to vector<64x1xf32>
    %151 = arith.addf %147, %150 : vector<64x1xf32>
    %152 = math.rsqrt %151 : vector<64x1xf32>
    %153 = vector.broadcast %152 : vector<64x1xf32> to vector<64x128xf32>
    %154 = arith.mulf %149, %153 : vector<64x128xf32>
    %155 = vector.broadcast %134 : vector<1x128xf32> to vector<64x128xf32>
    %156 = arith.mulf %154, %155 : vector<64x128xf32>
    %157 = vector.broadcast %136 : vector<1x128xf32> to vector<64x128xf32>
    %158 = arith.addf %156, %157 : vector<64x128xf32>
    %159 = arith.truncf %158 : vector<64x128xf32> to vector<64x128xbf16>
    %c0_60 = arith.constant 0 : index
    %c0_61 = arith.constant 0 : index
    %c0_62 = arith.constant 0 : index
    %160 = vector.load %arg11[%c0_60, %c0_61, %c0_62] : memref<1x128x256xbf16, #tpu.memory_space<vmem>>, vector<1x128x256xbf16>
    %161 = vector.shape_cast %160 : vector<1x128x256xbf16> to vector<128x256xbf16>
    %cst_63 = arith.constant dense<0.000000e+00> : vector<64x256xf32>
    %162 = tpu.matmul %159, %161, %cst_63 {dimension_numbers = #tpu.dot_dimension_numbers<[1], [0], [0], [1], [0, 0, 1, 1], [], []>} : vector<64x128xbf16>, vector<128x256xbf16>, vector<64x256xf32> -> vector<64x256xf32>
    %c0_64 = arith.constant 0 : index
    %c0_65 = arith.constant 0 : index
    %c0_66 = arith.constant 0 : index
    %163 = vector.load %arg12[%c0_64, %c0_65, %c0_66] : memref<1x1x256xf32, #tpu.memory_space<vmem>>, vector<1x1x256xf32>
    %164 = vector.shape_cast %163 : vector<1x1x256xf32> to vector<1x256xf32>
    %165 = vector.broadcast %164 : vector<1x256xf32> to vector<64x256xf32>
    %166 = arith.addf %162, %165 : vector<64x256xf32>
    %cst_67 = arith.constant 5.000000e-01 : f32
    %167 = vector.broadcast %cst_67 : f32 to vector<64x256xf32>
    %168 = arith.mulf %167, %166 : vector<64x256xf32>
    %cst_68 = arith.constant 4.471500e-02 : f32
    %169 = vector.broadcast %cst_68 : f32 to vector<64x256xf32>
    %170 = arith.mulf %169, %166 : vector<64x256xf32>
    %171 = arith.mulf %170, %166 : vector<64x256xf32>
    %172 = arith.mulf %171, %166 : vector<64x256xf32>
    %173 = arith.addf %166, %172 : vector<64x256xf32>
    %cst_69 = arith.constant 0.797884583 : f32
    %174 = vector.broadcast %cst_69 : f32 to vector<64x256xf32>
    %175 = arith.mulf %174, %173 : vector<64x256xf32>
    %176 = math.tanh %175 : vector<64x256xf32>
    %cst_70 = arith.constant 1.000000e+00 : f32
    %177 = vector.broadcast %cst_70 : f32 to vector<64x256xf32>
    %178 = arith.addf %177, %176 : vector<64x256xf32>
    %179 = arith.mulf %168, %178 : vector<64x256xf32>
    %180 = arith.truncf %179 : vector<64x256xf32> to vector<64x256xbf16>
    %c0_71 = arith.constant 0 : index
    %c0_72 = arith.constant 0 : index
    %c0_73 = arith.constant 0 : index
    %181 = vector.load %arg13[%c0_71, %c0_72, %c0_73] : memref<1x256x128xbf16, #tpu.memory_space<vmem>>, vector<1x256x128xbf16>
    %182 = vector.shape_cast %181 : vector<1x256x128xbf16> to vector<256x128xbf16>
    %cst_74 = arith.constant dense<0.000000e+00> : vector<64x128xf32>
    %183 = tpu.matmul %180, %182, %cst_74 {dimension_numbers = #tpu.dot_dimension_numbers<[1], [0], [0], [1], [0, 0, 1, 1], [], []>} : vector<64x256xbf16>, vector<256x128xbf16>, vector<64x128xf32> -> vector<64x128xf32>
    %c0_75 = arith.constant 0 : index
    %c0_76 = arith.constant 0 : index
    %c0_77 = arith.constant 0 : index
    %184 = vector.load %arg14[%c0_75, %c0_76, %c0_77] : memref<1x1x128xf32, #tpu.memory_space<vmem>>, vector<1x1x128xf32>
    %185 = vector.shape_cast %184 : vector<1x1x128xf32> to vector<1x128xf32>
    %186 = vector.broadcast %185 : vector<1x128xf32> to vector<64x128xf32>
    %187 = arith.addf %183, %186 : vector<64x128xf32>
    %188 = arith.addf %132, %187 : vector<64x128xf32>
    %c0_78 = arith.constant 0 : index
    %c0_79 = arith.constant 0 : index
    %189 = vector.load %arg18[%c0_78, %c0_79] : memref<64x128xf32, #tpu.memory_space<vmem>>, vector<64x128xf32>
    tpu.vector_store %arg18[%c0_78, %c0_79], %188 {strides = array<i32>} : memref<64x128xf32, #tpu.memory_space<vmem>>, vector<64x128xf32>,
    %c1_i32 = arith.constant 1 : i32
    %190 = arith.cmpi eq, %arg1, %c1_i32 : i32
    %191 = arith.extui %190 : i1 to i32
    %c0_i32_80 = arith.constant 0 : i32
    %192 = arith.cmpi ne, %191, %c0_i32_80 : i32
    scf.if %192 {
      %c0_81 = arith.constant 0 : index
      %c0_82 = arith.constant 0 : index
      %193 = vector.load %arg15[%c0_81, %c0_82] : memref<1x128xf32, #tpu.memory_space<vmem>>, vector<1x128xf32>
      %c0_83 = arith.constant 0 : index
      %c0_84 = arith.constant 0 : index
      %194 = vector.load %arg16[%c0_83, %c0_84] : memref<1x128xf32, #tpu.memory_space<vmem>>, vector<1x128xf32>
      %cst_85 = arith.constant dense<0.000000e+00> : vector<64xf32>
      %195 = vector.multi_reduction <add>, %188, %cst_85 [1] : vector<64x128xf32> to vector<64xf32>
      %196 = vector.shape_cast %195 : vector<64xf32> to vector<64x1xf32>
      %cst_86 = arith.constant 1.280000e+02 : f32
      %197 = vector.broadcast %cst_86 : f32 to vector<64x1xf32>
      %198 = arith.divf %196, %197 : vector<64x1xf32>
      %199 = vector.broadcast %198 : vector<64x1xf32> to vector<64x128xf32>
      %200 = arith.subf %188, %199 : vector<64x128xf32>
      %201 = arith.mulf %200, %200 : vector<64x128xf32>
      %cst_87 = arith.constant dense<0.000000e+00> : vector<64xf32>
      %202 = vector.multi_reduction <add>, %201, %cst_87 [1] : vector<64x128xf32> to vector<64xf32>
      %203 = vector.shape_cast %202 : vector<64xf32> to vector<64x1xf32>
      %cst_88 = arith.constant 1.280000e+02 : f32
      %204 = vector.broadcast %cst_88 : f32 to vector<64x1xf32>
      %205 = arith.divf %203, %204 : vector<64x1xf32>
      %206 = vector.broadcast %198 : vector<64x1xf32> to vector<64x128xf32>
      %207 = arith.subf %188, %206 : vector<64x128xf32>
      %cst_89 = arith.constant 9.99999974E-6 : f32
      %208 = vector.broadcast %cst_89 : f32 to vector<64x1xf32>
      %209 = arith.addf %205, %208 : vector<64x1xf32>
      %210 = math.rsqrt %209 : vector<64x1xf32>
      %211 = vector.broadcast %210 : vector<64x1xf32> to vector<64x128xf32>
      %212 = arith.mulf %207, %211 : vector<64x128xf32>
      %213 = vector.broadcast %193 : vector<1x128xf32> to vector<64x128xf32>
      %214 = arith.mulf %212, %213 : vector<64x128xf32>
      %215 = vector.broadcast %194 : vector<1x128xf32> to vector<64x128xf32>
      %216 = arith.addf %214, %215 : vector<64x128xf32>
      %c0_90 = arith.constant 0 : index
      %c0_91 = arith.constant 0 : index
      %217 = vector.load %arg17[%c0_90, %c0_91] : memref<64x128xf32, #tpu.memory_space<vmem>>, vector<64x128xf32>
      tpu.vector_store %arg17[%c0_90, %c0_91], %216 {strides = array<i32>} : memref<64x128xf32, #tpu.memory_space<vmem>>, vector<64x128xf32>,
    } else {
    }
    return
  }
  func.func @transform_0(%arg0: i32, %arg1: i32) -> (i32, i32) {
    %c0_i32 = arith.constant 0 : i32
    %c0_i32_0 = arith.constant 0 : i32
    return %arg0, %c0_i32 : i32, i32
  }
  func.func @transform_1(%arg0: i32, %arg1: i32) -> (i32, i32, i32) {
    %c0_i32 = arith.constant 0 : i32
    %c0_i32_0 = arith.constant 0 : i32
    %c0_i32_1 = arith.constant 0 : i32
    return %arg1, %c0_i32, %c0_i32_0 : i32, i32, i32
  }
  func.func @transform_2(%arg0: i32, %arg1: i32) -> (i32, i32, i32) {
    %c0_i32 = arith.constant 0 : i32
    %c0_i32_0 = arith.constant 0 : i32
    %c0_i32_1 = arith.constant 0 : i32
    return %arg1, %c0_i32, %c0_i32_0 : i32, i32, i32
  }
  func.func @transform_3(%arg0: i32, %arg1: i32) -> (i32, i32, i32) {
    %c0_i32 = arith.constant 0 : i32
    %c0_i32_0 = arith.constant 0 : i32
    %c0_i32_1 = arith.constant 0 : i32
    return %arg1, %c0_i32, %c0_i32_0 : i32, i32, i32
  }
  func.func @transform_4(%arg0: i32, %arg1: i32) -> (i32, i32, i32) {
    %c0_i32 = arith.constant 0 : i32
    %c0_i32_0 = arith.constant 0 : i32
    %c0_i32_1 = arith.constant 0 : i32
    return %arg1, %c0_i32, %c0_i32_0 : i32, i32, i32
  }
  func.func @transform_5(%arg0: i32, %arg1: i32) -> (i32, i32, i32) {
    %c0_i32 = arith.constant 0 : i32
    %c0_i32_0 = arith.constant 0 : i32
    %c0_i32_1 = arith.constant 0 : i32
    return %arg1, %c0_i32, %c0_i32_0 : i32, i32, i32
  }
  func.func @transform_6(%arg0: i32, %arg1: i32) -> (i32, i32, i32) {
    %c0_i32 = arith.constant 0 : i32
    %c0_i32_0 = arith.constant 0 : i32
    %c0_i32_1 = arith.constant 0 : i32
    return %arg1, %c0_i32, %c0_i32_0 : i32, i32, i32
  }
  func.func @transform_7(%arg0: i32, %arg1: i32) -> (i32, i32, i32) {
    %c0_i32 = arith.constant 0 : i32
    %c0_i32_0 = arith.constant 0 : i32
    %c0_i32_1 = arith.constant 0 : i32
    return %arg1, %c0_i32, %c0_i32_0 : i32, i32, i32
  }
  func.func @transform_8(%arg0: i32, %arg1: i32) -> (i32, i32, i32) {
    %c0_i32 = arith.constant 0 : i32
    %c0_i32_0 = arith.constant 0 : i32
    %c0_i32_1 = arith.constant 0 : i32
    return %arg1, %c0_i32, %c0_i32_0 : i32, i32, i32
  }
  func.func @transform_9(%arg0: i32, %arg1: i32) -> (i32, i32, i32) {
    %c0_i32 = arith.constant 0 : i32
    %c0_i32_0 = arith.constant 0 : i32
    %c0_i32_1 = arith.constant 0 : i32
    return %arg1, %c0_i32, %c0_i32_0 : i32, i32, i32
  }
  func.func @transform_10(%arg0: i32, %arg1: i32) -> (i32, i32, i32) {
    %c0_i32 = arith.constant 0 : i32
    %c0_i32_0 = arith.constant 0 : i32
    %c0_i32_1 = arith.constant 0 : i32
    return %arg1, %c0_i32, %c0_i32_0 : i32, i32, i32
  }
  func.func @transform_11(%arg0: i32, %arg1: i32) -> (i32, i32, i32) {
    %c0_i32 = arith.constant 0 : i32
    %c0_i32_0 = arith.constant 0 : i32
    %c0_i32_1 = arith.constant 0 : i32
    return %arg1, %c0_i32, %c0_i32_0 : i32, i32, i32
  }
  func.func @transform_12(%arg0: i32, %arg1: i32) -> (i32, i32, i32) {
    %c0_i32 = arith.constant 0 : i32
    %c0_i32_0 = arith.constant 0 : i32
    %c0_i32_1 = arith.constant 0 : i32
    return %arg1, %c0_i32, %c0_i32_0 : i32, i32, i32
  }
  func.func @transform_13(%arg0: i32, %arg1: i32) -> (i32, i32) {
    %c0_i32 = arith.constant 0 : i32
    %c0_i32_0 = arith.constant 0 : i32
    %c0_i32_1 = arith.constant 0 : i32
    return %c0_i32, %c0_i32_0 : i32, i32
  }
  func.func @transform_14(%arg0: i32, %arg1: i32) -> (i32, i32) {
    %c0_i32 = arith.constant 0 : i32
    %c0_i32_0 = arith.constant 0 : i32
    %c0_i32_1 = arith.constant 0 : i32
    return %c0_i32, %c0_i32_0 : i32, i32
  }
  func.func @transform_15(%arg0: i32, %arg1: i32) -> (i32, i32) {
    %c0_i32 = arith.constant 0 : i32
    %c0_i32_0 = arith.constant 0 : i32
    return %arg0, %c0_i32 : i32, i32
  }
}

</mosaic_0001>

<bundles_post_ra>
// kernel: tpu_custom_call.1
= control target key start
LH: loop header
LB: loop body
LE: loop exit
PB: predicated region body
PF: predicated region fallthrough
CT: control target
= control target key end

     0   :  { %s6573_s0 = inlined_call_operand.hbm [shape: f32[64,128], index: 0, kind: input, shape index: {}]   ;;  %s6574_s1 = inlined_call_operand.hbm [shape: f32[2,1,128], index: 1, kind: input, shape index: {}]   ;;  %s6575_s2 = inlined_call_operand.hbm [shape: f32[2,1,128], index: 2, kind: input, shape index: {}]   ;;  %s6576_s3 = inlined_call_operand.hbm [shape: bf16[2,128,384], index: 3, kind: input, shape index: {}]   ;;  %s6577_s4 = inlined_call_operand.vmem [shape: f32[2,1,384], index: 4, kind: input, shape index: {}]   ;;  %s6578_s5 = inlined_call_operand.hbm [shape: bf16[2,128,128], index: 5, kind: input, shape index: {}]   ;;  %s6579_s6 = inlined_call_operand.vmem [shape: f32[2,1,128], index: 6, kind: input, shape index: {}]   ;;  %s6580_s7 = inlined_call_operand.vmem [shape: f32[2,1,128], index: 7, kind: input, shape index: {}]   ;;  %s6581_s8 = inlined_call_operand.vmem [shape: f32[2,1,128], index: 8, kind: input, shape index: {}]   ;;  %s6582_s9 = inlined_call_operand.hbm [shape: bf16[2,128,256], index: 9, kind: input, shape index: {}]   ;;  %s6583_s10 = inlined_call_operand.vmem [shape: f32[2,1,256], index: 10, kind: input, shape index: {}]   ;;  %s6584_s11 = inlined_call_operand.hbm [shape: bf16[2,256,128], index: 11, kind: input, shape index: {}]   ;;  %s6585_s12 = inlined_call_operand.vmem [shape: f32[2,1,128], index: 12, kind: input, shape index: {}]   ;;  %s6586_s13 = inlined_call_operand.vmem [shape: f32[1,128], index: 13, kind: input, shape index: {}]   ;;  %s6587_s14 = inlined_call_operand.vmem [shape: f32[1,128], index: 14, kind: input, shape index: {}]   ;;  %s6588_s15 = inlined_call_operand.hbm [shape: f32[64,128], index: 15, kind: output, shape index: {}]  }
   0x1   :  { %6607 = sst [smem:[#allocation27_spill]] %s6573_s0 }
   0x2   :  { %6608 = sst [smem:[#allocation28_spill]] %s6574_s1 }
   0x3   :  { %6609 = sst [smem:[#allocation29_spill]] %s6575_s2 }
   0x4   :  { %6610 = sst [smem:[#allocation30_spill]] %s6576_s3 }
   0x5   :  { %6611 = sst [smem:[#allocation31_spill]] %s6577_s4 }
   0x6   :  { %6612 = sst [smem:[#allocation32_spill]] %s6578_s5 }
   0x7   :  { %6613 = sst [smem:[#allocation33_spill]] %s6581_s8 }
   0x8   :  { %6614 = sst [smem:[#allocation34_spill]] %s6582_s9 }
   0x9   :  { %6615 = sst [smem:[#allocation35_spill]] %s6583_s10 }
   0xa   :  { %6616 = sst [smem:[#allocation36_spill]] %s6584_s11 }
   0xb   :  { %6617 = sst [smem:[#allocation37_spill]] %s6585_s12 }
   0xc   :  { %6618 = sst [smem:[#allocation38_spill]] %s6586_s13 }
   0xd   :  { %6619 = sst [smem:[#allocation39_spill]] %s6587_s14 }
   0xe   :  { %6620 = sst [smem:[#allocation40_spill]] %s6588_s15 }
   0xf   :  { %20 = vsyncpa [#allocation5], 0 }
  0x10   :  { %21 = vsyncpa [#allocation8], 0 }
  0x11   :  { %23 = vsyncpa [#allocation8 + $0x1], 0 }
  0x12   :  { %24 = vsyncpa [#allocation11], 0 }
  0x13   :  { %26 = vsyncpa [#allocation11 + $0x1], 0 }
  0x14   :  { %27 = vsyncpa [#allocation14], 0 }
  0x15   :  { %29 = vsyncpa [#allocation14 + $0x1], 0 }
  0x16   :  { %30 = vsyncpa [#allocation6], 0  ;;  %s5286_s18 = smov 0   ;;  %s5288_s19 = smov 0  }
  0x17   :  { %s5290_s20 = smov 0   ;;  %s5292_s21 = smov 0  }
  0x18   :  { %s5294_s22 = smov 0   ;;  %s5296_s23 = smov 0  }
  0x19 LB: > { %6621 = sst [smem:[#allocation22_spill]] %s5172_s20  ;;  %s45_s24 = sadd.s32 1, %s5180_s22  ;;  %s5184_s23 = sphi %s5296_s23, %s36_s23   ;;  %s5180_s22 = sphi %s5294_s22, %s6668_s22   ;;  %s5176_s21 = sphi %s5292_s21, %s6667_s21   ;;  %s5172_s20 = sphi %s5290_s20, %s6666_s20   ;;  %s5168_s19 = sphi %s5288_s19, %s6670_s19   ;;  %s5164_s18 = sphi %s5286_s18, %s6669_s18  }
  0x1a   : > { %6622 = sst [smem:[#allocation23_spill]] %s5180_s22  ;;  %s81_s25 = sadd.s32 1, %s5172_s20 }
  0x1b   : > { %6623 = sst [smem:[#allocation24_spill]] %s5184_s23  ;;  %p46_p0 = scmp.ge.s32.totalorder %s45_s24, 2 }
  0x1c   : > { %p88_p1 = scmp.ne.s32.totalorder %s5172_s20, %s5168_s19  ;;  %p89_p2 = scmp.eq.s32.totalorder %s5184_s23, 0 }
  0x1d   : > { %s6672_s24 = smov (%p46_p0, %s45_s24), 0  ;;  %p4522_p4 = scmp.lt.s32.totalorder %s5184_s23, 2 }
  0x1e   : > { %6624 = sst [smem:[#allocation25_spill]] %s6672_s24  ;;  %p90_p3 = por %p89_p2, %p88_p1 }
  0x1f   : > { %s78_s26 = ssub.s32 %s5180_s22, %s6672_s24  ;;  %s5327_s27 = sand.u32 1, %s5184_s23  }
  0x20   : > { %p79_p5 = scmp.eq.s32.totalorder %s78_s26, 0  ;;  %s5330_s28 = sand.u32 1, %s5172_s20  }
  0x21   : > { %s4023_s29 = sshll.u32 %s5180_s22, 4  ;;  %s6626_s1 = sld [smem:[#allocation28_spill]] }
  0x22   : > { %s5334_s30 = scalar_select %p79_p5, %s5172_s20, %s81_s25  }
  0x23   : > { %s497_s24 = scalar_lea.vmem [#allocation7], %s5330_s28  ;;  %p5342_p6 = pnand %p4522_p4, %p90_p3 }
  0x24   : > { %6625 = sst [smem:[#allocation26_spill]] %s5334_s30  ;;  %s504_s14 = sshll.u32 %s497_s24, 4  ;;  %s5346_s14 = int_to_ptr.vmem [resolvable:$true] %s504_s14 }
  0x25   : > { %s6627_s13 = scalar_select %p5342_p6, 1, 0 }
  0x26   : > { %s6628_s2 = sld [smem:[#allocation29_spill]]  ;;  %s6592_s16 = scalar_lea.sflag [#allocation8], %s5327_s27 }
  0x27   : > { %s5339_s15 = scalar_lea.hbm %s6626_s1, %s4023_s29  ;;  %p5358_p8 = pneg %p5342_p6 }
  0x28   : > { %s4884_s17 = scalar_lea.hbm %s5339_s15, 16  ;;  %s4889_s10 = scalar_lea.hbm %s6626_s1, 32 }
  0x29   : > { %p4885_p7 = scmp.ne.s32.totalorder %s5339_s15, %s4884_s17  ;;  %p4890_p11 = scmp.lt.u32.totalorder %s5339_s15, %s6626_s1 }
  0x2a   : > { %s6629_s20 = scalar_select %p5358_p8, 1, 0 }
  0x2b   : > { %p4887_p9 = pnand %p5358_p8, %p4885_p7  ;;  %p4891_p12 = scmp.lt.u32.totalorder %s4889_s10, %s4884_s17 }
  0x2c   : > { %s5351_s30 = scalar_lea.hbm %s6628_s2, %s4023_s29  ;;  %p4893_p0 = scmp.lt.u32.totalorder %s4884_s17, %s5339_s15 }
  0x2d   : > { %p4888_p10 = pneg %p4887_p9  ;;  %p4892_p13 = por %p4891_p12, %p4890_p11 }
  0x2f   : > { %p4894_p1 = por %p4893_p0, %p4892_p13 }
  0x31   : > { %p4895_p2 = pnand %p4894_p1, %p4888_p10 }
  0x33   : > { %4898 = shalt.err (!%p4895_p2)
}
  0x34   : > { %s4899_s29 = scalar_lea.vmem %s5346_s14, 16  ;;  %s5186_s12 = smov [#allocation7]  }
  0x35   : > { %p4900_p3 = scmp.ne.s32.totalorder %s5346_s14, %s4899_s29  ;;  %s4904_s26 = sshll.u32 %s5186_s12, 4  ;;  %s4905_s26 = int_to_ptr.vmem [resolvable:$false] %s4904_s26 }
  0x36   : > { %s4906_s4 = scalar_lea.vmem %s4905_s26, 32  ;;  %p4907_p7 = scmp.lt.s32.totalorder %s5346_s14, %s4905_s26 }
  0x37   : > { %p4902_p4 = pnand %p4900_p3, %p5358_p8  ;;  %p4908_p9 = scmp.lt.s32.totalorder %s4906_s4, %s4899_s29 }
  0x39   : > { %p4903_p5 = pneg %p4902_p4  ;;  %p4909_p11 = por %p4908_p9, %p4907_p7 }
  0x3b   : > { %p4910_p12 = pnand %p4909_p11, %p4903_p5 }
  0x3d   : > { %4913 = shalt.err (!%p4910_p12)
}
  0x3e   : > { %4505 = dma.hbm_to_vmem [thread:$0]  (!%p5342_p6), %s5339_s15, 16, %s5346_s14, %s6592_s16  }
  0x3f   : > { %s4474_s10 = smul.u32 192, %s5330_s28  ;;  %s6630_s3 = sld [smem:[#allocation30_spill]] }
  0x40   : > { %s4475_s17 = smul.u32 3072, %s5180_s22  ;;  %s6594_s4 = scalar_lea.sflag [#allocation11], %s5327_s27 }
  0x41   : > { %s532_s12 = scalar_lea.vmem [#allocation10], %s4474_s10 }
  0x42   : > { %s539_s26 = sshll.u32 %s532_s12, 4  ;;  %s5390_s26 = int_to_ptr.vmem [resolvable:$true] %s539_s26 }
  0x45   : > { %s5388_s29 = scalar_lea.hbm %s6630_s3, %s4475_s17  ;;  %s4919_s24 = scalar_lea.hbm %s6630_s3, 6144 }
  0x46   : > { %s4914_s1 = scalar_lea.hbm %s5388_s29, 3072  ;;  %p4920_p1 = scmp.lt.u32.totalorder %s5388_s29, %s6630_s3 }
  0x47   : > { %p4915_p10 = scmp.ne.s32.totalorder %s5388_s29, %s4914_s1  ;;  %p4921_p2 = scmp.lt.u32.totalorder %s4919_s24, %s4914_s1 }
  0x48   : > { %p4923_p4 = scmp.lt.u32.totalorder %s4914_s1, %s5388_s29 }
  0x49   : > { %p4917_p13 = pnand %p4915_p10, %p5358_p8  ;;  %p4922_p3 = por %p4921_p2, %p4920_p1 }
  0x4b   : > { %p4918_p0 = pneg %p4917_p13  ;;  %p4924_p5 = por %p4923_p4, %p4922_p3 }
  0x4d   : > { %p4925_p7 = pnand %p4924_p5, %p4918_p0 }
  0x4f   : > { %4928 = shalt.err (!%p4925_p7)
}
  0x50   : > { %s4929_s10 = scalar_lea.vmem %s5390_s26, 3072  ;;  %s5187_s12 = smov [#allocation10]  }
  0x51   : > { %p4930_p9 = scmp.ne.s32.totalorder %s5390_s26, %s4929_s10  ;;  %s4934_s14 = sshll.u32 %s5187_s12, 4  ;;  %s4935_s14 = int_to_ptr.vmem [resolvable:$false] %s4934_s14 }
  0x52   : > { %s4936_s15 = scalar_lea.vmem %s4935_s14, 6144  ;;  %p4937_p10 = scmp.lt.s32.totalorder %s5390_s26, %s4935_s14 }
  0x53   : > { %p4932_p11 = pnand %p4930_p9, %p5358_p8  ;;  %p4938_p13 = scmp.lt.s32.totalorder %s4936_s15, %s4929_s10 }
  0x55   : > { %p4933_p12 = pneg %p4932_p11  ;;  %p4939_p1 = por %p4938_p13, %p4937_p10 }
  0x57   : > { %p4940_p2 = pnand %p4939_p1, %p4933_p12 }
  0x59   : > { %4943 = shalt.err (!%p4940_p2)
}
  0x5a   : > { %s5188_s1 = smov 192   ;;  %s5189_s24 = smov 12  }
  0x5b   : > { %4511 = dma.hbm_to_vmem [thread:$0]  (!%p5342_p6), %s5388_s29, 3072, %s5390_s26, %s6594_s4, %s5188_s1, %s5188_s1, %s5189_s24  }
  0x5c   : > { %s4029_s17 = sshll.u32 %s5330_s28, 7  ;;  %s4152_s25 = sshll.u32 %s5180_s22, 11 }
  0x5d   : > { %s6631_s9 = sld [smem:[#allocation34_spill]]  ;;  %s599_s15 = scalar_lea.vmem [#allocation13], %s4029_s17 }
  0x5e   : > { %s606_s16 = sshll.u32 %s599_s15, 4  ;;  %s6593_s3 = scalar_lea.sflag [#allocation14], %s5327_s27  ;;  %s5427_s16 = int_to_ptr.vmem [resolvable:$true] %s606_s16 }
  0x63   : > { %s5423_s14 = scalar_lea.hbm %s6631_s9, %s4152_s25  ;;  %s4949_s1 = scalar_lea.hbm %s6631_s9, 4096 }
  0x64   : > { %s4944_s8 = scalar_lea.hbm %s5423_s14, 2048  ;;  %p4950_p5 = scmp.lt.u32.totalorder %s5423_s14, %s6631_s9 }
  0x65   : > { %p4945_p0 = scmp.ne.s32.totalorder %s5423_s14, %s4944_s8  ;;  %p4951_p7 = scmp.lt.u32.totalorder %s4949_s1, %s4944_s8 }
  0x66   : > { %p4953_p11 = scmp.lt.u32.totalorder %s4944_s8, %s5423_s14 }
  0x67   : > { %p4947_p3 = pnand %p4945_p0, %p5358_p8  ;;  %p4952_p9 = por %p4951_p7, %p4950_p5 }
  0x69   : > { %p4948_p4 = pneg %p4947_p3  ;;  %p4954_p12 = por %p4953_p11, %p4952_p9 }
  0x6b   : > { %p4955_p10 = pnand %p4954_p12, %p4948_p4 }
  0x6d   : > { %4958 = shalt.err (!%p4955_p10)
}
  0x6e   : > { %s4959_s12 = scalar_lea.vmem %s5427_s16, 2048  ;;  %s5190_s15 = smov [#allocation13]  }
  0x6f   : > { %p4960_p13 = scmp.ne.s32.totalorder %s5427_s16, %s4959_s12  ;;  %s4964_s29 = sshll.u32 %s5190_s15, 4  ;;  %s4965_s29 = int_to_ptr.vmem [resolvable:$false] %s4964_s29 }
  0x70   : > { %s4966_s26 = scalar_lea.vmem %s4965_s29, 4096  ;;  %p4967_p0 = scmp.lt.s32.totalorder %s5427_s16, %s4965_s29 }
  0x71   : > { %p4962_p1 = pnand %p4960_p13, %p5358_p8  ;;  %p4968_p3 = scmp.lt.s32.totalorder %s4966_s26, %s4959_s12 }
  0x73   : > { %p4963_p2 = pneg %p4962_p1  ;;  %p4969_p5 = por %p4968_p3, %p4967_p0 }
  0x75   : > { %p4970_p7 = pnand %p4969_p5, %p4963_p2 }
  0x77   : > { %4973 = shalt.err (!%p4970_p7)
}
  0x78   : > { %s6595_s8 = smov 128   ;;  %s6596_s1 = smov 8  }
  0x79   : > { %4517 = dma.hbm_to_vmem [thread:$0]  (!%p5342_p6), %s5423_s14, 2048, %s5427_s16, %s6593_s3, %s6595_s8, %s6595_s8, %s6596_s1  }
  0x7a   : > { %s6632_s11 = sld [smem:[#allocation36_spill]]  ;;  %s627_s15 = scalar_lea.vmem [#allocation15], %s4029_s17 }
  0x7b   : > { %s634_s29 = sshll.u32 %s627_s15, 4  ;;  %s5468_s26 = sadd.s32 4294967295, %s5184_s23   ;;  %s5465_s29 = int_to_ptr.vmem [resolvable:$true] %s634_s29 }
  0x7c   : > { %p94_p4 = scmp.ne.s32.totalorder %s5168_s19, %s5164_s18  ;;  %p6597_p9 = scmp.eq.s32.totalorder %s5468_s26, 0 }
  0x7d   : > { %p4020_p11 = scmp.ge.s32.totalorder %s5184_s23, 1  ;;  %p459_p12 = scmp.lt.s32.totalorder %s5184_s23, 3 }
  0x7e   : > { %p5477_p10 = por %p6597_p9, %p94_p4  ;;  %s514_s18 = scalar_lea.vmem [#allocation9], %s5330_s28 }
  0x7f   : > { %p5481_p13 = pnand %p4020_p11, %p459_p12  ;;  %s521_s24 = sshll.u32 %s514_s18, 4  ;;  %s522_s24 = int_to_ptr.vmem [resolvable:$true] %s521_s24 }
  0x80   : > { %s5461_s12 = scalar_lea.hbm %s6632_s11, %s4152_s25  ;;  %s5193_s25 = smov [#allocation4]  }
  0x81   : > { %s6633_s16 = scalar_select %p5477_p10, 1, 0 }
  0x82   : > { %s6634_s17 = scalar_select %p5481_p13, 1, 0 }
  0x83   : > { %s474_s14 = sshll.u32 %s5193_s25, 4  ;;  %p4498_p1 = pneg %p5481_p13  ;;  %s5487_s14 = int_to_ptr.vmem [resolvable:$true] %s474_s14 }
  0x84   : > { %s4974_s3 = scalar_lea.hbm %s5351_s30, 16  ;;  %s4979_s8 = scalar_lea.hbm %s6628_s2, 32 }
  0x85   : > { %p5493_p2 = pnand %p4498_p1, %p6597_p9  ;;  %p4975_p0 = scmp.ne.s32.totalorder %s5351_s30, %s4974_s3 }
  0x86   : > { %p4980_p7 = scmp.lt.u32.totalorder %s5351_s30, %s6628_s2  ;;  %p4981_p4 = scmp.lt.u32.totalorder %s4979_s8, %s4974_s3 }
  0x87   : > { %s6635_s15 = scalar_select %p5493_p2, 1, 0 }
  0x88   : > { %p4977_p3 = pnand %p4975_p0, %p5358_p8  ;;  %p4982_p11 = por %p4981_p4, %p4980_p7 }
  0x89   : > { %p4983_p12 = scmp.lt.u32.totalorder %s4974_s3, %s5351_s30 }
  0x8a   : > { %p4978_p5 = pneg %p4977_p3 }
  0x8b   : > { %p4984_p1 = por %p4983_p12, %p4982_p11 }
  0x8d   : > { %p4985_p9 = pnand %p4984_p1, %p4978_p5 }
  0x8f   : > { %4988 = shalt.err (!%p4985_p9)
}
  0x90   : > { %s4989_s18 = scalar_lea.vmem %s522_s24, 16  ;;  %s5194_s10 = smov [#allocation9]  }
  0x91   : > { %p4990_p10 = scmp.ne.s32.totalorder %s522_s24, %s4989_s18  ;;  %s4994_s23 = sshll.u32 %s5194_s10, 4  ;;  %s4995_s23 = int_to_ptr.vmem [resolvable:$false] %s4994_s23 }
  0x92   : > { %s4996_s4 = scalar_lea.vmem %s4995_s23, 32  ;;  %p4997_p13 = scmp.lt.s32.totalorder %s522_s24, %s4995_s23 }
  0x93   : > { %p4992_p0 = pnand %p4990_p10, %p5358_p8  ;;  %p4998_p2 = scmp.lt.s32.totalorder %s4996_s4, %s4989_s18 }
  0x95   : > { %p4993_p3 = pneg %p4992_p0  ;;  %p4999_p6 = por %p4998_p2, %p4997_p13 }
  0x97   : > { %p5000_p4 = pnand %p4999_p6, %p4993_p3 }
  0x99   : > { %5003 = shalt.err (!%p5000_p4)
}
  0x9a   : > { %p6636_p7 = scmp.ne.s32.totalorder %s6627_s13, 0  ;;  %s6637_s3 = scalar_lea.sflag [#allocation8], %s5327_s27 }
  0x9b   : > { %s6638_s0 = sld [smem:[#allocation27_spill]]  ;;  %p6639_p10 = scmp.ne.s32.totalorder %s6635_s15, 0 }
  0x9c   : > { %4508 = dma.hbm_to_vmem [thread:$0]  (!%p6636_p7), %s5351_s30, 16, %s522_s24, %s6637_s3  }
  0x9d   : > { %p5006_p5 = pneg %p6639_p10 }
  0xa1   : > { %s5004_s1 = scalar_lea.hbm %s6638_s0, 1024 }
  0xa2   : > { %p5005_p9 = scmp.ne.s32.totalorder %s6638_s0, %s5004_s1  ;;  %p5011_p2 = scmp.lt.u32.totalorder %s5004_s1, %s6638_s0 }
  0xa4   : > { %p5007_p13 = pnand %p5006_p5, %p5005_p9 }
  0xa6   : > { %p5008_p6 = pneg %p5007_p13 }
  0xa8   : > { %p5013_p11 = pnand %p5011_p2, %p5008_p6 }
  0xaa   : > { %5016 = shalt.err (!%p5013_p11)
}
  0xab   : > { %s5017_s30 = scalar_lea.vmem %s5487_s14, 1024  ;;  %p5025_p3 = scmp.lt.s32.totalorder %s5487_s14, %s5487_s14 }
  0xac   : > { %p5018_p12 = scmp.ne.s32.totalorder %s5487_s14, %s5017_s30  ;;  %p5026_p4 = scmp.lt.s32.totalorder %s5017_s30, %s5017_s30 }
  0xae   : > { %p5020_p1 = pnand %p5018_p12, %p5006_p5  ;;  %p5027_p7 = por %p5026_p4, %p5025_p3 }
  0xb0   : > { %p5021_p0 = pneg %p5020_p1 }
  0xb2   : > { %p5028_p8 = pnand %p5027_p7, %p5021_p0 }
  0xb4   : > { %5031 = shalt.err (!%p5028_p8)
}
  0xb5   : > { %s6640_s24 = smov 8   ;;  %s6641_s4 = smov 128  }
  0xb6   : > { %4501 = dma.hbm_to_vmem [thread:$0]  (!%p6639_p10), %s6638_s0, 1024, %s5487_s14, [#allocation5], %s6641_s4, %s6641_s4, %s6640_s24  }
  0xb7   : > { %s4151_s8 = sshll.u32 %s5180_s22, 10  ;;  %s6642_s1 = sshll.u32 %s5330_s28, 6 }
  0xb8   : > { %s560_s25 = scalar_lea.vmem [#allocation12], %s6642_s1  ;;  %s6643_s5 = sld [smem:[#allocation32_spill]] }
  0xb9   : > { %s567_s10 = sshll.u32 %s560_s25, 4  ;;  %p6644_p7 = scmp.ne.s32.totalorder %s6629_s20, 0  ;;  %s5548_s10 = int_to_ptr.vmem [resolvable:$true] %s567_s10 }
  0xbe   : > { %s5546_s30 = scalar_lea.hbm %s6643_s5, %s4151_s8  ;;  %s5037_s24 = scalar_lea.hbm %s6643_s5, 2048 }
  0xbf   : > { %s5032_s15 = scalar_lea.hbm %s5546_s30, 1024  ;;  %p5038_p5 = scmp.lt.u32.totalorder %s5546_s30, %s6643_s5 }
  0xc0   : > { %p5033_p8 = scmp.ne.s32.totalorder %s5546_s30, %s5032_s15  ;;  %p5039_p13 = scmp.lt.u32.totalorder %s5037_s24, %s5032_s15 }
  0xc1   : > { %p5041_p2 = scmp.lt.u32.totalorder %s5032_s15, %s5546_s30 }
  0xc2   : > { %p5035_p9 = pnand %p5033_p8, %p6644_p7  ;;  %p5040_p6 = por %p5039_p13, %p5038_p5 }
  0xc4   : > { %p5036_p10 = pneg %p5035_p9  ;;  %p5042_p11 = por %p5041_p2, %p5040_p6 }
  0xc6   : > { %p5043_p12 = pnand %p5042_p11, %p5036_p10 }
  0xc8   : > { %5046 = shalt.err (!%p5043_p12)
}
  0xc9   : > { %s5047_s9 = scalar_lea.vmem %s5548_s10, 1024  ;;  %s5195_s8 = smov [#allocation12]  }
  0xca   : > { %p5048_p1 = scmp.ne.s32.totalorder %s5548_s10, %s5047_s9  ;;  %s5052_s1 = sshll.u32 %s5195_s8, 4  ;;  %s5053_s1 = int_to_ptr.vmem [resolvable:$false] %s5052_s1 }
  0xcb   : > { %s5054_s25 = scalar_lea.vmem %s5053_s1, 2048  ;;  %p5055_p4 = scmp.lt.s32.totalorder %s5548_s10, %s5053_s1 }
  0xcc   : > { %p5050_p0 = pnand %p5048_p1, %p6644_p7  ;;  %p5056_p8 = scmp.lt.s32.totalorder %s5054_s25, %s5047_s9 }
  0xce   : > { %p5051_p3 = pneg %p5050_p0  ;;  %p5057_p9 = por %p5056_p8, %p5055_p4 }
  0xd0   : > { %p5058_p5 = pnand %p5057_p9, %p5051_p3 }
  0xd2   : > { %5061 = shalt.err (!%p5058_p5)
}
  0xd3   : > { %s5196_s23 = smov 64   ;;  %s5197_s18 = smov 4  }
  0xd4   : > { %p6645_p10 = scmp.ne.s32.totalorder %s6627_s13, 0  ;;  %s6646_s15 = scalar_lea.sflag [#allocation11], %s5327_s27 }
  0xd5   : > { %s5062_s14 = scalar_lea.hbm %s5461_s12, 2048  ;;  %s5067_s4 = scalar_lea.hbm %s6632_s11, 4096 }
  0xd6   : > { %4514 = dma.hbm_to_vmem [thread:$0]  (!%p6645_p10), %s5546_s30, 1024, %s5548_s10, %s6646_s15, %s5196_s23, %s5196_s23, %s5197_s18  }
  0xd7   : > { %p5063_p13 = scmp.ne.s32.totalorder %s5461_s12, %s5062_s14  ;;  %p5068_p11 = scmp.lt.u32.totalorder %s5461_s12, %s6632_s11 }
  0xd8   : > { %p5069_p12 = scmp.lt.u32.totalorder %s5067_s4, %s5062_s14  ;;  %p5071_p0 = scmp.lt.u32.totalorder %s5062_s14, %s5461_s12 }
  0xd9   : > { %p5065_p6 = pnand %p5063_p13, %p6644_p7 }
  0xda   : > { %p5070_p1 = por %p5069_p12, %p5068_p11 }
  0xdb   : > { %p5066_p2 = pneg %p5065_p6 }
  0xdc   : > { %p5072_p3 = por %p5071_p0, %p5070_p1 }
  0xde   : > { %p5073_p4 = pnand %p5072_p3, %p5066_p2 }
  0xe0   : > { %5076 = shalt.err (!%p5073_p4)
}
  0xe1   : > { %s5077_s10 = scalar_lea.vmem %s5465_s29, 2048  ;;  %s5198_s30 = smov [#allocation15]  }
  0xe2   : > { %p5078_p8 = scmp.ne.s32.totalorder %s5465_s29, %s5077_s10  ;;  %s5082_s8 = sshll.u32 %s5198_s30, 4  ;;  %s5083_s8 = int_to_ptr.vmem [resolvable:$false] %s5082_s8 }
  0xe3   : > { %s5084_s1 = scalar_lea.vmem %s5083_s8, 4096  ;;  %p5085_p13 = scmp.lt.s32.totalorder %s5465_s29, %s5083_s8 }
  0xe4   : > { %p5080_p9 = pnand %p5078_p8, %p6644_p7  ;;  %p5086_p6 = scmp.lt.s32.totalorder %s5084_s1, %s5077_s10 }
  0xe6   : > { %p5081_p5 = pneg %p5080_p9  ;;  %p5087_p11 = por %p5086_p6, %p5085_p13 }
  0xe8   : > { %p5088_p12 = pnand %p5087_p11, %p5081_p5 }
  0xea   : > { %5091 = shalt.err (!%p5088_p12)
}
  0xeb   : > { %s6647_s25 = scalar_lea.sflag [#allocation14], %s5327_s27  ;;  %p6648_p7 = scmp.ne.s32.totalorder %s6634_s17, 0 }
  0xec   : > { %4520 = dma.hbm_to_vmem [thread:$0]  (!%p6645_p10), %s5461_s12, 2048, %s5465_s29, %s6647_s25, %s5196_s23, %s5196_s23, %s5197_s18  }
  0xed   : > { %652 = sbr.rel (%p6648_p7) target bundleno = 4854 (0x12f6), region = 80  ;;  %p6649_p2 = scmp.eq.s32.totalorder (!%p6648_p7), %s5468_s26, 0 }
  0xf4   : > { %5143 = dma.done.wait (%p6649_p2), [#allocation5], 1024   ;;  %p6650_p1 = pmov %p6649_p2 }
  0xf5   : > { %s658_s13 = sand.u32 1, %s5468_s26   ;;  %s5610_s20 = sand.u32 1, %s5168_s19  }
  0xf6   : > { %5145 = vsyncadd (%p6650_p1), [#allocation5], 4294966272  ;;  %s659_s27 = scalar_lea.sflag [#allocation8], %s658_s13  ;;  %p6651_p0 = scmp.ne.s32.totalorder %s6633_s16, 0 }
  0xf8   : > { %5147 = dma.done.wait (%p6651_p0), %s659_s27, 32  }
  0xf9   : > { %5149 = vsyncadd (%p6651_p0), %s659_s27, 4294967264  ;;  %s4476_s12 = smul.u32 192, %s5610_s20  ;;  %s675_s17 = scalar_lea.sflag [#allocation11], %s658_s13 }
  0xfb   : > { %s5619_s23 = scalar_lea.vmem [#allocation10], %s4476_s12 }
  0xfc   : > { %5151 = dma.done.wait (%p6651_p0), %s675_s17, 4096  }
  0xfd   : > { %5153 = vsyncadd (%p6651_p0), %s675_s17, 4294963200  ;;  %s4037_s18 = sshll.u32 %s5610_s20, 6  ;;  %s4038_s14 = sshll.u32 %s5610_s20, 7 }
  0xfe   : > { %s5627_s28 = scalar_lea.vmem [#allocation12], %s4037_s18  ;;  %s693_s24 = scalar_lea.sflag [#allocation14], %s658_s13 }
  0xff   : > { %s5629_s4 = scalar_lea.vmem [#allocation13], %s4038_s14 }
 0x100   : > { %5155 = dma.done.wait (%p6651_p0), %s693_s24, 4096  }
 0x101   : > { %5157 = vsyncadd (%p6651_p0), %s693_s24, 4294963200  ;;  %p791_p10 = scmp.lt.s32.totalorder %s5176_s21, 1  ;;  %s6652_s12 = sld [smem:[#allocation33_spill]] }
 0x102   : > { %s6653_s29 = sld [smem:[#allocation31_spill]]  ;;  %s6654_s11 = sld [smem:[#allocation35_spill]] }
 0x103   : > { %s5637_s3 = scalar_select %p791_p10, %s5176_s21, 1 }
 0x104   : > { %s6655_s8 = sld [smem:[#allocation37_spill]]  ;;  %s5667_s25 = scalar_lea.vmem [#allocation15], %s4038_s14 }
 0x105   : > { %s4477_s9 = smul.u32 3, %s5637_s3  ;;  %s800_s16 = scalar_lea.vmem %s6580_s7, %s5637_s3 }
 0x106   : > { %s4040_s0 = sshll.u32 %s5637_s3, 1  ;;  %p4041_p3 = scmp.ne.s32.totalorder %s5176_s21, 0 }
 0x107   : > { %s803_s17 = scalar_lea.vmem %s6652_s12, %s5637_s3  ;;  %v817_v0 = vld [vmem:[#allocation4] sm:$0xff] (!%p4041_p3)  ;;  %v818_v1 = vld [vmem:[#allocation4 + $0x8] sm:$0xff] (!%p4041_p3)  ;;  %v819_v2 = vld [vmem:[#allocation4 + $0x10] sm:$0xff] (!%p4041_p3) }
 0x108   : > { %s5655_s15 = scalar_lea.vmem %s6653_s29, %s4477_s9  ;;  %s5661_s22 = scalar_lea.vmem %s6654_s11, %s4040_s0  ;;  %825 = vst [vmem:[#allocation2] sm:$0xff] (!%p4041_p3), %v817_v0  ;;  %826 = vst [vmem:[#allocation2 + $0x8] sm:$0xff] (!%p4041_p3), %v818_v1  ;;  %v820_v3 = vld [vmem:[#allocation4 + $0x18] sm:$0xff] (!%p4041_p3)  ;;  %v821_v4 = vld [vmem:[#allocation4 + $0x20] sm:$0xff] (!%p4041_p3) }
 0x109   : > { %816 = sbr.rel (%p4041_p3) target bundleno = 272 (0x110), region = 112  ;;  %827 = vst [vmem:[#allocation2 + $0x10] sm:$0xff] (!%p4041_p3), %v819_v2  ;;  %v822_v5 = vld [vmem:[#allocation4 + $0x28] sm:$0xff] (!%p4041_p3)  ;;  %828 = vst [vmem:[#allocation2 + $0x18] sm:$0xff] (!%p4041_p3), %v820_v3  ;;  %v823_v6 = vld [vmem:[#allocation4 + $0x30] sm:$0xff] (!%p4041_p3) }
 0x10a   : > { %s810_s1 = scalar_lea.vmem %s6655_s8, %s5637_s3  ;;  %829 = vst [vmem:[#allocation2 + $0x20] sm:$0xff] (!%p4041_p3), %v821_v4  ;;  %830 = vst [vmem:[#allocation2 + $0x28] sm:$0xff] (!%p4041_p3), %v822_v5  ;;  %v824_v7 = vld [vmem:[#allocation4 + $0x38] sm:$0xff] (!%p4041_p3) }
 0x10b   : > { %831 = vst [vmem:[#allocation2 + $0x30] sm:$0xff] (!%p4041_p3), %v823_v6  ;;  %832 = vst [vmem:[#allocation2 + $0x38] sm:$0xff] (!%p4041_p3), %v824_v7 }
 0x110 PF: > { %v833_v8 = vld [vmem:[#allocation2] sm:$0xff]  ;;  %v835_v9 = vld [vmem:[#allocation2 + $0x10] sm:$0xff]  ;;  %v834_v10 = vld [vmem:[#allocation2 + $0x8] sm:$0xff]  ;;  %v5199_v7 = vmov 0   ;;  %s6656_s0 = scalar_lea.vmem [#allocation7], %s5610_s20  ;;  %s6657_s2 = scalar_lea.vmem [#allocation9], %s5610_s20 }
 0x111   : > { %843 = vadd.xlane.f32.xlu0 %v833_v8  ;;  %847 = vadd.xlane.f32.xlu1 %v835_v9  ;;  %v836_v11 = vld [vmem:[#allocation2 + $0x18] sm:$0xff]  ;;  %v837_v12 = vld [vmem:[#allocation2 + $0x20] sm:$0xff]  ;;  %v838_v13 = vld [vmem:[#allocation2 + $0x28] sm:$0xff]  ;;  %vm1291_vm0 = vcmask 261120   ;;  %s5200_s5 = smov 96   ;;  %s5201_s11 = smov 64  }
 0x112   : > { %v839_v14 = vld [vmem:[#allocation2 + $0x30] sm:$0xff]  ;;  %v840_v15 = vld [vmem:[#allocation2 + $0x38] sm:$0xff]  ;;  %v4591_v18 = vld [vmem:[%s5619_s23 + $0x1c] ss:$12 sps:$4 sm:$0xff]   ;;  %1173 = vmatprep.mubr.bf16.mxu0 %v5199_v7  ;;  %s5202_s20 = smov 32   ;;  %vm2020_vm1 = vcmask 523520  }
 0x113   : > { %v4588_v16 = vld [vmem:[%s5619_s23 + $0x4] ss:$12 sps:$4 sm:$0xff]   ;;  %v4590_v17 = vld [vmem:[%s5619_s23] ss:$12 sps:$4 sm:$0xff]   ;;  %v4593_v19 = vld [vmem:[%s5619_s23 + $0x8] ss:$12 sps:$4 sm:$0xff]  }
 0x114   : > { %1141 = vmatprep.subr.bf16.mxu0 %v4588_v16  ;;  %4282 = vmatprep.subr.bf16.mxu1 %v4593_v19  ;;  %v4594_v52 = vld [vmem:[%s5619_s23 + $0x18] ss:$12 sps:$4 sm:$0xff]   ;;  %v4595_v53 = vld [vmem:[%s5619_s23 + $0x34] ss:$12 sps:$4 sm:$0xff]   ;;  %v4598_v55 = vld [vmem:[%s5619_s23 + $0x30] ss:$12 sps:$4 sm:$0xff]  }
 0x115   : > { %845 = vadd.xlane.f32.xlu0 %v834_v10  ;;  %849 = vadd.xlane.f32.xlu1 %v836_v11  ;;  %v4597_v54 = vld [vmem:[%s5619_s23 + $0x20] ss:$12 sps:$4 sm:$0xff]   ;;  %v4601_v57 = vld [vmem:[%s5619_s23 + $0x38] ss:$12 sps:$4 sm:$0xff]   ;;  %v4602_v58 = vld [vmem:[%s5619_s23 + $0x48] ss:$12 sps:$4 sm:$0xff]  }
 0x116   : > { %1142 = vmatpush1.bf16.msra.mxu0 %v4590_v17  ;;  %4283 = vmatpush3.bf16.msra.mxu1 %v4593_v19  ;;  %v4599_v56 = vld [vmem:[%s5619_s23 + $0x4c] ss:$12 sps:$4 sm:$0xff]   ;;  %v4603_v59 = vld [vmem:[%s5619_s23 + $0x64] ss:$12 sps:$4 sm:$0xff]   ;;  %v4607_v62 = vld [vmem:[%s5619_s23 + $0x7c] ss:$12 sps:$4 sm:$0xff]  }
 0x117   : > { %1143 = vmatprep.subr.bf16.mxu0 %v4591_v18  ;;  %4284 = vmatprep.subr.bf16.mxu1 %v4597_v54  ;;  %v4605_v60 = vld [vmem:[%s5619_s23 + $0x50] ss:$12 sps:$4 sm:$0xff]   ;;  %v4606_v61 = vld [vmem:[%s5619_s23 + $0x60] ss:$12 sps:$4 sm:$0xff]   ;;  %v4609_v63 = vld [vmem:[%s5619_s23 + $0x68] ss:$12 sps:$4 sm:$0xff]  }
 0x118   : > { %v4610_v0 = vld [vmem:[%s5619_s23 + $0x78] ss:$12 sps:$4 sm:$0xff]   ;;  %v4611_v1 = vld [vmem:[%s5619_s23 + $0x94] ss:$12 sps:$4 sm:$0xff]   ;;  %v4614_v3 = vld [vmem:[%s5619_s23 + $0x90] ss:$12 sps:$4 sm:$0xff]  }
 0x119   : > { %851 = vadd.xlane.f32.xlu0 %v837_v12  ;;  %853 = vadd.xlane.f32.xlu1 %v838_v13  ;;  %v4613_v2 = vld [vmem:[%s5619_s23 + $0x80] ss:$12 sps:$4 sm:$0xff]   ;;  %v4617_v5 = vld [vmem:[%s5619_s23 + $0x98] ss:$12 sps:$4 sm:$0xff]   ;;  %v4618_v6 = vld [vmem:[%s5619_s23 + $0xa8] ss:$12 sps:$4 sm:$0xff]  }
 0x11a   : > { %1144 = vmatpush1.bf16.msra.mxu0 %v4594_v52  ;;  %4285 = vmatpush3.bf16.msra.mxu1 %v4597_v54  ;;  %v4615_v4 = vld [vmem:[%s5619_s23 + $0xac] ss:$12 sps:$4 sm:$0xff]   ;;  %vm2413_vm2 = vcmask 785920   ;;  %vm2806_vm3 = vcmask 1048320   ;;  %p4144_p4 = scmp.ne.s32.totalorder %s5176_s21, 1 }
 0x11b   : > { %1145 = vmatprep.subr.bf16.mxu0 %v4595_v53  ;;  %4286 = vmatprep.subr.bf16.mxu1 %v4601_v57  ;;  %s6661_s27 = sld [smem:[#allocation38_spill]] (!%p4144_p4)  ;;  %s6662_s18 = sld [smem:[#allocation39_spill]] (!%p4144_p4) }
 0x11d   : > { %855 = vadd.xlane.f32.xlu0 %v839_v14  ;;  %857 = vadd.xlane.f32.xlu1 %v840_v15 }
 0x11e   : > { %1146 = vmatpush1.bf16.msra.mxu0 %v4598_v55  ;;  %4287 = vmatpush3.bf16.msra.mxu1 %v4601_v57 }
 0x11f   : > { %1147 = vmatprep.subr.bf16.mxu0 %v4599_v56  ;;  %4288 = vmatprep.subr.bf16.mxu1 %v4605_v60 }
 0x122   : > { %1148 = vmatpush1.bf16.msra.mxu0 %v4602_v58  ;;  %4289 = vmatpush3.bf16.msra.mxu1 %v4605_v60 }
 0x123   : > { %1149 = vmatprep.subr.bf16.mxu0 %v4603_v59  ;;  %4290 = vmatprep.subr.bf16.mxu1 %v4609_v63 }
 0x126   : > { %1150 = vmatpush1.bf16.msra.mxu0 %v4606_v61  ;;  %4291 = vmatpush3.bf16.msra.mxu1 %v4609_v63 }
 0x127   : > { %1151 = vmatprep.subr.bf16.mxu0 %v4607_v62  ;;  %4292 = vmatprep.subr.bf16.mxu1 %v4613_v2 }
 0x12a   : > { %1152 = vmatpush1.bf16.msra.mxu0 %v4610_v0  ;;  %4293 = vmatpush3.bf16.msra.mxu1 %v4613_v2 }
 0x12b   : > { %1153 = vmatprep.subr.bf16.mxu0 %v4611_v1  ;;  %4294 = vmatprep.subr.bf16.mxu1 %v4617_v5 }
 0x12e   : > { %1154 = vmatpush1.bf16.msra.mxu0 %v4614_v3  ;;  %4295 = vmatpush3.bf16.msra.mxu1 %v4617_v5 }
 0x12f   : > { %1155 = vmatprep.subr.bf16.mxu0 %v4615_v4 }
 0x132   : > { %1156 = vmatpush1.bf16.msra.mxu0 %v4618_v6 }
 0x19e   : > { %v844_v20 = vpop.xlane.xlu0 %843  ;;  %v848_v21 = vpop.xlane.xlu1 %847 }
 0x19f   : > { %v860_v22 = vmul.f32 0.0078125, %v844_v20  ;;  %v862_v23 = vmul.f32 0.0078125, %v848_v21 }
 0x1a1   : > { %v5674_v24 = vsub.f32 %v833_v8, %v860_v22  ;;  %v5676_v25 = vsub.f32 %v835_v9, %v862_v23  ;;  %v4619_v8 = vld [vmem:[%s5619_s23 + $0xb0] ss:$12 sps:$4 sm:$0xff]   ;;  %s6658_s23 = scalar_lea.vmem %s6579_s6, %s5637_s3 }
 0x1a2   : > { %v846_v26 = vpop.xlane.xlu0 %845  ;;  %v850_v27 = vpop.xlane.xlu1 %849  ;;  %4296 = vmatprep.subr.bf16.mxu1 %v4619_v8 }
 0x1a3   : > { %v861_v28 = vmul.f32 0.0078125, %v846_v26  ;;  %v876_v29 = vmul.f32 %v5674_v24, %v5674_v24  ;;  %v863_v30 = vmul.f32 0.0078125, %v850_v27  ;;  %v878_v31 = vmul.f32 %v5676_v25, %v5676_v25  ;;  %4297 = vmatpush3.bf16.msra.mxu1 %v4619_v8 }
 0x1a5   : > { %884 = vadd.xlane.f32.xlu0 %v876_v29  ;;  %v5682_v32 = vsub.f32 %v834_v10, %v861_v28  ;;  %v5684_v33 = vsub.f32 %v836_v11, %v863_v30 }
 0x1a6   : > { %v852_v34 = vpop.xlane.xlu0 %851  ;;  %v854_v35 = vpop.xlane.xlu1 %853 }
 0x1a7   : > { %v864_v36 = vmul.f32 0.0078125, %v852_v34  ;;  %v877_v37 = vmul.f32 %v5682_v32, %v5682_v32  ;;  %v865_v38 = vmul.f32 0.0078125, %v854_v35  ;;  %v879_v39 = vmul.f32 %v5684_v33, %v5684_v33 }
 0x1a9   : > { %888 = vadd.xlane.f32.xlu0 %v878_v31  ;;  %886 = vadd.xlane.f32.xlu1 %v877_v37  ;;  %v5690_v40 = vsub.f32 %v837_v12, %v864_v36  ;;  %v5692_v41 = vsub.f32 %v838_v13, %v865_v38  ;;  %v4042_v38 = vld [vmem:[%s6656_s0] ss:$0 sm:$0xff] }
 0x1aa   : > { %v856_v42 = vpop.xlane.xlu0 %855  ;;  %v858_v43 = vpop.xlane.xlu1 %857 }
 0x1ab   : > { %v866_v44 = vmul.f32 0.0078125, %v856_v42  ;;  %v880_v45 = vmul.f32 %v5690_v40, %v5690_v40  ;;  %v867_v46 = vmul.f32 0.0078125, %v858_v43  ;;  %v881_v47 = vmul.f32 %v5692_v41, %v5692_v41 }
 0x1ad   : > { %890 = vadd.xlane.f32.xlu1 %v879_v39  ;;  %892 = vadd.xlane.f32.xlu0 %v880_v45  ;;  %v5698_v48 = vsub.f32 %v839_v14, %v866_v44  ;;  %v5700_v49 = vsub.f32 %v840_v15, %v867_v46  ;;  %v4043_v46 = vld [vmem:[%s6657_s2] ss:$0 sm:$0xff] }
 0x1af   : > { %v882_v50 = vmul.f32 %v5698_v48, %v5698_v48  ;;  %v883_v51 = vmul.f32 %v5700_v49, %v5700_v49 }
 0x1b1   : > { %894 = vadd.xlane.f32.xlu1 %v881_v47  ;;  %896 = vadd.xlane.f32.xlu0 %v882_v50 }
 0x1b5   : > { %898 = vadd.xlane.f32.xlu1 %v883_v51 }
 0x232   : > { %v885_v9 = vpop.xlane.xlu0 %884 }
 0x233   : > { %v900_v10 = vmul.f32 0.0078125, %v885_v9 }
 0x235   : > { %v908_v11 = vadd.f32 1e-05, %v900_v10 }
 0x236   : > { %v887_v12 = vpop.xlane.xlu1 %886  ;;  %v889_v13 = vpop.xlane.xlu0 %888 }
 0x237   : > { %4668 = vrsqrt.f32 %v908_v11  ;;  %v901_v14 = vmul.f32 0.0078125, %v887_v12  ;;  %v902_v15 = vmul.f32 0.0078125, %v889_v13  ;;  %v996_v11 = vld [vmem:[%s5655_s15] sm:$0x7] }
 0x239   : > { %v909_v16 = vadd.f32 1e-05, %v901_v14  ;;  %v910_v17 = vadd.f32 1e-05, %v902_v15 }
 0x23a   : > { %v891_v18 = vpop.xlane.xlu1 %890  ;;  %v893_v19 = vpop.xlane.xlu0 %892 }
 0x23b   : > { %4670 = vrsqrt.f32 %v909_v16  ;;  %v903_v20 = vmul.f32 0.0078125, %v891_v18  ;;  %v904_v21 = vmul.f32 0.0078125, %v893_v19 }
 0x23c   : > { %4672 = vrsqrt.f32 %v910_v17 }
 0x23d   : > { %v911_v22 = vadd.f32 1e-05, %v903_v20  ;;  %v912_v23 = vadd.f32 1e-05, %v904_v21 }
 0x23e   : > { %v895_v26 = vpop.xlane.xlu1 %894  ;;  %v897_v27 = vpop.xlane.xlu0 %896 }
 0x23f   : > { %4674 = vrsqrt.f32 %v911_v22  ;;  %v905_v28 = vmul.f32 0.0078125, %v895_v26  ;;  %v906_v29 = vmul.f32 0.0078125, %v897_v27 }
 0x240   : > { %4676 = vrsqrt.f32 %v912_v23 }
 0x241   : > { %v4669_v30 = vpop.eup %4668  ;;  %v913_v31 = vadd.f32 1e-05, %v905_v28  ;;  %v914_v34 = vadd.f32 1e-05, %v906_v29 }
 0x242   : > { %v899_v35 = vpop.xlane.xlu1 %898  ;;  %v924_v36 = vmul.f32 %v4669_v30, %v5674_v24 }
 0x243   : > { %4678 = vrsqrt.f32 %v913_v31  ;;  %v907_v37 = vmul.f32 0.0078125, %v899_v35 }
 0x244   : > { %4680 = vrsqrt.f32 %v914_v34  ;;  %v938_v45 = vmul.f32 %v4042_v38, %v924_v36 }
 0x245   : > { %v4671_v39 = vpop.eup %4670  ;;  %v915_v42 = vadd.f32 1e-05, %v907_v37 }
 0x246   : > { %v4673_v43 = vpop.eup %4672  ;;  %v925_v44 = vmul.f32 %v4671_v39, %v5682_v32  ;;  %v952_v53 = vadd.f32 %v4043_v46, %v938_v45 }
 0x247   : > { %4682 = vrsqrt.f32 %v915_v42  ;;  %v926_v47 = vmul.f32 %v4673_v43, %v5676_v25 }
 0x248   : > { %v939_v50 = vmul.f32 %v4042_v38, %v925_v44 }
 0x249   : > { %v4675_v51 = vpop.eup %4674  ;;  %v940_v52 = vmul.f32 %v4042_v38, %v926_v47 }
 0x24a   : > { %v4677_v24 = vpop.eup %4676  ;;  %v953_v54 = vadd.f32 %v4043_v46, %v939_v50  ;;  %v927_v55 = vmul.f32 %v4675_v51, %v5684_v33 }
 0x24b   : > { %v928_v56 = vmul.f32 %v4677_v24, %v5690_v40  ;;  %v954_v32 = vadd.f32 %v4043_v46, %v940_v52 }
 0x24c   : > { %v960_v57 = vpack.c.bf16 %v953_v54, %v952_v53  ;;  %v941_v58 = vmul.f32 %v4042_v38, %v927_v55 }
 0x24d   : > { %v4679_v59 = vpop.eup %4678  ;;  %v942_v62 = vmul.f32 %v4042_v38, %v928_v56 }
 0x24e   : > { %v4681_v60 = vpop.eup %4680  ;;  %1174 = vmatmul.mubr.bf16.vlgmr.msra.gmra.mrb[0].mxu0 %v960_v57  ;;  %4298 = vmatprep.mubr.bf16.mxu1 %v960_v57  ;;  %v955_v61 = vadd.f32 %v4043_v46, %v941_v58  ;;  %v929_v25 = vmul.f32 %v4679_v59, %v5692_v41 }
 0x24f   : > { %1183 = vmatprep.mubr.bf16.mxu0 %v5199_v7  ;;  %v930_v63 = vmul.f32 %v4681_v60, %v5698_v48  ;;  %v956_v40 = vadd.f32 %v4043_v46, %v942_v62  ;;  %v998_v48 = vlaneseq }
 0x250   : > { %v961_v0 = vpack.c.bf16 %v955_v61, %v954_v32  ;;  %v943_v1 = vmul.f32 %v4042_v38, %v929_v25 }
 0x251   : > { %v4683_v33 = vpop.eup %4682  ;;  %v944_v4 = vmul.f32 %v4042_v38, %v930_v63  ;;  %v5742_v10 = vshrl.u32 %v998_v48, 7 }
 0x252   : > { %4299 = vmatmul.mubr.bf16.vlgmr.msra.gmra.mrb[0].mxu1 %v961_v0  ;;  %v957_v2 = vadd.f32 %v4043_v46, %v943_v1  ;;  %v931_v3 = vmul.f32 %v4683_v33, %v5700_v49 }
 0x253   : > { %v958_v41 = vadd.f32 %v4043_v46, %v944_v4  ;;  %v1000_v49 = vsub.s32 0, %v5742_v10  ;;  %v1004_v12 = vsub.s32 1, %v5742_v10  ;;  %v1008_v14 = vsub.s32 2, %v5742_v10 }
 0x254   : > { %v962_v5 = vpack.c.bf16 %v957_v2, %v956_v40  ;;  %v945_v6 = vmul.f32 %v4042_v38, %v931_v3 }
 0x255   : > { %v5749_v13 = vrot.slane %v996_v11, %v1000_v49  ;;  %v5754_v16 = vrot.slane %v996_v11, %v1004_v12  ;;  %v1009_v22 = vrot.slane %v996_v11, %v1008_v14 }
 0x256   : > { %1184 = vmatmul.mubr.bf16.gmra.mrb[4].mxu0 %v961_v0  ;;  %4302 = vmatprep.mubr.bf16.mxu1 %v962_v5  ;;  %v959_v8 = vadd.f32 %v4043_v46, %v945_v6 }
 0x257   : > { %1193 = vmatprep.mubr.bf16.mxu0 %v5199_v7 }
 0x258   : > { %v963_v9 = vpack.c.bf16 %v959_v8, %v958_v41 }
 0x25a   : > { %4303 = vmatmul.mubr.bf16.gmra.mrb[4].mxu1 %v963_v9 }
 0x25e   : > { %1194 = vmatmul.mubr.bf16.gmra.mrb[8].mxu0 %v962_v5 }
 0x25f   : > { %1203 = vmatprep.mubr.bf16.mxu0 %v5199_v7 }
 0x266   : > { %1204 = vmatmul.mubr.bf16.gmra.mrb[12].mxu0 %v963_v9 }
 0x321   : > { %v1175_v15 = vpop.f32.mrb[0].mxu0 }
 0x322   : > { %v1177_v17 = vpop.f32.mrb[1].mxu0  ;;  %v1176_v19 = vadd.f32 %v1175_v15, %v5749_v13 }
 0x323   : > { %v1179_v18 = vpop.f32.mrb[2].mxu0  ;;  %v1178_v23 = vadd.f32 %v1177_v17, %v5754_v16 }
 0x324   : > { %v1180_v20 = vadd.f32 %v1179_v18, %v5749_v13  ;;  %v1181_v21 = vpop.f32.mrb[3].mxu0 }
 0x325   : > { %v1182_v26 = vadd.f32 %v1181_v21, %v5754_v16  ;;  %v4300_v27 = vpop.f32.mrb[0].mxu1 }
 0x326   : > { %v5760_v28 = vpack.c.bf16 %v1180_v20, %v1176_v19  ;;  %v1248_v29 = vpop.f32.mrb[1].mxu1  ;;  %v1257_v34 = vadd.f32 %v4300_v27, %v1009_v22 }
 0x327   : > { %v5762_v30 = vpack.c.bf16 %v1182_v26, %v1178_v23  ;;  %v4301_v31 = vpop.f32.mrb[2].mxu1  ;;  %v1249_v37 = vadd.f32 %v1248_v29, %v1009_v22 }
 0x328   : > { %v1260_v35 = vadd.f32 %v4301_v31, %v1009_v22  ;;  %v1251_v36 = vpop.f32.mrb[3].mxu1  ;;  %4310 = vmatprep.mubr.msk.bf16.mxu1 %vm1291_vm0, %v5760_v28 }
 0x329   : > { %v1252_v38 = vadd.f32 %v1251_v36, %v1009_v22  ;;  %v1185_v39 = vpop.f32.mrb[4].mxu0  ;;  %4458 = vmatprep.subr.msk.bf16.mxu1 %vm1291_vm0, %v5762_v30  ;;  %v1299_v42 = vsel %vm1291_vm0, %v5762_v30, 0 }
 0x32a   : > { %v5770_v43 = vpack.c.bf16 %v1260_v35, %v1257_v34  ;;  %v1187_v44 = vpop.f32.mrb[5].mxu0  ;;  %4307 = vmatpush3.bf16.xpose.msra.mxu1 %v1299_v42  ;;  %v1186_v47 = vadd.f32 %v1185_v39, %v5749_v13 }
 0x32b   : > { %v5772_v45 = vpack.c.bf16 %v1252_v38, %v1249_v37  ;;  %v1189_v46 = vpop.f32.mrb[6].mxu0  ;;  %v1188_v52 = vadd.f32 %v1187_v44, %v5754_v16 }
 0x32c   : > { %v1190_v50 = vadd.f32 %v1189_v46, %v5749_v13  ;;  %v1191_v51 = vpop.f32.mrb[7].mxu0 }
 0x32d   : > { %v1192_v24 = vadd.f32 %v1191_v51, %v5754_v16  ;;  %v4304_v53 = vpop.f32.mrb[4].mxu1 }
 0x32e   : > { %v5778_v54 = vpack.c.bf16 %v1190_v50, %v1186_v47  ;;  %v1273_v55 = vadd.f32 %v4304_v53, %v1009_v22  ;;  %v1264_v56 = vpop.f32.mrb[5].mxu1 }
 0x32f   : > { %v5780_v57 = vpack.c.bf16 %v1192_v24, %v1188_v52  ;;  %v4305_v58 = vpop.f32.mrb[6].mxu1  ;;  %v1265_v60 = vadd.f32 %v1264_v56, %v1009_v22 }
 0x330   : > { %v1276_v59 = vadd.f32 %v4305_v58, %v1009_v22  ;;  %v1267_v32 = vpop.f32.mrb[7].mxu1 }
 0x331   : > { %v1268_v61 = vadd.f32 %v1267_v32, %v1009_v22  ;;  %v1195_v25 = vpop.f32.mrb[8].mxu0  ;;  %4459 = vmatprep.subr.msk.bf16.mxu1 %vm1291_vm0, %v5780_v57  ;;  %v1302_v62 = vsel %vm1291_vm0, %v5780_v57, 0 }
 0x332   : > { %v5786_v63 = vpack.c.bf16 %v1276_v59, %v1273_v55  ;;  %v1197_v0 = vpop.f32.mrb[9].mxu0  ;;  %4309 = vmatpush3.bf16.xpose.msra.mxu1 %v1302_v62  ;;  %v1196_v40 = vadd.f32 %v1195_v25, %v5749_v13 }
 0x333   : > { %v5788_v1 = vpack.c.bf16 %v1268_v61, %v1265_v60  ;;  %v1199_v33 = vpop.f32.mrb[10].mxu0  ;;  %v1198_v4 = vadd.f32 %v1197_v0, %v5754_v16 }
 0x334   : > { %v1200_v2 = vadd.f32 %v1199_v33, %v5749_v13  ;;  %v1201_v3 = vpop.f32.mrb[11].mxu0 }
 0x335   : > { %v1202_v5 = vadd.f32 %v1201_v3, %v5754_v16 }
 0x336   : > { %v5794_v6 = vpack.c.bf16 %v1200_v2, %v1196_v40 }
 0x337   : > { %v5796_v41 = vpack.c.bf16 %v1202_v5, %v1198_v4 }
 0x339   : > { %v1205_v8 = vpop.f32.mrb[12].mxu0  ;;  %4311 = vmatmul.mubr.msk.bf16.vlgmr.msra.gmra.mrb[8].mxu1 %vm1291_vm0, %v5778_v54  ;;  %4460 = vmatprep.subr.msk.bf16.mxu1 %vm1291_vm0, %v5796_v41  ;;  %v1360_v9 = vsel %vm1291_vm0, %v5796_v41, 0 }
 0x33a   : > { %v1207_v48 = vpop.f32.mrb[13].mxu0  ;;  %4315 = vmatpush3.bf16.xpose.msra.mxu1 %v1360_v9  ;;  %4318 = vmatprep.mubr.msk.bf16.mxu1 %vm1291_vm0, %v5794_v6  ;;  %v1206_v14 = vadd.f32 %v1205_v8, %v5749_v13 }
 0x33b   : > { %v1209_v11 = vpop.f32.mrb[14].mxu0  ;;  %v1208_v18 = vadd.f32 %v1207_v48, %v5754_v16 }
 0x33c   : > { %v1210_v15 = vadd.f32 %v1209_v11, %v5749_v13  ;;  %v1211_v17 = vpop.f32.mrb[15].mxu0 }
 0x33d   : > { %v1212_v19 = vadd.f32 %v1211_v17, %v5754_v16 }
 0x33e   : > { %v5810_v20 = vpack.c.bf16 %v1210_v15, %v1206_v14 }
 0x33f   : > { %v5812_v21 = vpack.c.bf16 %v1212_v19, %v1208_v18 }
 0x341   : > { %4461 = vmatprep.subr.msk.bf16.mxu1 %vm1291_vm0, %v5812_v21  ;;  %v1363_v22 = vsel %vm1291_vm0, %v5812_v21, 0 }
 0x342   : > { %4317 = vmatpush3.bf16.xpose.msra.mxu1 %v1363_v22 }
 0x343   : > { %4322 = vmatprep.subr.bf16.mxu1 %v5772_v45 }
 0x349   : > { %4319 = vmatmul.mubr.msk.bf16.vlgmr.msra.gmra.mrb[12].mxu1 %vm1291_vm0, %v5810_v20 }
 0x34a   : > { %4323 = vmatpush3.bf16.msra.mxu1 %v5772_v45 }
 0x34b   : > { %4324 = vmatprep.subr.bf16.mxu1 %v5770_v43 }
 0x34e   : > { %4325 = vmatpush3.bf16.msra.mxu1 %v5770_v43 }
 0x34f   : > { %4330 = vmatprep.subr.bf16.mxu1 %v5788_v1 }
 0x40c   : > { %v4312_v13 = vpop.f32.mrb[8].mxu1 }
 0x40d   : > { %v1338_v16 = vpop.f32.mrb[9].mxu1  ;;  %v1420_v31 = vsel %vm1291_vm0, %v4312_v13, -inf }
 0x40e   : > { %v4313_v23 = vpop.f32.mrb[10].mxu1  ;;  %v1414_v26 = vsel %vm1291_vm0, %v1338_v16, -inf }
 0x40f   : > { %1415 = vmax.xlane.f32.xlu0 %v1414_v26  ;;  %v1341_v27 = vpop.f32.mrb[11].mxu1  ;;  %v1423_v34 = vsel %vm1291_vm0, %v4313_v23, -inf }
 0x410   : > { %v1417_v29 = vsel %vm1291_vm0, %v1341_v27, -inf }
 0x411   : > { %1418 = vmax.xlane.f32.xlu1 %v1417_v29 }
 0x413   : > { %1421 = vmax.xlane.f32.xlu0 %v1420_v31 }
 0x415   : > { %1424 = vmax.xlane.f32.xlu1 %v1423_v34 }
 0x41c   : > { %v5829_v35 = vpop.f32.mrb[12].mxu1 }
 0x41d   : > { %v5831_v36 = vpop.f32.mrb[13].mxu1  ;;  %v1432_v44 = vsel %vm1291_vm0, %v5829_v35, -inf }
 0x41e   : > { %v4321_v37 = vpop.f32.mrb[14].mxu1  ;;  %v1426_v38 = vsel %vm1291_vm0, %v5831_v36, -inf }
 0x41f   : > { %1427 = vmax.xlane.f32.xlu0 %v1426_v38  ;;  %v1402_v39 = vpop.f32.mrb[15].mxu1  ;;  %v1435_v46 = vsel %vm1291_vm0, %v4321_v37, -inf }
 0x420   : > { %v1429_v42 = vsel %vm1291_vm0, %v1402_v39, -inf }
 0x421   : > { %1430 = vmax.xlane.f32.xlu1 %v1429_v42 }
 0x423   : > { %1433 = vmax.xlane.f32.xlu0 %v1432_v44 }
 0x425   : > { %1436 = vmax.xlane.f32.xlu1 %v1435_v46 }
 0x436   : > { %1634 = vrot.lane.b32.xlu1 %v5780_v57, %s5200_s5 }
 0x43a   : > { %1626 = vrot.lane.b32.xlu1 %v5760_v28, %s5200_s5 }
 0x49c   : > { %v1416_v47 = vpop.xlane.xlu0 %1415 }
 0x49d   : > { %v1438_v50 = vsub.f32 %v1338_v16, %v1416_v47 }
 0x49e   : > { %v1419_v51 = vpop.xlane.xlu1 %1418 }
 0x49f   : > { %v1439_v24 = vsub.f32 %v1341_v27, %v1419_v51  ;;  %v1446_v55 = vmul.f32 1.442695, %v1438_v50 }
 0x4a0   : > { %v1422_v52 = vpop.xlane.xlu0 %1421 }
 0x4a1   : > { %v1440_v53 = vsub.f32 %v4312_v13, %v1422_v52  ;;  %v1448_v32 = vmul.f32 1.442695, %v1439_v24 }
 0x4a2   : > { %v1425_v56 = vpop.xlane.xlu1 %1424 }
 0x4a3   : > { %v1450_v58 = vmul.f32 1.442695, %v1440_v53  ;;  %v1441_v59 = vsub.f32 %v4313_v23, %v1425_v56 }
 0x4a5   : > { %4684 = vpow2.f32 %v1450_v58  ;;  %v1452_v60 = vmul.f32 1.442695, %v1441_v59 }
 0x4a6   : > { %4686 = vpow2.f32 %v1446_v55 }
 0x4a7   : > { %4688 = vpow2.f32 %v1452_v60 }
 0x4a8   : > { %4690 = vpow2.f32 %v1448_v32 }
 0x4ac   : > { %v1428_v13 = vpop.xlane.xlu0 %1427 }
 0x4ad   : > { %v1442_v26 = vsub.f32 %v5831_v36, %v1428_v13 }
 0x4ae   : > { %v1431_v61 = vpop.xlane.xlu1 %1430 }
 0x4af   : > { %v5843_v25 = vpop.eup %4684  ;;  %v1443_v40 = vsub.f32 %v1402_v39, %v1431_v61  ;;  %v1454_v29 = vmul.f32 1.442695, %v1442_v26 }
 0x4b0   : > { %v5845_v62 = vpop.eup %4686  ;;  %v1468_v0 = vsel %vm1291_vm0, %v5843_v25, 0.0  ;;  %v1434_v16 = vpop.xlane.xlu0 %1433 }
 0x4b1   : > { %v4689_v33 = vpop.eup %4688  ;;  %1469 = vadd.xlane.f32.xlu0 %v1468_v0  ;;  %v1462_v8 = vsel %vm1291_vm0, %v5845_v62, 0.0  ;;  %v1456_v9 = vmul.f32 1.442695, %v1443_v40  ;;  %v1444_v23 = vsub.f32 %v5829_v35, %v1434_v16 }
 0x4b2   : > { %v1437_v2 = vpop.xlane.xlu1 %1436  ;;  %v1471_v3 = vsel %vm1291_vm0, %v4689_v33, 0.0  ;;  %v4691_v4 = vpop.eup %4690 }
 0x4b3   : > { %v1445_v5 = vsub.f32 %v4321_v37, %v1437_v2  ;;  %1472 = vadd.xlane.f32.xlu1 %v1471_v3  ;;  %v1465_v14 = vsel %vm1291_vm0, %v4691_v4, 0.0  ;;  %v1458_v27 = vmul.f32 1.442695, %v1444_v23 }
 0x4b5   : > { %v1460_v48 = vmul.f32 1.442695, %v1445_v5  ;;  %1463 = vadd.xlane.f32.xlu0 %v1462_v8 }
 0x4b6   : > { %v1635_v11 = vpop.permute.xlu1 %1634 }
 0x4b7   : > { %4692 = vpow2.f32 %v1460_v48  ;;  %1466 = vadd.xlane.f32.xlu1 %v1465_v14  ;;  %v1646_v53 = vsel %vm1291_vm0, %v1635_v11, 0 }
 0x4b8   : > { %4694 = vpow2.f32 %v1456_v9 }
 0x4b9   : > { %4696 = vpow2.f32 %v1458_v27 }
 0x4ba   : > { %v1627_v15 = vpop.permute.xlu1 %1626  ;;  %4698 = vpow2.f32 %v1454_v29 }
 0x4bb   : > { %4342 = vmatprep.mubr.msk.bf16.mxu0 %vm1291_vm0, %v1627_v15 }
 0x4c1   : > { %v5854_v17 = vpop.eup %4692 }
 0x4c2   : > { %v1483_v18 = vsel %vm1291_vm0, %v5854_v17, 0.0  ;;  %v5858_v19 = vpop.eup %4694 }
 0x4c3   : > { %1484 = vadd.xlane.f32.xlu1 %v1483_v18  ;;  %v1477_v22 = vsel %vm1291_vm0, %v5858_v19, 0.0  ;;  %v4697_v31 = vpop.eup %4696 }
 0x4c4   : > { %v1480_v34 = vsel %vm1291_vm0, %v4697_v31, 0.0  ;;  %v4699_v37 = vpop.eup %4698 }
 0x4c5   : > { %v1474_v35 = vsel %vm1291_vm0, %v4699_v37, 0.0 }
 0x4c7   : > { %1478 = vadd.xlane.f32.xlu1 %v1477_v22 }
 0x4cb   : > { %1632 = vrot.lane.b32.xlu0 %v5762_v30, %s5200_s5 }
 0x4d8   : > { %1628 = vrot.lane.b32.xlu1 %v5778_v54, %s5200_s5 }
 0x4dc   : > { %1707 = vrot.lane.b32.xlu1 %v5812_v21, %s5200_s5 }
 0x4e0   : > { %1701 = vrot.lane.b32.xlu1 %v5810_v20, %s5200_s5 }
 0x4ea   : > { %1481 = vadd.xlane.f32.xlu0 %v1480_v34 }
 0x4ee   : > { %1475 = vadd.xlane.f32.xlu0 %v1474_v35 }
 0x504   : > { %1705 = vrot.lane.b32.xlu0 %v5796_v41, %s5200_s5 }
 0x508   : > { %1699 = vrot.lane.b32.xlu0 %v5794_v6, %s5200_s5 }
 0x53e   : > { %v1470_v36 = vpop.xlane.xlu0 %1469 }
 0x540   : > { %v1473_v38 = vpop.xlane.xlu1 %1472 }
 0x541   : > { %4700 = vrcp.f32 %v1473_v38 }
 0x542   : > { %v1464_v39 = vpop.xlane.xlu0 %1463 }
 0x543   : > { %4702 = vrcp.f32 %v1464_v39 }
 0x544   : > { %4704 = vrcp.f32 %v1470_v36  ;;  %v1467_v42 = vpop.xlane.xlu1 %1466 }
 0x545   : > { %4706 = vrcp.f32 %v1467_v42 }
 0x546   : > { %v1633_v44 = vpop.permute.xlu0 %1632 }
 0x547   : > { %4462 = vmatprep.subr.msk.bf16.mxu0 %vm1291_vm0, %v1633_v44  ;;  %v1643_v46 = vsel %vm1291_vm0, %v1633_v44, 0 }
 0x548   : > { %4339 = vmatpush3.bf16.xpose.msra.mxu0 %v1643_v46 }
 0x549   : > { %4463 = vmatprep.subr.msk.bf16.mxu0 %vm1291_vm0, %v1635_v11 }
 0x54b   : > { %v4701_v47 = vpop.eup %4700 }
 0x54c   : > { %v1497_v24 = vmul.f32 %v4701_v47, %v4689_v33 }
 0x54d   : > { %v4703_v50 = vpop.eup %4702 }
 0x54e   : > { %v4705_v51 = vpop.eup %4704  ;;  %v1494_v56 = vmul.f32 %v4703_v50, %v5845_v62 }
 0x54f   : > { %v4707_v52 = vpop.eup %4706  ;;  %v1496_v59 = vmul.f32 %v4705_v51, %v5843_v25 }
 0x550   : > { %4341 = vmatpush3.bf16.xpose.msra.mxu0 %v1646_v53  ;;  %v1485_v55 = vpop.xlane.xlu1 %1484  ;;  %v1495_v58 = vmul.f32 %v4707_v52, %v4691_v4 }
 0x551   : > { %v1503_v60 = vpack.c.bf16 %v1497_v24, %v1496_v59 }
 0x552   : > { %v1502_v32 = vpack.c.bf16 %v1495_v58, %v1494_v56 }
 0x554   : > { %4326 = vmatprep.mubr.msk.bf16.mxu1 %vm1291_vm0, %v1502_v32  ;;  %v1479_v61 = vpop.xlane.xlu1 %1478 }
 0x555   : > { %4327 = vmatmul.mubr.msk.bf16.vlgmr.msra.gmra.mrb[16].mxu1 %vm1291_vm0, %v1503_v60 }
 0x556   : > { %4331 = vmatpush3.bf16.msra.mxu1 %v5788_v1 }
 0x557   : > { %4332 = vmatprep.subr.bf16.mxu1 %v5786_v63 }
 0x558   : > { %v1629_v0 = vpop.permute.xlu1 %1628 }
 0x559   : > { %4343 = vmatmul.mubr.msk.bf16.vlgmr.msra.gmra.mrb[16].mxu0 %vm1291_vm0, %v1629_v0 }
 0x55a   : > { %4333 = vmatpush3.bf16.msra.mxu1 %v5786_v63 }
 0x55c   : > { %v1708_v22 = vpop.permute.xlu1 %1707 }
 0x55d   : > { %v1719_v13 = vsel %vm1291_vm0, %v1708_v22, 0 }
 0x577   : > { %v1482_v62 = vpop.xlane.xlu0 %1481 }
 0x578   : > { %4708 = vrcp.f32 %v1482_v62 }
 0x579   : > { %4710 = vrcp.f32 %v1479_v61 }
 0x57a   : > { %4712 = vrcp.f32 %v1485_v55 }
 0x57b   : > { %v1476_v25 = vpop.xlane.xlu0 %1475 }
 0x57c   : > { %4714 = vrcp.f32 %v1476_v25 }
 0x57f   : > { %v1706_v33 = vpop.permute.xlu0 %1705 }
 0x580   : > { %4464 = vmatprep.subr.msk.bf16.mxu1 %vm1291_vm0, %v1706_v33  ;;  %v1716_v18 = vsel %vm1291_vm0, %v1706_v33, 0 }
 0x582   : > { %v4709_v40 = vpop.eup %4708 }
 0x583   : > { %v4711_v2 = vpop.eup %4710  ;;  %v1500_v5 = vmul.f32 %v4709_v40, %v4697_v31  ;;  %v1700_v15 = vpop.permute.xlu0 %1699 }
 0x584   : > { %v4713_v3 = vpop.eup %4712  ;;  %v1499_v9 = vmul.f32 %v4711_v2, %v5858_v19  ;;  %v1702_v19 = vpop.permute.xlu1 %1701 }
 0x585   : > { %v1501_v48 = vmul.f32 %v4713_v3, %v5854_v17 }
 0x586   : > { %v4715_v4 = vpop.eup %4714 }
 0x587   : > { %v1498_v8 = vmul.f32 %v4715_v4, %v4699_v37  ;;  %v1505_v14 = vpack.c.bf16 %v1501_v48, %v1500_v5 }
 0x589   : > { %v1504_v11 = vpack.c.bf16 %v1499_v9, %v1498_v8 }
 0x58b   : > { %4334 = vmatprep.mubr.msk.bf16.mxu1 %vm1291_vm0, %v1504_v11 }
 0x58c   : > { %4335 = vmatmul.mubr.msk.bf16.vlgmr.msra.gmra.mrb[20].mxu1 %vm1291_vm0, %v1505_v14 }
 0x58d   : > { %4347 = vmatpush3.bf16.xpose.msra.mxu1 %v1716_v18  ;;  %4350 = vmatprep.mubr.msk.bf16.mxu1 %vm1291_vm0, %v1700_v15 }
 0x58e   : > { %4465 = vmatprep.subr.msk.bf16.mxu1 %vm1291_vm0, %v1708_v22 }
 0x595   : > { %4349 = vmatpush3.bf16.xpose.msra.mxu1 %v1719_v13 }
 0x59c   : > { %4351 = vmatmul.mubr.msk.bf16.vlgmr.msra.gmra.mrb[24].mxu1 %vm1291_vm0, %v1702_v19 }
 0x628   : > { %v4328_v17 = vpop.f32.mrb[16].mxu1 }
 0x629   : > { %1618 = vst.msk [vmem:[#allocation3 + $0x10] sm:$0xff] %vm1291_vm0, %v4328_v17  ;;  %v1546_v16 = vpop.f32.mrb[17].mxu1 }
 0x62a   : > { %1616 = vst.msk [vmem:[#allocation3] sm:$0xff] %vm1291_vm0, %v1546_v16  ;;  %v4329_v23 = vpop.f32.mrb[18].mxu1 }
 0x62b   : > { %1619 = vst.msk [vmem:[#allocation3 + $0x18] sm:$0xff] %vm1291_vm0, %v4329_v23  ;;  %v1549_v26 = vpop.f32.mrb[19].mxu1 }
 0x62c   : > { %1617 = vst.msk [vmem:[#allocation3 + $0x8] sm:$0xff] %vm1291_vm0, %v1549_v26  ;;  %v4344_v27 = vpop.f32.mrb[16].mxu0 }
 0x62d   : > { %v1682_v29 = vpop.f32.mrb[17].mxu0  ;;  %v1776_v36 = vsel %vm1291_vm0, %v4344_v27, -inf }
 0x62e   : > { %v4345_v31 = vpop.f32.mrb[18].mxu0  ;;  %v1770_v34 = vsel %vm1291_vm0, %v1682_v29, -inf }
 0x62f   : > { %1771 = vmax.xlane.f32.xlu0 %v1770_v34  ;;  %v1685_v37 = vpop.f32.mrb[19].mxu0  ;;  %v1779_v38 = vsel %vm1291_vm0, %v4345_v31, -inf }
 0x630   : > { %v1773_v35 = vsel %vm1291_vm0, %v1685_v37, -inf }
 0x631   : > { %1774 = vmax.xlane.f32.xlu1 %v1773_v35 }
 0x633   : > { %1777 = vmax.xlane.f32.xlu0 %v1776_v36 }
 0x637   : > { %1780 = vmax.xlane.f32.xlu0 %v1779_v38 }
 0x65f   : > { %v4336_v39 = vpop.f32.mrb[20].mxu1 }
 0x660   : > { %1622 = vst.msk [vmem:[#allocation3 + $0x30] sm:$0xff] %vm1291_vm0, %v4336_v39  ;;  %v1601_v42 = vpop.f32.mrb[21].mxu1 }
 0x661   : > { %1620 = vst.msk [vmem:[#allocation3 + $0x20] sm:$0xff] %vm1291_vm0, %v1601_v42  ;;  %v4337_v44 = vpop.f32.mrb[22].mxu1 }
 0x662   : > { %1623 = vst.msk [vmem:[#allocation3 + $0x38] sm:$0xff] %vm1291_vm0, %v4337_v44  ;;  %v1604_v46 = vpop.f32.mrb[23].mxu1 }
 0x663   : > { %1621 = vst.msk [vmem:[#allocation3 + $0x28] sm:$0xff] %vm1291_vm0, %v1604_v46 }
 0x66f   : > { %v4352_v47 = vpop.f32.mrb[24].mxu1 }
 0x670   : > { %v1755_v50 = vpop.f32.mrb[25].mxu1  ;;  %v1788_v55 = vsel %vm1291_vm0, %v4352_v47, -inf }
 0x671   : > { %v4353_v51 = vpop.f32.mrb[26].mxu1  ;;  %v1782_v52 = vsel %vm1291_vm0, %v1755_v50, -inf }
 0x672   : > { %1783 = vmax.xlane.f32.xlu0 %v1782_v52  ;;  %v1758_v24 = vpop.f32.mrb[27].mxu1  ;;  %v1791_v56 = vsel %vm1291_vm0, %v4353_v51, -inf }
 0x673   : > { %v1785_v53 = vsel %vm1291_vm0, %v1758_v24, -inf }
 0x674   : > { %1786 = vmax.xlane.f32.xlu1 %v1785_v53 }
 0x676   : > { %1789 = vmax.xlane.f32.xlu0 %v1788_v55 }
 0x678   : > { %1792 = vmax.xlane.f32.xlu1 %v1791_v56 }
 0x6bc   : > { %v1772_v58 = vpop.xlane.xlu0 %1771 }
 0x6bd   : > { %v1794_v59 = vsub.f32 %v1682_v29, %v1772_v58 }
 0x6be   : > { %v1775_v32 = vpop.xlane.xlu1 %1774 }
 0x6bf   : > { %v1802_v60 = vmul.f32 1.442695, %v1794_v59  ;;  %v1795_v61 = vsub.f32 %v1685_v37, %v1775_v32 }
 0x6c0   : > { %v1778_v0 = vpop.xlane.xlu0 %1777 }
 0x6c1   : > { %4716 = vpow2.f32 %v1802_v60  ;;  %v1804_v62 = vmul.f32 1.442695, %v1795_v61  ;;  %v1796_v25 = vsub.f32 %v4344_v27, %v1778_v0 }
 0x6c3   : > { %4718 = vpow2.f32 %v1804_v62  ;;  %v1806_v33 = vmul.f32 1.442695, %v1796_v25 }
 0x6c4   : > { %v1781_v40 = vpop.xlane.xlu0 %1780 }
 0x6c5   : > { %4720 = vpow2.f32 %v1806_v33  ;;  %v1797_v2 = vsub.f32 %v4345_v31, %v1781_v40 }
 0x6c7   : > { %v1808_v3 = vmul.f32 1.442695, %v1797_v2 }
 0x6c9   : > { %4722 = vpow2.f32 %v1808_v3 }
 0x6cb   : > { %v5916_v4 = vpop.eup %4716 }
 0x6cc   : > { %v1818_v5 = vsel %vm1291_vm0, %v5916_v4, 0.0 }
 0x6cd   : > { %v5920_v8 = vpop.eup %4718  ;;  %1819 = vadd.xlane.f32.xlu0 %v1818_v5 }
 0x6ce   : > { %v1821_v9 = vsel %vm1291_vm0, %v5920_v8, 0.0 }
 0x6cf   : > { %v5924_v48 = vpop.eup %4720  ;;  %1822 = vadd.xlane.f32.xlu1 %v1821_v9 }
 0x6d0   : > { %v1824_v11 = vsel %vm1291_vm0, %v5924_v48, 0.0 }
 0x6d1   : > { %1825 = vadd.xlane.f32.xlu0 %v1824_v11 }
 0x6d3   : > { %v5928_v14 = vpop.eup %4722 }
 0x6d4   : > { %v1827_v15 = vsel %vm1291_vm0, %v5928_v14, 0.0 }
 0x6d5   : > { %1828 = vadd.xlane.f32.xlu1 %v1827_v15 }
 0x6e6   : > { %1866 = vrot.lane.b32.xlu1 %v5770_v43, %s5200_s5 }
 0x6e7   : > { %1864 = vrot.lane.b32.xlu0 %v5772_v45, %s5200_s5 }
 0x6ea   : > { %1927 = vrot.lane.b32.xlu1 %v5788_v1, %s5200_s5 }
 0x6eb   : > { %2033 = vrot.lane.b32.xlu0 %v5762_v30, %s5201_s11 }
 0x6ee   : > { %2035 = vrot.lane.b32.xlu1 %v5780_v57, %s5201_s11 }
 0x6ef   : > { %1929 = vrot.lane.b32.xlu0 %v5786_v63, %s5200_s5 }
 0x6f3   : > { %2029 = vrot.lane.b32.xlu0 %v5760_v28, %s5201_s11 }
 0x6ff   : > { %v1784_v18 = vpop.xlane.xlu0 %1783 }
 0x700   : > { %v1798_v22 = vsub.f32 %v1755_v50, %v1784_v18 }
 0x701   : > { %v1787_v13 = vpop.xlane.xlu1 %1786 }
 0x702   : > { %v1810_v19 = vmul.f32 1.442695, %v1798_v22  ;;  %v1799_v26 = vsub.f32 %v1758_v24, %v1787_v13 }
 0x703   : > { %v1790_v17 = vpop.xlane.xlu0 %1789 }
 0x704   : > { %4724 = vpow2.f32 %v1810_v19  ;;  %v1800_v16 = vsub.f32 %v4352_v47, %v1790_v17  ;;  %v1812_v34 = vmul.f32 1.442695, %v1799_v26 }
 0x705   : > { %v1793_v23 = vpop.xlane.xlu1 %1792 }
 0x706   : > { %v1814_v27 = vmul.f32 1.442695, %v1800_v16  ;;  %v1801_v29 = vsub.f32 %v4353_v51, %v1793_v23 }
 0x708   : > { %4726 = vpow2.f32 %v1814_v27  ;;  %v1816_v31 = vmul.f32 1.442695, %v1801_v29 }
 0x70a   : > { %4728 = vpow2.f32 %v1816_v31 }
 0x70b   : > { %4730 = vpow2.f32 %v1812_v34 }
 0x70e   : > { %v5946_v37 = vpop.eup %4724 }
 0x70f   : > { %v1830_v35 = vsel %vm1291_vm0, %v5946_v37, 0.0 }
 0x712   : > { %v5950_v36 = vpop.eup %4726  ;;  %1831 = vadd.xlane.f32.xlu0 %v1830_v35 }
 0x713   : > { %v1836_v38 = vsel %vm1291_vm0, %v5950_v36, 0.0 }
 0x714   : > { %v5954_v39 = vpop.eup %4728  ;;  %1837 = vadd.xlane.f32.xlu1 %v1836_v38 }
 0x715   : > { %v1839_v42 = vsel %vm1291_vm0, %v5954_v39, 0.0  ;;  %v5958_v44 = vpop.eup %4730 }
 0x716   : > { %v1833_v46 = vsel %vm1291_vm0, %v5958_v44, 0.0 }
 0x718   : > { %1840 = vadd.xlane.f32.xlu1 %v1839_v42 }
 0x71c   : > { %1834 = vadd.xlane.f32.xlu1 %v1833_v46 }
 0x728   : > { %2102 = vrot.lane.b32.xlu0 %v5796_v41, %s5201_s11 }
 0x72c   : > { %2098 = vrot.lane.b32.xlu0 %v5794_v6, %s5201_s11 }
 0x72d   : > { %2031 = vrot.lane.b32.xlu1 %v5778_v54, %s5201_s11 }
 0x731   : > { %2104 = vrot.lane.b32.xlu1 %v5812_v21, %s5201_s11 }
 0x735   : > { %2100 = vrot.lane.b32.xlu1 %v5810_v20, %s5201_s11 }
 0x75a   : > { %v1820_v47 = vpop.xlane.xlu0 %1819 }
 0x75b   : > { %4732 = vrcp.f32 %v1820_v47 }
 0x75c   : > { %v1823_v50 = vpop.xlane.xlu1 %1822 }
 0x75d   : > { %4734 = vrcp.f32 %v1823_v50 }
 0x75e   : > { %v1826_v51 = vpop.xlane.xlu0 %1825 }
 0x75f   : > { %4736 = vrcp.f32 %v1826_v51 }
 0x762   : > { %v1865_v52 = vpop.permute.xlu0 %1864  ;;  %v1829_v24 = vpop.xlane.xlu1 %1828 }
 0x763   : > { %4738 = vrcp.f32 %v1829_v24  ;;  %4354 = vmatprep.subr.bf16.mxu0 %v1865_v52 }
 0x764   : > { %4355 = vmatpush3.bf16.msra.mxu0 %v1865_v52 }
 0x765   : > { %v4733_v53 = vpop.eup %4732 }
 0x766   : > { %v2034_v55 = vpop.permute.xlu0 %2033  ;;  %v1867_v56 = vpop.permute.xlu1 %1866  ;;  %v1850_v59 = vmul.f32 %v4733_v53, %v5916_v4 }
 0x767   : > { %v4735_v58 = vpop.eup %4734  ;;  %4356 = vmatprep.subr.bf16.mxu0 %v1867_v56  ;;  %v2044_v4 = vsel %vm1291_vm0, %v2034_v55, 0 }
 0x768   : > { %4357 = vmatpush3.bf16.msra.mxu0 %v1867_v56  ;;  %v1851_v32 = vmul.f32 %v4735_v58, %v5920_v8 }
 0x769   : > { %4466 = vmatprep.subr.msk.bf16.mxu0 %vm1291_vm0, %v2034_v55  ;;  %v4737_v0 = vpop.eup %4736 }
 0x76a   : > { %v1928_v60 = vpop.permute.xlu1 %1927  ;;  %v1858_v61 = vpack.c.bf16 %v1851_v32, %v1850_v59  ;;  %v1930_v62 = vpop.permute.xlu0 %1929  ;;  %v1852_v33 = vmul.f32 %v4737_v0, %v5924_v48 }
 0x76b   : > { %4362 = vmatprep.subr.bf16.mxu1 %v1928_v60 }
 0x76c   : > { %4358 = vmatprep.mubr.msk.bf16.mxu0 %vm1291_vm0, %v1858_v61  ;;  %4363 = vmatpush3.bf16.msra.mxu1 %v1928_v60 }
 0x76d   : > { %v4739_v25 = vpop.eup %4738  ;;  %4364 = vmatprep.subr.bf16.mxu1 %v1930_v62 }
 0x76e   : > { %v1853_v40 = vmul.f32 %v4739_v25, %v5928_v14  ;;  %v2030_v3 = vpop.permute.xlu0 %2029  ;;  %v2036_v5 = vpop.permute.xlu1 %2035 }
 0x76f   : > { %v2047_v8 = vsel %vm1291_vm0, %v2036_v5, 0 }
 0x770   : > { %4365 = vmatpush3.bf16.msra.mxu1 %v1930_v62  ;;  %v1859_v2 = vpack.c.bf16 %v1853_v40, %v1852_v33 }
 0x772   : > { %4359 = vmatmul.mubr.msk.bf16.vlgmr.msra.gmra.mrb[20].mxu0 %vm1291_vm0, %v1859_v2 }
 0x773   : > { %4371 = vmatpush3.bf16.xpose.msra.mxu0 %v2044_v4  ;;  %4374 = vmatprep.mubr.msk.bf16.mxu0 %vm1291_vm0, %v2030_v3 }
 0x774   : > { %4467 = vmatprep.subr.msk.bf16.mxu0 %vm1291_vm0, %v2036_v5 }
 0x77b   : > { %4373 = vmatpush3.bf16.xpose.msra.mxu0 %v2047_v8 }
 0x79f   : > { %v1832_v9 = vpop.xlane.xlu0 %1831 }
 0x7a1   : > { %v1838_v48 = vpop.xlane.xlu1 %1837 }
 0x7a3   : > { %v2103_v11 = vpop.permute.xlu0 %2102 }
 0x7a4   : > { %4468 = vmatprep.subr.msk.bf16.mxu1 %vm1291_vm0, %v2103_v11  ;;  %v2113_v34 = vsel %vm1291_vm0, %v2103_v11, 0 }
 0x7a5   : > { %v1841_v14 = vpop.xlane.xlu1 %1840 }
 0x7a6   : > { %4740 = vrcp.f32 %v1841_v14 }
 0x7a7   : > { %4742 = vrcp.f32 %v1832_v9  ;;  %v2099_v35 = vpop.permute.xlu0 %2098 }
 0x7a8   : > { %4744 = vrcp.f32 %v1838_v48 }
 0x7a9   : > { %v1835_v15 = vpop.xlane.xlu1 %1834 }
 0x7aa   : > { %4746 = vrcp.f32 %v1835_v15 }
 0x7ad   : > { %v2032_v18 = vpop.permute.xlu1 %2031 }
 0x7ae   : > { %4375 = vmatmul.mubr.msk.bf16.vlgmr.msra.gmra.mrb[24].mxu0 %vm1291_vm0, %v2032_v18 }
 0x7b0   : > { %v4741_v22 = vpop.eup %4740 }
 0x7b1   : > { %v4743_v13 = vpop.eup %4742  ;;  %v1857_v16 = vmul.f32 %v4741_v22, %v5954_v39  ;;  %v2105_v38 = vpop.permute.xlu1 %2104 }
 0x7b2   : > { %v4745_v19 = vpop.eup %4744  ;;  %v1854_v23 = vmul.f32 %v4743_v13, %v5946_v37  ;;  %v2116_v37 = vsel %vm1291_vm0, %v2105_v38, 0 }
 0x7b3   : > { %v1856_v27 = vmul.f32 %v4745_v19, %v5950_v36 }
 0x7b4   : > { %v4747_v17 = vpop.eup %4746 }
 0x7b5   : > { %v1855_v26 = vmul.f32 %v4747_v17, %v5958_v44  ;;  %v1861_v31 = vpack.c.bf16 %v1857_v16, %v1856_v27  ;;  %v2101_v39 = vpop.permute.xlu1 %2100 }
 0x7b7   : > { %v1860_v29 = vpack.c.bf16 %v1855_v26, %v1854_v23 }
 0x7b9   : > { %4366 = vmatprep.mubr.msk.bf16.mxu1 %vm1291_vm0, %v1860_v29 }
 0x7ba   : > { %4367 = vmatmul.mubr.msk.bf16.vlgmr.msra.gmra.mrb[28].mxu1 %vm1291_vm0, %v1861_v31 }
 0x7bb   : > { %4379 = vmatpush3.bf16.xpose.msra.mxu1 %v2113_v34  ;;  %4382 = vmatprep.mubr.msk.bf16.mxu1 %vm1291_vm0, %v2099_v35 }
 0x7bc   : > { %4469 = vmatprep.subr.msk.bf16.mxu1 %vm1291_vm0, %v2105_v38 }
 0x7c3   : > { %4381 = vmatpush3.bf16.xpose.msra.mxu1 %v2116_v37 }
 0x7ca   : > { %4383 = vmatmul.mubr.msk.bf16.vlgmr.msra.gmra.mrb[32].mxu1 %vm1291_vm0, %v2101_v39 }
 0x845   : > { %v5996_v36 = vpop.f32.mrb[20].mxu0 }
 0x846   : > { %v5998_v42 = vpop.f32.mrb[21].mxu0 }
 0x847   : > { %v6000_v44 = vpop.f32.mrb[22].mxu0 }
 0x848   : > { %v6002_v46 = vpop.f32.mrb[23].mxu0 }
 0x881   : > { %v4376_v47 = vpop.f32.mrb[24].mxu0 }
 0x882   : > { %v2083_v50 = vpop.f32.mrb[25].mxu0  ;;  %v2173_v55 = vsel %vm1291_vm0, %v4376_v47, -inf }
 0x883   : > { %v4377_v51 = vpop.f32.mrb[26].mxu0  ;;  %v2167_v52 = vsel %vm1291_vm0, %v2083_v50, -inf }
 0x884   : > { %2168 = vmax.xlane.f32.xlu0 %v2167_v52  ;;  %v2086_v24 = vpop.f32.mrb[27].mxu0  ;;  %v2176_v56 = vsel %vm1291_vm0, %v4377_v51, -inf }
 0x885   : > { %v2170_v53 = vsel %vm1291_vm0, %v2086_v24, -inf }
 0x886   : > { %2171 = vmax.xlane.f32.xlu1 %v2170_v53 }
 0x888   : > { %2174 = vmax.xlane.f32.xlu0 %v2173_v55 }
 0x88c   : > { %2177 = vmax.xlane.f32.xlu0 %v2176_v56 }
 0x88d   : > { %v6008_v58 = vpop.f32.mrb[28].mxu1 }
 0x88e   : > { %v6010_v59 = vpop.f32.mrb[29].mxu1 }
 0x88f   : > { %v6012_v32 = vpop.f32.mrb[30].mxu1 }
 0x890   : > { %v6014_v60 = vpop.f32.mrb[31].mxu1 }
 0x89d   : > { %v4384_v61 = vpop.f32.mrb[32].mxu1 }
 0x89e   : > { %v2152_v0 = vpop.f32.mrb[33].mxu1  ;;  %v2185_v2 = vsel %vm1291_vm0, %v4384_v61, -inf }
 0x89f   : > { %v4385_v62 = vpop.f32.mrb[34].mxu1  ;;  %v2179_v25 = vsel %vm1291_vm0, %v2152_v0, -inf }
 0x8a0   : > { %2180 = vmax.xlane.f32.xlu0 %v2179_v25  ;;  %v2155_v33 = vpop.f32.mrb[35].mxu1  ;;  %v2188_v3 = vsel %vm1291_vm0, %v4385_v62, -inf }
 0x8a1   : > { %v2182_v40 = vsel %vm1291_vm0, %v2155_v33, -inf }
 0x8a2   : > { %2183 = vmax.xlane.f32.xlu1 %v2182_v40 }
 0x8a4   : > { %2186 = vmax.xlane.f32.xlu0 %v2185_v2 }
 0x8a6   : > { %2189 = vmax.xlane.f32.xlu1 %v2188_v3 }
 0x911   : > { %v2169_v4 = vpop.xlane.xlu0 %2168 }
 0x912   : > { %v2191_v5 = vsub.f32 %v2083_v50, %v2169_v4 }
 0x913   : > { %v2172_v8 = vpop.xlane.xlu1 %2171 }
 0x914   : > { %v2199_v9 = vmul.f32 1.442695, %v2191_v5  ;;  %v2192_v48 = vsub.f32 %v2086_v24, %v2172_v8 }
 0x915   : > { %v2175_v11 = vpop.xlane.xlu0 %2174 }
 0x916   : > { %4748 = vpow2.f32 %v2199_v9  ;;  %v2201_v14 = vmul.f32 1.442695, %v2192_v48  ;;  %v2193_v15 = vsub.f32 %v4376_v47, %v2175_v11 }
 0x918   : > { %4750 = vpow2.f32 %v2201_v14  ;;  %v2203_v18 = vmul.f32 1.442695, %v2193_v15 }
 0x919   : > { %v2178_v22 = vpop.xlane.xlu0 %2177 }
 0x91a   : > { %4752 = vpow2.f32 %v2203_v18  ;;  %v2194_v13 = vsub.f32 %v4377_v51, %v2178_v22 }
 0x91c   : > { %v2205_v19 = vmul.f32 1.442695, %v2194_v13 }
 0x91e   : > { %4754 = vpow2.f32 %v2205_v19 }
 0x920   : > { %v6020_v17 = vpop.eup %4748 }
 0x921   : > { %v2215_v16 = vsel %vm1291_vm0, %v6020_v17, 0.0 }
 0x922   : > { %v6024_v23 = vpop.eup %4750  ;;  %2216 = vadd.xlane.f32.xlu0 %v2215_v16 }
 0x923   : > { %v2218_v26 = vsel %vm1291_vm0, %v6024_v23, 0.0 }
 0x924   : > { %v6028_v27 = vpop.eup %4752  ;;  %2219 = vadd.xlane.f32.xlu1 %v2218_v26 }
 0x925   : > { %v2221_v29 = vsel %vm1291_vm0, %v6028_v27, 0.0 }
 0x926   : > { %2222 = vadd.xlane.f32.xlu0 %v2221_v29 }
 0x928   : > { %v6032_v31 = vpop.eup %4754 }
 0x929   : > { %v2224_v34 = vsel %vm1291_vm0, %v6032_v31, 0.0 }
 0x92a   : > { %2225 = vadd.xlane.f32.xlu1 %v2224_v34 }
 0x92d   : > { %v2181_v35 = vpop.xlane.xlu0 %2180 }
 0x92e   : > { %v2195_v39 = vsub.f32 %v2152_v0, %v2181_v35 }
 0x92f   : > { %v2184_v38 = vpop.xlane.xlu1 %2183 }
 0x930   : > { %v2207_v51 = vmul.f32 1.442695, %v2195_v39 }
 0x931   : > { %v2187_v37 = vpop.xlane.xlu0 %2186 }
 0x932   : > { %v2197_v47 = vsub.f32 %v4384_v61, %v2187_v37  ;;  %4756 = vpow2.f32 %v2207_v51 }
 0x933   : > { %v2190_v50 = vpop.xlane.xlu1 %2189 }
 0x934   : > { %v2211_v52 = vmul.f32 1.442695, %v2197_v47  ;;  %v2198_v24 = vsub.f32 %v4385_v62, %v2190_v50 }
 0x936   : > { %4758 = vpow2.f32 %v2211_v52  ;;  %v2213_v53 = vmul.f32 1.442695, %v2198_v24 }
 0x938   : > { %4760 = vpow2.f32 %v2213_v53 }
 0x93b   : > { %2261 = vrot.lane.b32.xlu1 %v5770_v43, %s5201_s11 }
 0x93c   : > { %2259 = vrot.lane.b32.xlu0 %v5772_v45, %s5201_s11  ;;  %v6050_v55 = vpop.eup %4756 }
 0x93f   : > { %2320 = vrot.lane.b32.xlu1 %v5788_v1, %s5201_s11 }
 0x940   : > { %2426 = vrot.lane.b32.xlu0 %v5762_v30, %s5202_s20  ;;  %v2196_v30 = vsub.f32 %v2155_v33, %v2184_v38  ;;  %v6052_v56 = vpop.eup %4758 }
 0x941   : > { %v2233_v61 = vsel %vm1291_vm0, %v6052_v56, 0.0 }
 0x942   : > { %v6058_v0 = vpop.eup %4760 }
 0x943   : > { %2428 = vrot.lane.b32.xlu1 %v5780_v57, %s5202_s20  ;;  %v2209_v57 = vmul.f32 1.442695, %v2196_v30  ;;  %v2236_v62 = vsel %vm1291_vm0, %v6058_v0, 0.0 }
 0x944   : > { %2322 = vrot.lane.b32.xlu0 %v5786_v63, %s5201_s11 }
 0x945   : > { %4762 = vpow2.f32 %v2209_v57 }
 0x948   : > { %2422 = vrot.lane.b32.xlu0 %v5760_v28, %s5202_s20  ;;  %v2227_v28 = vsel %vm1291_vm0, %v6050_v55, 0.0 }
 0x94f   : > { %v6062_v25 = vpop.eup %4762 }
 0x950   : > { %v2230_v33 = vsel %vm1291_vm0, %v6062_v25, 0.0 }
 0x967   : > { %2228 = vadd.xlane.f32.xlu0 %v2227_v28  ;;  %2234 = vadd.xlane.f32.xlu1 %v2233_v61 }
 0x96b   : > { %2237 = vadd.xlane.f32.xlu1 %v2236_v62 }
 0x96f   : > { %2231 = vadd.xlane.f32.xlu1 %v2230_v33 }
 0x97d   : > { %2495 = vrot.lane.b32.xlu0 %v5796_v41, %s5202_s20 }
 0x980   : > { %2424 = vrot.lane.b32.xlu1 %v5778_v54, %s5202_s20 }
 0x981   : > { %2491 = vrot.lane.b32.xlu0 %v5794_v6, %s5202_s20 }
 0x984   : > { %2497 = vrot.lane.b32.xlu1 %v5812_v21, %s5202_s20 }
 0x988   : > { %2493 = vrot.lane.b32.xlu1 %v5810_v20, %s5202_s20 }
 0x9af   : > { %v2217_v40 = vpop.xlane.xlu0 %2216 }
 0x9b0   : > { %4764 = vrcp.f32 %v2217_v40 }
 0x9b1   : > { %v2220_v2 = vpop.xlane.xlu1 %2219 }
 0x9b2   : > { %4766 = vrcp.f32 %v2220_v2 }
 0x9b3   : > { %v2223_v3 = vpop.xlane.xlu0 %2222 }
 0x9b4   : > { %4768 = vrcp.f32 %v2223_v3 }
 0x9b7   : > { %v2260_v4 = vpop.permute.xlu0 %2259  ;;  %v2226_v41 = vpop.xlane.xlu1 %2225 }
 0x9b8   : > { %4770 = vrcp.f32 %v2226_v41  ;;  %4386 = vmatprep.subr.bf16.mxu0 %v2260_v4 }
 0x9b9   : > { %4387 = vmatpush3.bf16.msra.mxu0 %v2260_v4 }
 0x9ba   : > { %v4765_v54 = vpop.eup %4764 }
 0x9bb   : > { %v2427_v5 = vpop.permute.xlu0 %2426  ;;  %v2262_v6 = vpop.permute.xlu1 %2261  ;;  %v2247_v21 = vmul.f32 %v4765_v54, %v6020_v17 }
 0x9bc   : > { %v4767_v8 = vpop.eup %4766  ;;  %4388 = vmatprep.subr.bf16.mxu0 %v2262_v6  ;;  %v2437_v19 = vsel %vm1291_vm0, %v2427_v5, 0 }
 0x9bd   : > { %4389 = vmatpush3.bf16.msra.mxu0 %v2262_v6  ;;  %v2248_v20 = vmul.f32 %v4767_v8, %v6024_v23 }
 0x9be   : > { %4470 = vmatprep.subr.msk.bf16.mxu0 %vm1291_vm0, %v2427_v5  ;;  %v4769_v11 = vpop.eup %4768 }
 0x9bf   : > { %v2321_v9 = vpop.permute.xlu1 %2320  ;;  %v2255_v48 = vpack.c.bf16 %v2248_v20, %v2247_v21  ;;  %v2323_v14 = vpop.permute.xlu0 %2322  ;;  %v2249_v18 = vmul.f32 %v4769_v11, %v6028_v27 }
 0x9c0   : > { %4394 = vmatprep.subr.bf16.mxu1 %v2321_v9 }
 0x9c1   : > { %4390 = vmatprep.mubr.msk.bf16.mxu0 %vm1291_vm0, %v2255_v48  ;;  %4395 = vmatpush3.bf16.msra.mxu1 %v2321_v9 }
 0x9c2   : > { %v4771_v15 = vpop.eup %4770  ;;  %4396 = vmatprep.subr.bf16.mxu1 %v2323_v14 }
 0x9c3   : > { %v2250_v22 = vmul.f32 %v4771_v15, %v6032_v31  ;;  %v2423_v17 = vpop.permute.xlu0 %2422  ;;  %v2429_v16 = vpop.permute.xlu1 %2428 }
 0x9c4   : > { %v2440_v23 = vsel %vm1291_vm0, %v2429_v16, 0 }
 0x9c5   : > { %4397 = vmatpush3.bf16.msra.mxu1 %v2323_v14  ;;  %v2256_v13 = vpack.c.bf16 %v2250_v22, %v2249_v18 }
 0x9c7   : > { %4391 = vmatmul.mubr.msk.bf16.vlgmr.msra.gmra.mrb[28].mxu0 %vm1291_vm0, %v2256_v13 }
 0x9c8   : > { %4403 = vmatpush3.bf16.xpose.msra.mxu0 %v2437_v19  ;;  %4406 = vmatprep.mubr.msk.bf16.mxu0 %vm1291_vm0, %v2423_v17 }
 0x9c9   : > { %4471 = vmatprep.subr.msk.bf16.mxu0 %vm1291_vm0, %v2429_v16 }
 0x9d0   : > { %4405 = vmatpush3.bf16.xpose.msra.mxu0 %v2440_v23 }
 0x9f4   : > { %v2229_v26 = vpop.xlane.xlu0 %2228  ;;  %v2235_v27 = vpop.xlane.xlu1 %2234 }
 0x9f8   : > { %v2496_v29 = vpop.permute.xlu0 %2495  ;;  %v2238_v31 = vpop.xlane.xlu1 %2237 }
 0x9f9   : > { %4472 = vmatprep.subr.msk.bf16.mxu1 %vm1291_vm0, %v2496_v29  ;;  %4772 = vrcp.f32 %v2238_v31  ;;  %v2506_v57 = vsel %vm1291_vm0, %v2496_v29, 0 }
 0x9fa   : > { %4774 = vrcp.f32 %v2229_v26 }
 0x9fb   : > { %4776 = vrcp.f32 %v2235_v27 }
 0x9fc   : > { %v2232_v34 = vpop.xlane.xlu1 %2231  ;;  %v2492_v28 = vpop.permute.xlu0 %2491 }
 0x9fd   : > { %4778 = vrcp.f32 %v2232_v34 }
 0xa00   : > { %v2425_v35 = vpop.permute.xlu1 %2424 }
 0xa01   : > { %4407 = vmatmul.mubr.msk.bf16.vlgmr.msra.gmra.mrb[32].mxu0 %vm1291_vm0, %v2425_v35 }
 0xa03   : > { %v4773_v38 = vpop.eup %4772 }
 0xa04   : > { %v4775_v37 = vpop.eup %4774  ;;  %v2254_v50 = vmul.f32 %v4773_v38, %v6058_v0  ;;  %v2498_v61 = vpop.permute.xlu1 %2497 }
 0xa05   : > { %v4777_v39 = vpop.eup %4776  ;;  %v2251_v51 = vmul.f32 %v4775_v37, %v6050_v55  ;;  %v2509_v55 = vsel %vm1291_vm0, %v2498_v61, 0 }
 0xa06   : > { %v2253_v24 = vmul.f32 %v4777_v39, %v6052_v56 }
 0xa07   : > { %v4779_v47 = vpop.eup %4778 }
 0xa08   : > { %v2252_v52 = vmul.f32 %v4779_v47, %v6062_v25  ;;  %v2258_v53 = vpack.c.bf16 %v2254_v50, %v2253_v24  ;;  %v2494_v0 = vpop.permute.xlu1 %2493 }
 0xa0a   : > { %v2257_v30 = vpack.c.bf16 %v2252_v52, %v2251_v51 }
 0xa0c   : > { %4398 = vmatprep.mubr.msk.bf16.mxu1 %vm1291_vm0, %v2257_v30 }
 0xa0d   : > { %4399 = vmatmul.mubr.msk.bf16.vlgmr.msra.gmra.mrb[36].mxu1 %vm1291_vm0, %v2258_v53 }
 0xa0e   : > { %4411 = vmatpush3.bf16.xpose.msra.mxu1 %v2506_v57  ;;  %4414 = vmatprep.mubr.msk.bf16.mxu1 %vm1291_vm0, %v2492_v28 }
 0xa0f   : > { %4473 = vmatprep.subr.msk.bf16.mxu1 %vm1291_vm0, %v2498_v61 }
 0xa16   : > { %4413 = vmatpush3.bf16.xpose.msra.mxu1 %v2509_v55 }
 0xa1d   : > { %4415 = vmatmul.mubr.msk.bf16.vlgmr.msra.gmra.mrb[40].mxu1 %vm1291_vm0, %v2494_v0 }
 0xa9a   : > { %v6100_v56 = vpop.f32.mrb[28].mxu0 }
 0xa9b   : > { %v6102_v62 = vpop.f32.mrb[29].mxu0 }
 0xa9c   : > { %v6104_v25 = vpop.f32.mrb[30].mxu0 }
 0xa9d   : > { %v6106_v33 = vpop.f32.mrb[31].mxu0 }
 0xad4   : > { %v4408_v40 = vpop.f32.mrb[32].mxu0 }
 0xad5   : > { %v2476_v2 = vpop.f32.mrb[33].mxu0  ;;  %v2566_v5 = vsel %vm1291_vm0, %v4408_v40, -inf }
 0xad6   : > { %v4409_v3 = vpop.f32.mrb[34].mxu0  ;;  %v2560_v4 = vsel %vm1291_vm0, %v2476_v2, -inf }
 0xad7   : > { %2561 = vmax.xlane.f32.xlu0 %v2560_v4  ;;  %v2479_v41 = vpop.f32.mrb[35].mxu0  ;;  %v2569_v6 = vsel %vm1291_vm0, %v4409_v3, -inf }
 0xad8   : > { %v2563_v54 = vsel %vm1291_vm0, %v2479_v41, -inf }
 0xad9   : > { %2564 = vmax.xlane.f32.xlu1 %v2563_v54 }
 0xadb   : > { %2567 = vmax.xlane.f32.xlu0 %v2566_v5 }
 0xadf   : > { %2570 = vmax.xlane.f32.xlu0 %v2569_v6 }
 0xae0   : > { %v6112_v8 = vpop.f32.mrb[36].mxu1 }
 0xae1   : > { %v6114_v21 = vpop.f32.mrb[37].mxu1 }
 0xae2   : > { %v6116_v20 = vpop.f32.mrb[38].mxu1 }
 0xae3   : > { %v6118_v9 = vpop.f32.mrb[39].mxu1 }
 0xaf0   : > { %v4416_v48 = vpop.f32.mrb[40].mxu1 }
 0xaf1   : > { %v2545_v11 = vpop.f32.mrb[41].mxu1  ;;  %v2578_v13 = vsel %vm1291_vm0, %v4416_v48, -inf }
 0xaf2   : > { %v4417_v14 = vpop.f32.mrb[42].mxu1  ;;  %v2572_v15 = vsel %vm1291_vm0, %v2545_v11, -inf }
 0xaf3   : > { %2573 = vmax.xlane.f32.xlu0 %v2572_v15  ;;  %v2548_v18 = vpop.f32.mrb[43].mxu1  ;;  %v2581_v19 = vsel %vm1291_vm0, %v4417_v14, -inf }
 0xaf4   : > { %v2575_v22 = vsel %vm1291_vm0, %v2548_v18, -inf }
 0xaf5   : > { %2576 = vmax.xlane.f32.xlu1 %v2575_v22 }
 0xaf7   : > { %2579 = vmax.xlane.f32.xlu0 %v2578_v13 }
 0xaf9   : > { %2582 = vmax.xlane.f32.xlu1 %v2581_v19 }
 0xb64   : > { %v2562_v17 = vpop.xlane.xlu0 %2561 }
 0xb65   : > { %v2584_v16 = vsub.f32 %v2476_v2, %v2562_v17 }
 0xb66   : > { %v2565_v23 = vpop.xlane.xlu1 %2564 }
 0xb67   : > { %v2592_v26 = vmul.f32 1.442695, %v2584_v16  ;;  %v2585_v27 = vsub.f32 %v2479_v41, %v2565_v23 }
 0xb68   : > { %v2568_v29 = vpop.xlane.xlu0 %2567 }
 0xb69   : > { %4780 = vpow2.f32 %v2592_v26  ;;  %v2594_v31 = vmul.f32 1.442695, %v2585_v27  ;;  %v2586_v34 = vsub.f32 %v4408_v40, %v2568_v29 }
 0xb6b   : > { %4782 = vpow2.f32 %v2594_v31  ;;  %v2596_v35 = vmul.f32 1.442695, %v2586_v34 }
 0xb6c   : > { %v2571_v38 = vpop.xlane.xlu0 %2570 }
 0xb6d   : > { %4784 = vpow2.f32 %v2596_v35  ;;  %v2587_v37 = vsub.f32 %v4409_v3, %v2571_v38 }
 0xb6f   : > { %v2598_v39 = vmul.f32 1.442695, %v2587_v37 }
 0xb71   : > { %4786 = vpow2.f32 %v2598_v39 }
 0xb73   : > { %v4781_v47 = vpop.eup %4780 }
 0xb74   : > { %v2608_v50 = vsel %vm1291_vm0, %v4781_v47, 0.0 }
 0xb75   : > { %v4783_v51 = vpop.eup %4782  ;;  %2609 = vadd.xlane.f32.xlu0 %v2608_v50 }
 0xb76   : > { %v2611_v52 = vsel %vm1291_vm0, %v4783_v51, 0.0 }
 0xb77   : > { %v6126_v24 = vpop.eup %4784  ;;  %2612 = vadd.xlane.f32.xlu1 %v2611_v52 }
 0xb78   : > { %v2614_v30 = vsel %vm1291_vm0, %v6126_v24, 0.0 }
 0xb79   : > { %2615 = vadd.xlane.f32.xlu0 %v2614_v30 }
 0xb7b   : > { %v6130_v53 = vpop.eup %4786 }
 0xb7c   : > { %v2617_v57 = vsel %vm1291_vm0, %v6130_v53, 0.0 }
 0xb7d   : > { %2618 = vadd.xlane.f32.xlu1 %v2617_v57 }
 0xb80   : > { %v2574_v28 = vpop.xlane.xlu0 %2573 }
 0xb81   : > { %v2588_v61 = vsub.f32 %v2545_v11, %v2574_v28 }
 0xb82   : > { %v2577_v54 = vpop.xlane.xlu1 %2576 }
 0xb83   : > { %v2600_v40 = vmul.f32 1.442695, %v2588_v61  ;;  %v2589_v11 = vsub.f32 %v2548_v18, %v2577_v54  ;;  %v4621_v54 = vld [vmem:[%s5627_s28 + $0x8] sm:$0xff]  }
 0xb84   : > { %v2580_v55 = vpop.xlane.xlu0 %2579 }
 0xb85   : > { %v2590_v0 = vsub.f32 %v4416_v48, %v2580_v55  ;;  %v2602_v15 = vmul.f32 1.442695, %v2589_v11  ;;  %v4625_v11 = vld [vmem:[%s5627_s28 + $0x28] sm:$0xff]  }
 0xb86   : > { %v2583_v6 = vpop.xlane.xlu1 %2582 }
 0xb87   : > { %v2604_v2 = vmul.f32 1.442695, %v2590_v0  ;;  %v2591_v48 = vsub.f32 %v4417_v14, %v2583_v6  ;;  %v4623_v6 = vld [vmem:[%s5627_s28 + $0x18] sm:$0xff]  }
 0xb89   : > { %4788 = vpow2.f32 %v2604_v2 }
 0xb8a   : > { %4790 = vpow2.f32 %v2600_v40 }
 0xb8e   : > { %2654 = vrot.lane.b32.xlu1 %v5770_v43, %s5202_s20  ;;  %v2606_v43 = vmul.f32 1.442695, %v2591_v48  ;;  %v4624_v48 = vld [vmem:[%s5627_s28 + $0x20] sm:$0xff]  }
 0xb90   : > { %4792 = vpow2.f32 %v2606_v43  ;;  %v4626_v43 = vld [vmem:[%s5627_s28 + $0x30] sm:$0xff]  }
 0xb91   : > { %4794 = vpow2.f32 %v2602_v15  ;;  %v4627_v15 = vld [vmem:[%s5627_s28 + $0x38] sm:$0xff]  }
 0xb92   : > { %2713 = vrot.lane.b32.xlu1 %v5788_v1, %s5202_s20 }
 0xb93   : > { %v6138_v3 = vpop.eup %4788 }
 0xb94   : > { %v2626_v4 = vsel %vm1291_vm0, %v6138_v3, 0.0  ;;  %v6142_v41 = vpop.eup %4790 }
 0xb95   : > { %2627 = vadd.xlane.f32.xlu0 %v2626_v4  ;;  %v2620_v5 = vsel %vm1291_vm0, %v6142_v41, 0.0 }
 0xb99   : > { %2621 = vadd.xlane.f32.xlu0 %v2620_v5  ;;  %v4622_v5 = vld [vmem:[%s5627_s28 + $0x10] sm:$0xff]  }
 0xb9a   : > { %v6148_v1 = vpop.eup %4792 }
 0xb9b   : > { %v2629_v22 = vsel %vm1291_vm0, %v6148_v1, 0.0  ;;  %v6154_v13 = vpop.eup %4794 }
 0xb9c   : > { %v2623_v14 = vsel %vm1291_vm0, %v6154_v13, 0.0 }
 0xbaf   : > { %2652 = vrot.lane.b32.xlu0 %v5772_v45, %s5202_s20 }
 0xbb3   : > { %1996 = vrot.lane.b32.xlu0 %v5998_v42, %s5202_s20 }
 0xbb6   : > { %2630 = vadd.xlane.f32.xlu1 %v2629_v22 }
 0xbb7   : > { %2000 = vrot.lane.b32.xlu0 %v5996_v36, %s5202_s20 }
 0xbba   : > { %2624 = vadd.xlane.f32.xlu1 %v2623_v14 }
 0xbbb   : > { %2389 = vrot.lane.b32.xlu0 %v6102_v62, %s5201_s11 }
 0xbbf   : > { %2393 = vrot.lane.b32.xlu0 %v6100_v56, %s5201_s11 }
 0xbcb   : > { %2715 = vrot.lane.b32.xlu1 %v5786_v63, %s5202_s20 }
 0xbcf   : > { %1998 = vrot.lane.b32.xlu1 %v6002_v46, %s5202_s20 }
 0xbd3   : > { %2002 = vrot.lane.b32.xlu1 %v6000_v44, %s5202_s20 }
 0xbd7   : > { %2391 = vrot.lane.b32.xlu1 %v6106_v33, %s5201_s11 }
 0xbdb   : > { %2395 = vrot.lane.b32.xlu1 %v6104_v25, %s5201_s11 }
 0xc02   : > { %v2610_v45 = vpop.xlane.xlu0 %2609 }
 0xc03   : > { %4796 = vrcp.f32 %v2610_v45 }
 0xc04   : > { %v2613_v36 = vpop.xlane.xlu1 %2612 }
 0xc05   : > { %4798 = vrcp.f32 %v2613_v36 }
 0xc06   : > { %v2616_v44 = vpop.xlane.xlu0 %2615 }
 0xc0a   : > { %v2619_v42 = vpop.xlane.xlu1 %2618 }
 0xc0b   : > { %4800 = vrcp.f32 %v2619_v42 }
 0xc0c   : > { %4802 = vrcp.f32 %v2616_v44 }
 0xc0d   : > { %v4797_v56 = vpop.eup %4796 }
 0xc0e   : > { %v2655_v62 = vpop.permute.xlu1 %2654  ;;  %v2640_v18 = vmul.f32 %v4797_v56, %v4781_v47 }
 0xc0f   : > { %v4799_v63 = vpop.eup %4798 }
 0xc10   : > { %v2641_v19 = vmul.f32 %v4799_v63, %v4783_v51 }
 0xc12   : > { %v2714_v46 = vpop.permute.xlu1 %2713  ;;  %v2648_v17 = vpack.c.bf16 %v2641_v19, %v2640_v18 }
 0xc13   : > { %4426 = vmatprep.subr.bf16.mxu1 %v2714_v46 }
 0xc14   : > { %4422 = vmatprep.mubr.msk.bf16.mxu0 %vm1291_vm0, %v2648_v17  ;;  %4427 = vmatpush3.bf16.msra.mxu1 %v2714_v46 }
 0xc15   : > { %v4801_v16 = vpop.eup %4800 }
 0xc16   : > { %v4803_v26 = vpop.eup %4802  ;;  %v2643_v27 = vmul.f32 %v4801_v16, %v6130_v53 }
 0xc17   : > { %v2642_v31 = vmul.f32 %v4803_v26, %v6126_v24 }
 0xc19   : > { %v2649_v34 = vpack.c.bf16 %v2643_v27, %v2642_v31 }
 0xc22   : > { %v2628_v25 = vpop.xlane.xlu0 %2627 }
 0xc26   : > { %v2622_v33 = vpop.xlane.xlu0 %2621 }
 0xc2a   : > { %v2653_v23 = vpop.permute.xlu0 %2652 }
 0xc2b   : > { %4418 = vmatprep.subr.bf16.mxu0 %v2653_v23 }
 0xc2c   : > { %4419 = vmatpush3.bf16.msra.mxu0 %v2653_v23 }
 0xc2d   : > { %4420 = vmatprep.subr.bf16.mxu0 %v2655_v62 }
 0xc2e   : > { %v1997_v29 = vpop.permute.xlu0 %1996 }
 0xc2f   : > { %2021 = vst.msk [vmem:[#allocation3] sm:$0xff] %vm2020_vm1, %v1997_v29 }
 0xc30   : > { %4421 = vmatpush3.bf16.msra.mxu0 %v2655_v62 }
 0xc32   : > { %v2001_v35 = vpop.permute.xlu0 %2000 }
 0xc33   : > { %2023 = vst.msk [vmem:[#allocation3 + $0x10] sm:$0xff] %vm2020_vm1, %v2001_v35  ;;  %4423 = vmatmul.mubr.msk.bf16.vlgmr.msra.gmra.mrb[36].mxu0 %vm1291_vm0, %v2649_v34 }
 0xc36   : > { %v2390_v38 = vpop.permute.xlu0 %2389 }
 0xc37   : > { %2414 = vst.msk [vmem:[#allocation3] sm:$0xff] %vm2413_vm2, %v2390_v38 }
 0xc3a   : > { %v2394_v37 = vpop.permute.xlu0 %2393 }
 0xc3b   : > { %2416 = vst.msk [vmem:[#allocation3 + $0x10] sm:$0xff] %vm2413_vm2, %v2394_v37 }
 0xc43   : > { %v2631_v39 = vpop.xlane.xlu1 %2630 }
 0xc44   : > { %4804 = vrcp.f32 %v2631_v39 }
 0xc45   : > { %4806 = vrcp.f32 %v2622_v33 }
 0xc46   : > { %4808 = vrcp.f32 %v2628_v25 }
 0xc47   : > { %v2625_v47 = vpop.xlane.xlu1 %2624 }
 0xc48   : > { %4810 = vrcp.f32 %v2625_v47  ;;  %v4100_v47 = vld [vmem:[%s6658_s23] ss:$0 sm:$0xff] }
 0xc4b   : > { %v2716_v50 = vpop.permute.xlu1 %2715 }
 0xc4c   : > { %4428 = vmatprep.subr.bf16.mxu1 %v2716_v50 }
 0xc4d   : > { %4429 = vmatpush3.bf16.msra.mxu1 %v2716_v50 }
 0xc4e   : > { %v4805_v51 = vpop.eup %4804 }
 0xc4f   : > { %v1999_v52 = vpop.permute.xlu1 %1998  ;;  %v4807_v24 = vpop.eup %4806  ;;  %v2647_v57 = vmul.f32 %v4805_v51, %v6148_v1 }
 0xc50   : > { %2022 = vst.msk [vmem:[#allocation3 + $0x8] sm:$0xff] %vm2020_vm1, %v1999_v52  ;;  %v4809_v30 = vpop.eup %4808  ;;  %v2644_v61 = vmul.f32 %v4807_v24, %v6142_v41 }
 0xc51   : > { %v2646_v0 = vmul.f32 %v4809_v30, %v6138_v3  ;;  %v4620_v3 = vld [vmem:[%s5627_s28] sm:$0xff]  }
 0xc52   : > { %v4811_v53 = vpop.eup %4810  ;;  %4434 = vmatprep.subr.bf16.mxu0 %v4620_v3 }
 0xc53   : > { %v2003_v28 = vpop.permute.xlu1 %2002  ;;  %v2645_v55 = vmul.f32 %v4811_v53, %v6154_v13  ;;  %v2651_v2 = vpack.c.bf16 %v2647_v57, %v2646_v0  ;;  %4435 = vmatpush3.bf16.msra.mxu0 %v4620_v3  ;;  %v4860_v57 = vld [vmem:[#allocation2] sm:$0xff] }
 0xc54   : > { %2024 = vst.msk [vmem:[#allocation3 + $0x18] sm:$0xff] %vm2020_vm1, %v2003_v28  ;;  %4436 = vmatprep.subr.bf16.mxu0 %v4621_v54 }
 0xc55   : > { %v2650_v40 = vpack.c.bf16 %v2645_v55, %v2644_v61  ;;  %v4861_v55 = vld [vmem:[#allocation2 + $0x8] sm:$0xff] }
 0xc57   : > { %4430 = vmatprep.mubr.msk.bf16.mxu1 %vm1291_vm0, %v2650_v40  ;;  %v2392_v4 = vpop.permute.xlu1 %2391  ;;  %4437 = vmatpush3.bf16.msra.mxu0 %v4621_v54  ;;  %v4862_v40 = vld [vmem:[#allocation2 + $0x10] sm:$0xff] }
 0xc58   : > { %2415 = vst.msk [vmem:[#allocation3 + $0x8] sm:$0xff] %vm2413_vm2, %v2392_v4  ;;  %4431 = vmatmul.mubr.msk.bf16.vlgmr.msra.gmra.mrb[44].mxu1 %vm1291_vm0, %v2651_v2  ;;  %4438 = vmatprep.subr.bf16.mxu0 %v4622_v5 }
 0xc59   : > { %3233 = vmatprep.mubr.bf16.mxu1 %v5199_v7 }
 0xc5b   : > { %v2396_v41 = vpop.permute.xlu1 %2395  ;;  %4439 = vmatpush3.bf16.msra.mxu0 %v4622_v5 }
 0xc5c   : > { %2417 = vst.msk [vmem:[#allocation3 + $0x18] sm:$0xff] %vm2413_vm2, %v2396_v41  ;;  %4440 = vmatprep.subr.bf16.mxu0 %v4623_v6  ;;  %v4863_v41 = vld [vmem:[#allocation2 + $0x18] sm:$0xff] }
 0xc5f   : > { %4441 = vmatpush3.bf16.msra.mxu0 %v4623_v6 }
 0xc60   : > { %4442 = vmatprep.subr.bf16.mxu0 %v4624_v48 }
 0xc63   : > { %4443 = vmatpush3.bf16.msra.mxu0 %v4624_v48 }
 0xc64   : > { %4444 = vmatprep.subr.bf16.mxu0 %v4625_v11 }
 0xc67   : > { %4445 = vmatpush3.bf16.msra.mxu0 %v4625_v11 }
 0xc68   : > { %4446 = vmatprep.subr.bf16.mxu0 %v4626_v43 }
 0xc6b   : > { %4447 = vmatpush3.bf16.msra.mxu0 %v4626_v43 }
 0xc6c   : > { %4448 = vmatprep.subr.bf16.mxu0 %v4627_v15 }
 0xc6f   : > { %4449 = vmatpush3.bf16.msra.mxu0 %v4627_v15  ;;  %v4864_v15 = vld [vmem:[#allocation2 + $0x20] sm:$0xff] }
 0xd06   : > { %v4424_v1 = vpop.f32.mrb[36].mxu0 }
 0xd07   : > { %v2698_v22 = vpop.f32.mrb[37].mxu0 }
 0xd08   : > { %2782 = vrot.lane.b32.xlu0 %v2698_v22, %s5200_s5  ;;  %v4425_v13 = vpop.f32.mrb[38].mxu0 }
 0xd09   : > { %v2701_v14 = vpop.f32.mrb[39].mxu0 }
 0xd0a   : > { %2784 = vrot.lane.b32.xlu1 %v2701_v14, %s5200_s5  ;;  %v4865_v14 = vld [vmem:[#allocation2 + $0x28] sm:$0xff] }
 0xd0c   : > { %2786 = vrot.lane.b32.xlu0 %v4424_v1, %s5200_s5 }
 0xd0e   : > { %2788 = vrot.lane.b32.xlu1 %v4425_v13, %s5200_s5 }
 0xd10   : > { %2004 = vrot.lane.b32.xlu0 %v6010_v59, %s5202_s20 }
 0xd12   : > { %2006 = vrot.lane.b32.xlu1 %v6014_v60, %s5202_s20 }
 0xd14   : > { %2008 = vrot.lane.b32.xlu0 %v6008_v58, %s5202_s20 }
 0xd16   : > { %2010 = vrot.lane.b32.xlu1 %v6012_v32, %s5202_s20 }
 0xd18   : > { %2397 = vrot.lane.b32.xlu0 %v6114_v21, %s5201_s11 }
 0xd1a   : > { %2399 = vrot.lane.b32.xlu1 %v6118_v9, %s5201_s11 }
 0xd1c   : > { %2401 = vrot.lane.b32.xlu0 %v6112_v8, %s5201_s11 }
 0xd1e   : > { %2403 = vrot.lane.b32.xlu1 %v6116_v20, %s5201_s11 }
 0xd2b   : > { %v4432_v59 = vpop.f32.mrb[44].mxu1 }
 0xd2c   : > { %v2759_v60 = vpop.f32.mrb[45].mxu1 }
 0xd2d   : > { %2790 = vrot.lane.b32.xlu0 %v2759_v60, %s5200_s5  ;;  %v4433_v58 = vpop.f32.mrb[46].mxu1  ;;  %v4866_v60 = vld [vmem:[#allocation2 + $0x30] sm:$0xff] }
 0xd2e   : > { %v2762_v45 = vpop.f32.mrb[47].mxu1 }
 0xd2f   : > { %2792 = vrot.lane.b32.xlu1 %v2762_v45, %s5200_s5  ;;  %v4867_v45 = vld [vmem:[#allocation2 + $0x38] sm:$0xff] }
 0xd31   : > { %2794 = vrot.lane.b32.xlu0 %v4432_v59, %s5200_s5 }
 0xd33   : > { %2796 = vrot.lane.b32.xlu1 %v4433_v58, %s5200_s5 }
 0xd7a   : > { %v2783_v32 = vpop.permute.xlu0 %2782 }
 0xd7b   : > { %2807 = vst.msk [vmem:[#allocation3] sm:$0xff] %vm2806_vm3, %v2783_v32 }
 0xd7c   : > { %v2785_v8 = vpop.permute.xlu1 %2784 }
 0xd7d   : > { %2808 = vst.msk [vmem:[#allocation3 + $0x8] sm:$0xff] %vm2806_vm3, %v2785_v8  ;;  %v4628_v8 = vld [vmem:[%s5629_s4] ss:$8 sps:$4 sm:$0xff]  }
 0xd7e   : > { %v2787_v21 = vpop.permute.xlu0 %2786 }
 0xd7f   : > { %2809 = vst.msk [vmem:[#allocation3 + $0x10] sm:$0xff] %vm2806_vm3, %v2787_v21  ;;  %v4630_v21 = vld [vmem:[%s5629_s4 + $0x4] ss:$8 sps:$4 sm:$0xff]  }
 0xd80   : > { %v2789_v20 = vpop.permute.xlu1 %2788  ;;  %3201 = vmatprep.subr.bf16.mxu1 %v4630_v21 }
 0xd81   : > { %2810 = vst.msk [vmem:[#allocation3 + $0x18] sm:$0xff] %vm2806_vm3, %v2789_v20  ;;  %v4633_v20 = vld [vmem:[%s5629_s4 + $0x14] ss:$8 sps:$4 sm:$0xff]   ;;  %3202 = vmatpush1.bf16.msra.mxu1 %v4628_v8 }
 0xd82   : > { %v2005_v9 = vpop.permute.xlu0 %2004  ;;  %v2815_v42 = vld [vmem:[#allocation3] sm:$0xff]  ;;  %3203 = vmatprep.subr.bf16.mxu1 %v4633_v20 }
 0xd83   : > { %2025 = vst.msk [vmem:[#allocation3 + $0x20] sm:$0xff] %vm2020_vm1, %v2005_v9  ;;  %v4631_v9 = vld [vmem:[%s5629_s4 + $0x10] ss:$8 sps:$4 sm:$0xff]  }
 0xd84   : > { %v2007_v36 = vpop.permute.xlu1 %2006  ;;  %v2816_v56 = vld [vmem:[#allocation3 + $0x8] sm:$0xff] }
 0xd85   : > { %2026 = vst.msk [vmem:[#allocation3 + $0x28] sm:$0xff] %vm2020_vm1, %v2007_v36  ;;  %v2823_v62 = vpack.c.bf16 %v2816_v56, %v2815_v42  ;;  %3204 = vmatpush1.bf16.msra.mxu1 %v4631_v9 }
 0xd86   : > { %v2009_v63 = vpop.permute.xlu0 %2008  ;;  %v2817_v19 = vld [vmem:[#allocation3 + $0x10] sm:$0xff] }
 0xd87   : > { %2027 = vst.msk [vmem:[#allocation3 + $0x30] sm:$0xff] %vm2020_vm1, %v2009_v63  ;;  %4450 = vmatprep.mubr.bf16.mxu0 %v2823_v62 }
 0xd88   : > { %v2011_v18 = vpop.permute.xlu1 %2010  ;;  %v2818_v46 = vld [vmem:[#allocation3 + $0x18] sm:$0xff] }
 0xd89   : > { %2028 = vst.msk [vmem:[#allocation3 + $0x38] sm:$0xff] %vm2020_vm1, %v2011_v18  ;;  %v2824_v17 = vpack.c.bf16 %v2818_v46, %v2817_v19 }
 0xd8a   : > { %v2398_v44 = vpop.permute.xlu0 %2397 }
 0xd8b   : > { %2418 = vst.msk [vmem:[#allocation3 + $0x20] sm:$0xff] %vm2413_vm2, %v2398_v44  ;;  %4451 = vmatmul.mubr.bf16.vlgmr.msra.gmra.mrb[40].mxu0 %v2824_v17 }
 0xd8c   : > { %v2400_v25 = vpop.permute.xlu1 %2399 }
 0xd8d   : > { %2419 = vst.msk [vmem:[#allocation3 + $0x28] sm:$0xff] %vm2413_vm2, %v2400_v25 }
 0xd8e   : > { %v2402_v33 = vpop.permute.xlu0 %2401 }
 0xd8f   : > { %2420 = vst.msk [vmem:[#allocation3 + $0x30] sm:$0xff] %vm2413_vm2, %v2402_v33 }
 0xd90   : > { %v2404_v16 = vpop.permute.xlu1 %2403 }
 0xd91   : > { %2421 = vst.msk [vmem:[#allocation3 + $0x38] sm:$0xff] %vm2413_vm2, %v2404_v16 }
 0xd9f   : > { %v2791_v23 = vpop.permute.xlu0 %2790 }
 0xda0   : > { %2811 = vst.msk [vmem:[#allocation3 + $0x20] sm:$0xff] %vm2806_vm3, %v2791_v23 }
 0xda1   : > { %v2793_v26 = vpop.permute.xlu1 %2792 }
 0xda2   : > { %2812 = vst.msk [vmem:[#allocation3 + $0x28] sm:$0xff] %vm2806_vm3, %v2793_v26 }
 0xda3   : > { %v2795_v27 = vpop.permute.xlu0 %2794 }
 0xda4   : > { %2813 = vst.msk [vmem:[#allocation3 + $0x30] sm:$0xff] %vm2806_vm3, %v2795_v27 }
 0xda5   : > { %v2797_v29 = vpop.permute.xlu1 %2796 }
 0xda6   : > { %2814 = vst.msk [vmem:[#allocation3 + $0x38] sm:$0xff] %vm2806_vm3, %v2797_v29  ;;  %v4636_v29 = vld [vmem:[%s5629_s4 + $0x24] ss:$8 sps:$4 sm:$0xff]  }
 0xda7   : > { %v2819_v31 = vld [vmem:[#allocation3 + $0x20] sm:$0xff]  ;;  %3205 = vmatprep.subr.bf16.mxu1 %v4636_v29 }
 0xda9   : > { %v2820_v34 = vld [vmem:[#allocation3 + $0x28] sm:$0xff] }
 0xdaa   : > { %v2825_v35 = vpack.c.bf16 %v2820_v34, %v2819_v31  ;;  %v4634_v31 = vld [vmem:[%s5629_s4 + $0x20] ss:$8 sps:$4 sm:$0xff]   ;;  %v4639_v34 = vld [vmem:[%s5629_s4 + $0x34] ss:$8 sps:$4 sm:$0xff]  }
 0xdab   : > { %v2821_v38 = vld [vmem:[#allocation3 + $0x30] sm:$0xff]  ;;  %3206 = vmatpush1.bf16.msra.mxu1 %v4634_v31 }
 0xdac   : > { %4454 = vmatprep.mubr.bf16.mxu0 %v2825_v35  ;;  %v4637_v35 = vld [vmem:[%s5629_s4 + $0x30] ss:$8 sps:$4 sm:$0xff]   ;;  %3207 = vmatprep.subr.bf16.mxu1 %v4639_v34 }
 0xdad   : > { %v2822_v37 = vld [vmem:[#allocation3 + $0x38] sm:$0xff] }
 0xdae   : > { %v2826_v39 = vpack.c.bf16 %v2822_v37, %v2821_v38  ;;  %v4642_v38 = vld [vmem:[%s5629_s4 + $0x44] ss:$8 sps:$4 sm:$0xff]   ;;  %v4640_v37 = vld [vmem:[%s5629_s4 + $0x40] ss:$8 sps:$4 sm:$0xff]  }
 0xdaf   : > { %3208 = vmatpush1.bf16.msra.mxu1 %v4637_v35 }
 0xdb0   : > { %4455 = vmatmul.mubr.bf16.gmra.mrb[44].mxu0 %v2826_v39  ;;  %3209 = vmatprep.subr.bf16.mxu1 %v4642_v38  ;;  %v4645_v39 = vld [vmem:[%s5629_s4 + $0x54] ss:$8 sps:$4 sm:$0xff]  }
 0xdb3   : > { %3210 = vmatpush1.bf16.msra.mxu1 %v4640_v37 }
 0xdb4   : > { %3211 = vmatprep.subr.bf16.mxu1 %v4645_v39 }
 0xe5e   : > { %v4452_v50 = vpop.f32.mrb[40].mxu0 }
 0xe5f   : > { %v2932_v51 = vpop.f32.mrb[41].mxu0  ;;  %v2941_v53 = vadd.f32 %v4452_v50, %v4100_v47  ;;  %v4648_v50 = vld [vmem:[%s5629_s4 + $0x64] ss:$8 sps:$4 sm:$0xff]  }
 0xe60   : > { %v2933_v52 = vadd.f32 %v4100_v47, %v2932_v51  ;;  %v4453_v24 = vpop.f32.mrb[42].mxu0 }
 0xe61   : > { %v2935_v30 = vpop.f32.mrb[43].mxu0  ;;  %v6251_v2 = vadd.f32 %v4862_v40, %v2941_v53  ;;  %v2944_v4 = vadd.f32 %v4453_v24, %v4100_v47 }
 0xe62   : > { %v6246_v28 = vadd.f32 %v4860_v57, %v2933_v52  ;;  %v2936_v61 = vadd.f32 %v4100_v47, %v2935_v30  ;;  %v4646_v52 = vld [vmem:[%s5629_s4 + $0x60] ss:$8 sps:$4 sm:$0xff]   ;;  %v4651_v30 = vld [vmem:[%s5629_s4 + $0x74] ss:$8 sps:$4 sm:$0xff]   ;;  %v4649_v57 = vld [vmem:[%s5629_s4 + $0x70] ss:$8 sps:$4 sm:$0xff]  }
 0xe63   : > { %v6255_v3 = vadd.f32 %v4863_v41, %v2944_v4 }
 0xe64   : > { %v6248_v0 = vadd.f32 %v4861_v55, %v2936_v61  ;;  %2973 = vadd.xlane.f32.xlu0 %v6246_v28 }
 0xe66   : > { %2975 = vadd.xlane.f32.xlu1 %v6248_v0 }
 0xe68   : > { %2977 = vadd.xlane.f32.xlu0 %v6251_v2 }
 0xe6c   : > { %2979 = vadd.xlane.f32.xlu0 %v6255_v3 }
 0xe83   : > { %v4456_v54 = vpop.f32.mrb[44].mxu0 }
 0xe84   : > { %v2948_v5 = vpop.f32.mrb[45].mxu0  ;;  %v2957_v43 = vadd.f32 %v4456_v54, %v4100_v47 }
 0xe85   : > { %v2949_v6 = vadd.f32 %v4100_v47, %v2948_v5  ;;  %v4457_v48 = vpop.f32.mrb[46].mxu0 }
 0xe86   : > { %v2951_v11 = vpop.f32.mrb[47].mxu0  ;;  %v2960_v13 = vadd.f32 %v4457_v48, %v4100_v47  ;;  %v6263_v58 = vadd.f32 %v4866_v60, %v2957_v43 }
 0xe87   : > { %v6258_v1 = vadd.f32 %v4864_v15, %v2949_v6  ;;  %v2952_v22 = vadd.f32 %v4100_v47, %v2951_v11  ;;  %v4643_v47 = vld [vmem:[%s5629_s4 + $0x50] ss:$8 sps:$4 sm:$0xff]  }
 0xe88   : > { %v6266_v32 = vadd.f32 %v4867_v45, %v2960_v13  ;;  %3212 = vmatpush1.bf16.msra.mxu1 %v4643_v47 }
 0xe89   : > { %v6260_v59 = vadd.f32 %v4865_v14, %v2952_v22  ;;  %2981 = vadd.xlane.f32.xlu0 %v6258_v1  ;;  %3213 = vmatprep.subr.bf16.mxu1 %v4648_v50 }
 0xe8b   : > { %2983 = vadd.xlane.f32.xlu1 %v6260_v59 }
 0xe8c   : > { %3214 = vmatpush1.bf16.msra.mxu1 %v4646_v52 }
 0xe8d   : > { %2985 = vadd.xlane.f32.xlu0 %v6263_v58  ;;  %3215 = vmatprep.subr.bf16.mxu1 %v4651_v30 }
 0xe8f   : > { %2987 = vadd.xlane.f32.xlu1 %v6266_v32 }
 0xe90   : > { %3216 = vmatpush1.bf16.msra.mxu1 %v4649_v57 }
 0xef1   : > { %v2974_v36 = vpop.xlane.xlu0 %2973 }
 0xef2   : > { %v2989_v42 = vmul.f32 0.0078125, %v2974_v36 }
 0xef3   : > { %v2976_v56 = vpop.xlane.xlu1 %2975 }
 0xef4   : > { %v6275_v62 = vsub.f32 %v6246_v28, %v2989_v42  ;;  %v2990_v63 = vmul.f32 0.0078125, %v2976_v56 }
 0xef5   : > { %v2978_v18 = vpop.xlane.xlu0 %2977 }
 0xef6   : > { %v6278_v19 = vsub.f32 %v6248_v0, %v2990_v63  ;;  %v2991_v46 = vmul.f32 0.0078125, %v2978_v18  ;;  %v3005_v17 = vmul.f32 %v6275_v62, %v6275_v62 }
 0xef8   : > { %v6283_v44 = vsub.f32 %v6251_v2, %v2991_v46  ;;  %3013 = vadd.xlane.f32.xlu0 %v3005_v17  ;;  %v3006_v25 = vmul.f32 %v6278_v19, %v6278_v19  ;;  %v4109_v46 = vld [vmem:[%s800_s16] ss:$0 sm:$0xff] }
 0xef9   : > { %v2980_v33 = vpop.xlane.xlu0 %2979 }
 0xefa   : > { %v2992_v16 = vmul.f32 0.0078125, %v2980_v33  ;;  %3015 = vadd.xlane.f32.xlu1 %v3006_v25  ;;  %v3007_v23 = vmul.f32 %v6283_v44, %v6283_v44 }
 0xefc   : > { %v6290_v26 = vsub.f32 %v6255_v3, %v2992_v16  ;;  %3017 = vadd.xlane.f32.xlu0 %v3007_v23 }
 0xefe   : > { %v3008_v27 = vmul.f32 %v6290_v26, %v6290_v26 }
 0xf00   : > { %3019 = vadd.xlane.f32.xlu1 %v3008_v27  ;;  %v4110_v27 = vld [vmem:[%s803_s17] ss:$0 sm:$0xff] }
 0xf16   : > { %v2982_v51 = vpop.xlane.xlu0 %2981 }
 0xf17   : > { %v2993_v24 = vmul.f32 0.0078125, %v2982_v51 }
 0xf18   : > { %v2984_v53 = vpop.xlane.xlu1 %2983 }
 0xf19   : > { %v6307_v61 = vsub.f32 %v6258_v1, %v2993_v24  ;;  %v2994_v55 = vmul.f32 0.0078125, %v2984_v53 }
 0xf1a   : > { %v2986_v40 = vpop.xlane.xlu0 %2985 }
 0xf1b   : > { %v6310_v4 = vsub.f32 %v6260_v59, %v2994_v55  ;;  %v2995_v41 = vmul.f32 0.0078125, %v2986_v40  ;;  %v3009_v54 = vmul.f32 %v6307_v61, %v6307_v61 }
 0xf1c   : > { %v2988_v5 = vpop.xlane.xlu1 %2987 }
 0xf1d   : > { %v6315_v6 = vsub.f32 %v6263_v58, %v2995_v41  ;;  %v2996_v48 = vmul.f32 0.0078125, %v2988_v5  ;;  %3021 = vadd.xlane.f32.xlu0 %v3009_v54  ;;  %v3010_v11 = vmul.f32 %v6310_v4, %v6310_v4 }
 0xf1f   : > { %v6320_v43 = vsub.f32 %v6266_v32, %v2996_v48  ;;  %3023 = vadd.xlane.f32.xlu1 %v3010_v11  ;;  %v3011_v15 = vmul.f32 %v6315_v6, %v6315_v6 }
 0xf21   : > { %3025 = vadd.xlane.f32.xlu0 %v3011_v15  ;;  %v3012_v22 = vmul.f32 %v6320_v43, %v6320_v43 }
 0xf23   : > { %3027 = vadd.xlane.f32.xlu1 %v3012_v22 }
 0xf85   : > { %v3014_v13 = vpop.xlane.xlu0 %3013 }
 0xf86   : > { %v3029_v14 = vmul.f32 0.0078125, %v3014_v13 }
 0xf87   : > { %v3016_v60 = vpop.xlane.xlu1 %3015 }
 0xf88   : > { %v3037_v45 = vadd.f32 1e-05, %v3029_v14  ;;  %v3030_v8 = vmul.f32 0.0078125, %v3016_v60 }
 0xf89   : > { %v3018_v21 = vpop.xlane.xlu0 %3017 }
 0xf8a   : > { %4812 = vrsqrt.f32 %v3037_v45  ;;  %v3038_v20 = vadd.f32 1e-05, %v3030_v8  ;;  %v3031_v9 = vmul.f32 0.0078125, %v3018_v21 }
 0xf8c   : > { %4814 = vrsqrt.f32 %v3038_v20  ;;  %v3039_v36 = vadd.f32 1e-05, %v3031_v9 }
 0xf8d   : > { %v3020_v42 = vpop.xlane.xlu1 %3019 }
 0xf8e   : > { %4816 = vrsqrt.f32 %v3039_v36  ;;  %v3032_v56 = vmul.f32 0.0078125, %v3020_v42 }
 0xf90   : > { %v3040_v63 = vadd.f32 1e-05, %v3032_v56 }
 0xf92   : > { %4818 = vrsqrt.f32 %v3040_v63 }
 0xf94   : > { %v4813_v18 = vpop.eup %4812 }
 0xf95   : > { %v3053_v17 = vmul.f32 %v4813_v18, %v6275_v62  ;;  %v4652_v18 = vld [vmem:[%s5667_s25 + $0x40] sm:$0xff]  }
 0xf96   : > { %v4815_v25 = vpop.eup %4814  ;;  %4242 = vmatprep.subr.bf16.mxu0 %v4652_v18 }
 0xf97   : > { %v3054_v33 = vmul.f32 %v4815_v25, %v6278_v19  ;;  %v3067_v16 = vmul.f32 %v4109_v46, %v3053_v17  ;;  %v4655_v17 = vld [vmem:[%s5667_s25 + $0x8] sm:$0xff]   ;;  %v4658_v25 = vld [vmem:[%s5667_s25 + $0x58] sm:$0xff]  }
 0xf98   : > { %v4817_v23 = vpop.eup %4816 }
 0xf99   : > { %v3068_v29 = vmul.f32 %v4109_v46, %v3054_v33  ;;  %v3081_v31 = vadd.f32 %v4110_v27, %v3067_v16  ;;  %v3055_v35 = vmul.f32 %v4817_v23, %v6283_v44  ;;  %v4659_v33 = vld [vmem:[%s5667_s25 + $0x18] sm:$0xff]   ;;  %v4660_v16 = vld [vmem:[%s5667_s25 + $0x60] sm:$0xff]  }
 0xf9a   : > { %v4661_v23 = vld [vmem:[%s5667_s25 + $0x20] sm:$0xff]  }
 0xf9b   : > { %v3082_v34 = vadd.f32 %v4110_v27, %v3068_v29  ;;  %v3069_v62 = vmul.f32 %v4109_v46, %v3055_v35  ;;  %v4663_v29 = vld [vmem:[%s5667_s25 + $0x28] sm:$0xff]   ;;  %v4666_v35 = vld [vmem:[%s5667_s25 + $0x78] sm:$0xff]  }
 0xf9c   : > { %v4819_v38 = vpop.eup %4818 }
 0xf9d   : > { %v3089_v37 = vpack.c.bf16 %v3082_v34, %v3081_v31  ;;  %v3056_v39 = vmul.f32 %v4819_v38, %v6290_v26  ;;  %v3083_v50 = vadd.f32 %v4110_v27, %v3069_v62  ;;  %v4664_v31 = vld [vmem:[%s5667_s25 + $0x70] sm:$0xff]   ;;  %v4667_v38 = vld [vmem:[%s5667_s25 + $0x38] sm:$0xff]  }
 0xf9e   : > { %v4665_v34 = vld [vmem:[%s5667_s25 + $0x30] sm:$0xff]  }
 0xf9f   : > { %3234 = vmatmul.mubr.bf16.vlgmr.msra.gmra.mrb[48].mxu1 %v3089_v37  ;;  %v3070_v47 = vmul.f32 %v4109_v46, %v3056_v39  ;;  %v3109_v37 = vld [vmem:[%s5661_s22] sm:$0x3] }
 0xfa0   : > { %3243 = vmatprep.mubr.bf16.mxu1 %v5199_v7  ;;  %v6366_v39 = vrot.slane %v3109_v37, %v1000_v49  ;;  %v6370_v62 = vrot.slane %v3109_v37, %v1004_v12 }
 0xfa1   : > { %v3084_v19 = vadd.f32 %v4110_v27, %v3070_v47 }
 0xfa3   : > { %v3090_v51 = vpack.c.bf16 %v3084_v19, %v3083_v50 }
 0xfa7   : > { %3244 = vmatmul.mubr.bf16.gmra.mrb[52].mxu1 %v3090_v51 }
 0xfa8   : > { %3253 = vmatprep.mubr.bf16.mxu1 %v5199_v7 }
 0xfaa   : > { %v3022_v52 = vpop.xlane.xlu0 %3021 }
 0xfab   : > { %v3033_v24 = vmul.f32 0.0078125, %v3022_v52 }
 0xfac   : > { %v3024_v30 = vpop.xlane.xlu1 %3023 }
 0xfad   : > { %v3041_v53 = vadd.f32 1e-05, %v3033_v24  ;;  %v3034_v44 = vmul.f32 0.0078125, %v3024_v30 }
 0xfae   : > { %v3026_v57 = vpop.xlane.xlu0 %3025 }
 0xfaf   : > { %4820 = vrsqrt.f32 %v3041_v53  ;;  %v3042_v55 = vadd.f32 1e-05, %v3034_v44  ;;  %v3035_v26 = vmul.f32 0.0078125, %v3026_v57 }
 0xfb0   : > { %v3028_v40 = vpop.xlane.xlu1 %3027 }
 0xfb1   : > { %4822 = vrsqrt.f32 %v3042_v55  ;;  %v3043_v41 = vadd.f32 1e-05, %v3035_v26  ;;  %v3036_v54 = vmul.f32 0.0078125, %v3028_v40 }
 0xfb3   : > { %4824 = vrsqrt.f32 %v3043_v41  ;;  %v3044_v5 = vadd.f32 1e-05, %v3036_v54 }
 0xfb5   : > { %4826 = vrsqrt.f32 %v3044_v5 }
 0xfb9   : > { %v4821_v48 = vpop.eup %4820 }
 0xfba   : > { %v3057_v11 = vmul.f32 %v4821_v48, %v6307_v61 }
 0xfbb   : > { %v4823_v15 = vpop.eup %4822 }
 0xfbc   : > { %v3058_v22 = vmul.f32 %v4823_v15, %v6310_v4  ;;  %v3071_v13 = vmul.f32 %v4109_v46, %v3057_v11 }
 0xfbd   : > { %v4825_v14 = vpop.eup %4824 }
 0xfbe   : > { %v3072_v60 = vmul.f32 %v4109_v46, %v3058_v22  ;;  %v3085_v8 = vadd.f32 %v4110_v27, %v3071_v13  ;;  %v3059_v20 = vmul.f32 %v4825_v14, %v6315_v6  ;;  %v4653_v6 = vld [vmem:[%s5667_s25] sm:$0xff]  }
 0xfbf   : > { %v4827_v45 = vpop.eup %4826  ;;  %4243 = vmatpush3.bf16.msra.mxu0 %v4653_v6 }
 0xfc0   : > { %v3086_v21 = vadd.f32 %v4110_v27, %v3072_v60  ;;  %v3060_v9 = vmul.f32 %v4827_v45, %v6320_v43  ;;  %v3073_v61 = vmul.f32 %v4109_v46, %v3059_v20  ;;  %v4654_v43 = vld [vmem:[%s5667_s25 + $0x48] sm:$0xff]  }
 0xfc1   : > { %4244 = vmatprep.subr.bf16.mxu0 %v4654_v43 }
 0xfc2   : > { %v3091_v36 = vpack.c.bf16 %v3086_v21, %v3085_v8  ;;  %v3074_v42 = vmul.f32 %v4109_v46, %v3060_v9  ;;  %v3087_v56 = vadd.f32 %v4110_v27, %v3073_v61  ;;  %v4657_v46 = vld [vmem:[%s5667_s25 + $0x10] sm:$0xff]  }
 0xfc3   : > { %4245 = vmatpush3.bf16.msra.mxu0 %v4655_v17 }
 0xfc4   : > { %3254 = vmatmul.mubr.bf16.gmra.mrb[56].mxu1 %v3091_v36  ;;  %v3088_v4 = vadd.f32 %v4110_v27, %v3074_v42  ;;  %v4662_v27 = vld [vmem:[%s5667_s25 + $0x68] sm:$0xff]  }
 0xfc5   : > { %3263 = vmatprep.mubr.bf16.mxu1 %v5199_v7  ;;  %v4656_v7 = vld [vmem:[%s5667_s25 + $0x50] sm:$0xff]  }
 0xfc6   : > { %v3092_v63 = vpack.c.bf16 %v3088_v4, %v3087_v56  ;;  %4246 = vmatprep.subr.bf16.mxu0 %v4656_v7 }
 0xfc7   : > { %4247 = vmatpush3.bf16.msra.mxu0 %v4657_v46 }
 0xfc8   : > { %4248 = vmatprep.subr.bf16.mxu0 %v4658_v25 }
 0xfcb   : > { %4249 = vmatpush3.bf16.msra.mxu0 %v4659_v33 }
 0xfcc   : > { %3264 = vmatmul.mubr.bf16.gmra.mrb[60].mxu1 %v3092_v63  ;;  %4250 = vmatprep.subr.bf16.mxu0 %v4660_v16 }
 0xfcf   : > { %4251 = vmatpush3.bf16.msra.mxu0 %v4661_v23 }
 0xfd0   : > { %4252 = vmatprep.subr.bf16.mxu0 %v4662_v27 }
 0xfd3   : > { %4253 = vmatpush3.bf16.msra.mxu0 %v4663_v29 }
 0xfd4   : > { %4254 = vmatprep.subr.bf16.mxu0 %v4664_v31 }
 0xfd7   : > { %4255 = vmatpush3.bf16.msra.mxu0 %v4665_v34 }
 0xfd8   : > { %4256 = vmatprep.subr.bf16.mxu0 %v4666_v35 }
 0xfdb   : > { %4257 = vmatpush3.bf16.msra.mxu0 %v4667_v38 }
0x1072   : > { %v3235_v47 = vpop.f32.mrb[48].mxu1 }
0x1073   : > { %v6373_v19 = vadd.f32 %v3235_v47, %v6366_v39  ;;  %v3237_v50 = vpop.f32.mrb[49].mxu1 }
0x1074   : > { %v6376_v51 = vadd.f32 %v3237_v50, %v6370_v62  ;;  %v3239_v52 = vpop.f32.mrb[50].mxu1 }
0x1075   : > { %v3290_v24 = vmul.f32 0.044715, %v6373_v19  ;;  %v6380_v30 = vadd.f32 %v3239_v52, %v6366_v39  ;;  %v3241_v49 = vpop.f32.mrb[51].mxu1 }
0x1076   : > { %v3291_v53 = vmul.f32 0.044715, %v6376_v51  ;;  %v6384_v10 = vadd.f32 %v3241_v49, %v6370_v62 }
0x1077   : > { %v3306_v12 = vmul.f32 %v3290_v24, %v6373_v19  ;;  %v3292_v44 = vmul.f32 0.044715, %v6380_v30 }
0x1078   : > { %v3307_v57 = vmul.f32 %v3291_v53, %v6376_v51  ;;  %v3293_v55 = vmul.f32 0.044715, %v6384_v10 }
0x1079   : > { %v3322_v26 = vmul.f32 %v3306_v12, %v6373_v19  ;;  %v3308_v40 = vmul.f32 %v3292_v44, %v6380_v30 }
0x107a   : > { %v3323_v41 = vmul.f32 %v3307_v57, %v6376_v51  ;;  %v3309_v54 = vmul.f32 %v3293_v55, %v6384_v10  ;;  %v3245_v5 = vpop.f32.mrb[52].mxu1  ;;  %v3274_v57 = vmul.f32 0.5, %v6373_v19  ;;  %v3276_v55 = vmul.f32 0.5, %v6380_v30 }
0x107b   : > { %v3338_v48 = vadd.f32 %v3322_v26, %v6373_v19  ;;  %v3324_v11 = vmul.f32 %v3308_v40, %v6380_v30  ;;  %v6397_v15 = vadd.f32 %v3245_v5, %v6366_v39  ;;  %v3247_v22 = vpop.f32.mrb[53].mxu1  ;;  %v3275_v40 = vmul.f32 0.5, %v6376_v51 }
0x107c   : > { %v3325_v13 = vmul.f32 %v3309_v54, %v6384_v10  ;;  %v6401_v14 = vadd.f32 %v3247_v22, %v6370_v62  ;;  %v3249_v60 = vpop.f32.mrb[54].mxu1  ;;  %v3339_v45 = vadd.f32 %v3323_v41, %v6376_v51  ;;  %v3277_v41 = vmul.f32 0.5, %v6384_v10 }
0x107d   : > { %v3354_v8 = vmul.f32 0.7978846, %v3338_v48  ;;  %v3340_v21 = vadd.f32 %v3324_v11, %v6380_v30  ;;  %v3294_v20 = vmul.f32 0.044715, %v6397_v15  ;;  %v3250_v9 = vadd.f32 %v3249_v60, %v6366_v39  ;;  %v3251_v36 = vpop.f32.mrb[55].mxu1 }
0x107e   : > { %v3295_v42 = vmul.f32 0.044715, %v6401_v14  ;;  %v3252_v61 = vadd.f32 %v3251_v36, %v6370_v62  ;;  %v3341_v4 = vadd.f32 %v3325_v13, %v6384_v10  ;;  %v3355_v56 = vmul.f32 0.7978846, %v3339_v45 }
0x107f   : > { %4828 = vtanh.f32 %v3354_v8  ;;  %v3356_v63 = vmul.f32 0.7978846, %v3340_v21  ;;  %v3310_v18 = vmul.f32 %v3294_v20, %v6397_v15  ;;  %v3296_v6 = vmul.f32 0.044715, %v3250_v9 }
0x1080   : > { %v3311_v43 = vmul.f32 %v3295_v42, %v6401_v14  ;;  %v3297_v17 = vmul.f32 0.044715, %v3252_v61  ;;  %v3357_v7 = vmul.f32 0.7978846, %v3341_v4  ;;  %4830 = vtanh.f32 %v3355_v56 }
0x1081   : > { %4832 = vtanh.f32 %v3356_v63  ;;  %v3326_v46 = vmul.f32 %v3310_v18, %v6397_v15  ;;  %v3312_v25 = vmul.f32 %v3296_v6, %v3250_v9  ;;  %v3278_v30 = vmul.f32 0.5, %v6397_v15 }
0x1082   : > { %v3327_v33 = vmul.f32 %v3311_v43, %v6401_v14  ;;  %v3313_v16 = vmul.f32 %v3297_v17, %v3252_v61  ;;  %4834 = vtanh.f32 %v3357_v7  ;;  %v3280_v51 = vmul.f32 0.5, %v3250_v9 }
0x1083   : > { %v3328_v23 = vmul.f32 %v3312_v25, %v3250_v9  ;;  %v3342_v27 = vadd.f32 %v3326_v46, %v6397_v15  ;;  %v3279_v10 = vmul.f32 0.5, %v6401_v14  ;;  %v3281_v4 = vmul.f32 0.5, %v3252_v61 }
0x1084   : > { %v3329_v29 = vmul.f32 %v3313_v16, %v3252_v61  ;;  %v3343_v31 = vadd.f32 %v3327_v33, %v6401_v14 }
0x1085   : > { %v3344_v34 = vadd.f32 %v3328_v23, %v3250_v9  ;;  %v3358_v35 = vmul.f32 0.7978846, %v3342_v27 }
0x1086   : > { %v3345_v38 = vadd.f32 %v3329_v29, %v3252_v61  ;;  %v3359_v37 = vmul.f32 0.7978846, %v3343_v31 }
0x1087   : > { %v3360_v47 = vmul.f32 0.7978846, %v3344_v34  ;;  %4836 = vtanh.f32 %v3358_v35 }
0x1088   : > { %v3361_v50 = vmul.f32 0.7978846, %v3345_v38  ;;  %4838 = vtanh.f32 %v3359_v37 }
0x1089   : > { %v4829_v52 = vpop.eup %4828  ;;  %4840 = vtanh.f32 %v3360_v47 }
0x108a   : > { %v4831_v24 = vpop.eup %4830  ;;  %v3386_v49 = vadd.f32 1.0, %v4829_v52  ;;  %4842 = vtanh.f32 %v3361_v50 }
0x108b   : > { %v4833_v53 = vpop.eup %4832  ;;  %v3387_v12 = vadd.f32 1.0, %v4831_v24 }
0x108c   : > { %v4835_v44 = vpop.eup %4834  ;;  %v3388_v26 = vadd.f32 1.0, %v4833_v53  ;;  %v3402_v5 = vmul.f32 %v3386_v49, %v3274_v57 }
0x108d   : > { %v3389_v54 = vadd.f32 1.0, %v4835_v44  ;;  %v3403_v11 = vmul.f32 %v3387_v12, %v3275_v40 }
0x108e   : > { %v3404_v48 = vmul.f32 %v3388_v26, %v3276_v55 }
0x108f   : > { %v3405_v22 = vmul.f32 %v3389_v54, %v3277_v41 }
0x1090   : > { %v3418_v13 = vpack.c.bf16 %v3404_v48, %v3402_v5 }
0x1091   : > { %v4837_v60 = vpop.eup %4836  ;;  %v3419_v45 = vpack.c.bf16 %v3405_v22, %v3403_v11 }
0x1092   : > { %v4839_v8 = vpop.eup %4838  ;;  %v3390_v21 = vadd.f32 1.0, %v4837_v60 }
0x1093   : > { %v4841_v20 = vpop.eup %4840  ;;  %3593 = vmatprep.mubr.bf16.mxu0 %v3419_v45  ;;  %v3391_v19 = vadd.f32 1.0, %v4839_v8 }
0x1094   : > { %v4843_v36 = vpop.eup %4842  ;;  %3594 = vmatmul.mubr.bf16.vlgmr.msra.gmra.mrb[48].mxu0 %v3418_v13  ;;  %v3392_v42 = vadd.f32 1.0, %v4841_v20  ;;  %v3406_v63 = vmul.f32 %v3390_v21, %v3278_v30 }
0x1095   : > { %v3393_v56 = vadd.f32 1.0, %v4843_v36  ;;  %v3407_v43 = vmul.f32 %v3391_v19, %v3279_v10 }
0x1096   : > { %v3408_v18 = vmul.f32 %v3392_v42, %v3280_v51 }
0x1097   : > { %v3255_v6 = vpop.f32.mrb[56].mxu1  ;;  %v3409_v17 = vmul.f32 %v3393_v56, %v3281_v4 }
0x1098   : > { %v6423_v7 = vadd.f32 %v3255_v6, %v6366_v39  ;;  %v3257_v46 = vpop.f32.mrb[57].mxu1  ;;  %v3420_v25 = vpack.c.bf16 %v3408_v18, %v3406_v63 }
0x1099   : > { %v6426_v33 = vadd.f32 %v3257_v46, %v6370_v62  ;;  %v3259_v15 = vpop.f32.mrb[58].mxu1  ;;  %v3421_v9 = vpack.c.bf16 %v3409_v17, %v3407_v43 }
0x109a   : > { %v3298_v16 = vmul.f32 0.044715, %v6423_v7  ;;  %v6430_v14 = vadd.f32 %v3259_v15, %v6366_v39  ;;  %v3261_v61 = vpop.f32.mrb[59].mxu1 }
0x109b   : > { %v3299_v23 = vmul.f32 0.044715, %v6426_v33  ;;  %v6434_v27 = vadd.f32 %v3261_v61, %v6370_v62  ;;  %3601 = vmatprep.mubr.bf16.mxu0 %v3421_v9 }
0x109c   : > { %v3314_v29 = vmul.f32 %v3298_v16, %v6423_v7  ;;  %v3300_v31 = vmul.f32 0.044715, %v6430_v14  ;;  %3602 = vmatmul.mubr.bf16.gmra.mrb[52].mxu0 %v3420_v25 }
0x109d   : > { %v3315_v34 = vmul.f32 %v3299_v23, %v6426_v33  ;;  %v3301_v35 = vmul.f32 0.044715, %v6434_v27 }
0x109e   : > { %v3330_v38 = vmul.f32 %v3314_v29, %v6423_v7  ;;  %v3316_v37 = vmul.f32 %v3300_v31, %v6430_v14  ;;  %v3282_v29 = vmul.f32 0.5, %v6423_v7  ;;  %v3284_v31 = vmul.f32 0.5, %v6430_v14 }
0x109f   : > { %v3331_v47 = vmul.f32 %v3315_v34, %v6426_v33  ;;  %v3317_v50 = vmul.f32 %v3301_v35, %v6434_v27  ;;  %v3265_v52 = vpop.f32.mrb[60].mxu1  ;;  %v3283_v35 = vmul.f32 0.5, %v6426_v33 }
0x10a0   : > { %v3332_v24 = vmul.f32 %v3316_v37, %v6430_v14  ;;  %v6446_v49 = vadd.f32 %v3265_v52, %v6366_v39  ;;  %v3267_v53 = vpop.f32.mrb[61].mxu1  ;;  %v3346_v12 = vadd.f32 %v3330_v38, %v6423_v7  ;;  %v3285_v38 = vmul.f32 0.5, %v6434_v27 }
0x10a1   : > { %v3333_v44 = vmul.f32 %v3317_v50, %v6434_v27  ;;  %v6451_v57 = vadd.f32 %v3267_v53, %v6370_v62  ;;  %v3269_v55 = vpop.f32.mrb[62].mxu1  ;;  %v3347_v26 = vadd.f32 %v3331_v47, %v6426_v33 }
0x10a2   : > { %v3302_v40 = vmul.f32 0.044715, %v6446_v49  ;;  %v3270_v41 = vadd.f32 %v3269_v55, %v6366_v39  ;;  %v3271_v54 = vpop.f32.mrb[63].mxu1  ;;  %v3348_v5 = vadd.f32 %v3332_v24, %v6430_v14  ;;  %v3362_v48 = vmul.f32 0.7978846, %v3346_v12 }
0x10a3   : > { %v3303_v11 = vmul.f32 0.044715, %v6451_v57  ;;  %v3272_v22 = vadd.f32 %v3271_v54, %v6370_v62  ;;  %v3349_v13 = vadd.f32 %v3333_v44, %v6434_v27  ;;  %v3363_v60 = vmul.f32 0.7978846, %v3347_v26 }
0x10a4   : > { %v3318_v45 = vmul.f32 %v3302_v40, %v6446_v49  ;;  %v3304_v8 = vmul.f32 0.044715, %v3270_v41  ;;  %v3364_v21 = vmul.f32 0.7978846, %v3348_v5  ;;  %4844 = vtanh.f32 %v3362_v48 }
0x10a5   : > { %v3319_v20 = vmul.f32 %v3303_v11, %v6451_v57  ;;  %v3305_v19 = vmul.f32 0.044715, %v3272_v22  ;;  %v3365_v39 = vmul.f32 0.7978846, %v3349_v13  ;;  %4846 = vtanh.f32 %v3363_v60 }
0x10a6   : > { %v3334_v36 = vmul.f32 %v3318_v45, %v6446_v49  ;;  %v3320_v30 = vmul.f32 %v3304_v8, %v3270_v41  ;;  %4848 = vtanh.f32 %v3364_v21  ;;  %v3286_v33 = vmul.f32 0.5, %v6446_v49 }
0x10a7   : > { %v3335_v51 = vmul.f32 %v3319_v20, %v6451_v57  ;;  %v3321_v62 = vmul.f32 %v3305_v19, %v3272_v22  ;;  %4850 = vtanh.f32 %v3365_v39  ;;  %v3288_v14 = vmul.f32 0.5, %v3270_v41 }
0x10a8   : > { %v3336_v42 = vmul.f32 %v3320_v30, %v3270_v41  ;;  %v3350_v10 = vadd.f32 %v3334_v36, %v6446_v49  ;;  %v3287_v5 = vmul.f32 0.5, %v6451_v57  ;;  %v3289_v48 = vmul.f32 0.5, %v3272_v22  ;;  %v4127_v49 = vld [vmem:[%s810_s1] ss:$0 sm:$0xff] }
0x10a9   : > { %v3337_v4 = vmul.f32 %v3321_v62, %v3272_v22  ;;  %v3351_v56 = vadd.f32 %v3335_v51, %v6451_v57 }
0x10aa   : > { %v3352_v63 = vadd.f32 %v3336_v42, %v3270_v41  ;;  %v3366_v18 = vmul.f32 0.7978846, %v3350_v10 }
0x10ab   : > { %v3353_v6 = vadd.f32 %v3337_v4, %v3272_v22  ;;  %v3367_v43 = vmul.f32 0.7978846, %v3351_v56 }
0x10ac   : > { %v3368_v17 = vmul.f32 0.7978846, %v3352_v63  ;;  %4852 = vtanh.f32 %v3366_v18 }
0x10ad   : > { %v3369_v46 = vmul.f32 0.7978846, %v3353_v6  ;;  %4854 = vtanh.f32 %v3367_v43 }
0x10ae   : > { %v4845_v25 = vpop.eup %4844  ;;  %4856 = vtanh.f32 %v3368_v17 }
0x10af   : > { %v4847_v15 = vpop.eup %4846  ;;  %v3394_v9 = vadd.f32 1.0, %v4845_v25  ;;  %4858 = vtanh.f32 %v3369_v46 }
0x10b0   : > { %v4849_v16 = vpop.eup %4848  ;;  %v3395_v61 = vadd.f32 1.0, %v4847_v15 }
0x10b1   : > { %v4851_v23 = vpop.eup %4850  ;;  %v3396_v34 = vadd.f32 1.0, %v4849_v16  ;;  %v3410_v47 = vmul.f32 %v3394_v9, %v3282_v29 }
0x10b2   : > { %v3397_v37 = vadd.f32 1.0, %v4851_v23  ;;  %v3411_v52 = vmul.f32 %v3395_v61, %v3283_v35 }
0x10b3   : > { %v3412_v50 = vmul.f32 %v3396_v34, %v3284_v31 }
0x10b4   : > { %v3413_v24 = vmul.f32 %v3397_v37, %v3285_v38 }
0x10b5   : > { %v3422_v53 = vpack.c.bf16 %v3412_v50, %v3410_v47 }
0x10b6   : > { %v4853_v12 = vpop.eup %4852  ;;  %v3423_v44 = vpack.c.bf16 %v3413_v24, %v3411_v52 }
0x10b7   : > { %v4855_v55 = vpop.eup %4854  ;;  %v3398_v26 = vadd.f32 1.0, %v4853_v12 }
0x10b8   : > { %v4857_v40 = vpop.eup %4856  ;;  %3609 = vmatprep.mubr.bf16.mxu0 %v3423_v44  ;;  %v3399_v7 = vadd.f32 1.0, %v4855_v55 }
0x10b9   : > { %v4859_v54 = vpop.eup %4858  ;;  %3610 = vmatmul.mubr.bf16.gmra.mrb[56].mxu0 %v3422_v53  ;;  %v3400_v27 = vadd.f32 1.0, %v4857_v40  ;;  %v3414_v13 = vmul.f32 %v3398_v26, %v3286_v33 }
0x10ba   : > { %v3401_v11 = vadd.f32 1.0, %v4859_v54  ;;  %v3415_v45 = vmul.f32 %v3399_v7, %v3287_v5 }
0x10bb   : > { %v3416_v60 = vmul.f32 %v3400_v27, %v3288_v14 }
0x10bc   : > { %v3417_v8 = vmul.f32 %v3401_v11, %v3289_v48 }
0x10bd   : > { %v3424_v21 = vpack.c.bf16 %v3416_v60, %v3414_v13 }
0x10be   : > { %v3425_v20 = vpack.c.bf16 %v3417_v8, %v3415_v45 }
0x10c0   : > { %3617 = vmatprep.mubr.bf16.mxu0 %v3425_v20 }
0x10c1   : > { %3618 = vmatmul.mubr.bf16.gmra.mrb[60].mxu0 %v3424_v21 }
0x1167   : > { %v4258_v19 = vpop.f32.mrb[48].mxu0 }
0x1168   : > { %v4259_v41 = vpop.f32.mrb[49].mxu0 }
0x1169   : > { %v4260_v39 = vadd.f32 %v4259_v41, %v4258_v19  ;;  %v4261_v36 = vpop.f32.mrb[50].mxu0 }
0x116a   : > { %v4262_v57 = vpop.f32.mrb[51].mxu0 }
0x116b   : > { %v3596_v22 = vadd.f32 %v4260_v39, %v4127_v49  ;;  %v4263_v30 = vadd.f32 %v4262_v57, %v4261_v36 }
0x116d   : > { %v3626_v51 = vadd.f32 %v3596_v22, %v6246_v28  ;;  %v3599_v62 = vadd.f32 %v4263_v30, %v4127_v49 }
0x116f   : > { %3634 = vst [vmem:[#allocation2] sm:$0xff] %v3626_v51  ;;  %v3627_v42 = vadd.f32 %v3599_v62, %v6248_v0  ;;  %v4264_v10 = vpop.f32.mrb[52].mxu0  ;;  %3648 = vadd.xlane.f32.xlu0 (!%p4144_p4), %v3626_v51 }
0x1170   : > { %v4265_v4 = vpop.f32.mrb[53].mxu0 }
0x1171   : > { %3635 = vst [vmem:[#allocation2 + $0x8] sm:$0xff] %v3627_v42  ;;  %v4266_v56 = vadd.f32 %v4265_v4, %v4264_v10  ;;  %v4267_v63 = vpop.f32.mrb[54].mxu0 }
0x1172   : > { %v4268_v18 = vpop.f32.mrb[55].mxu0 }
0x1173   : > { %v3604_v6 = vadd.f32 %v4266_v56, %v4127_v49  ;;  %v4269_v43 = vadd.f32 %v4268_v18, %v4267_v63  ;;  %3650 = vadd.xlane.f32.xlu0 (!%p4144_p4), %v3627_v42 }
0x1175   : > { %v3628_v17 = vadd.f32 %v3604_v6, %v6251_v2  ;;  %v3607_v46 = vadd.f32 %v4269_v43, %v4127_v49 }
0x1177   : > { %3636 = vst [vmem:[#allocation2 + $0x10] sm:$0xff] %v3628_v17  ;;  %v3629_v25 = vadd.f32 %v3607_v46, %v6255_v3  ;;  %3652 = vadd.xlane.f32.xlu1 (!%p4144_p4), %v3628_v17 }
0x1179   : > { %3637 = vst [vmem:[#allocation2 + $0x18] sm:$0xff] %v3629_v25 }
0x117b   : > { %3654 = vadd.xlane.f32.xlu1 (!%p4144_p4), %v3629_v25 }
0x118c   : > { %v4270_v28 = vpop.f32.mrb[56].mxu0 }
0x118d   : > { %v4271_v15 = vpop.f32.mrb[57].mxu0 }
0x118e   : > { %v4272_v9 = vadd.f32 %v4271_v15, %v4270_v28  ;;  %v4273_v16 = vpop.f32.mrb[58].mxu0 }
0x118f   : > { %v4274_v0 = vpop.f32.mrb[59].mxu0 }
0x1190   : > { %v3612_v61 = vadd.f32 %v4272_v9, %v4127_v49  ;;  %v4275_v23 = vadd.f32 %v4274_v0, %v4273_v16 }
0x1192   : > { %v3630_v29 = vadd.f32 %v3612_v61, %v6258_v1  ;;  %v3615_v31 = vadd.f32 %v4275_v23, %v4127_v49 }
0x1194   : > { %3638 = vst [vmem:[#allocation2 + $0x20] sm:$0xff] %v3630_v29  ;;  %v3631_v34 = vadd.f32 %v3615_v31, %v6260_v59  ;;  %v4276_v35 = vpop.f32.mrb[60].mxu0  ;;  %3656 = vadd.xlane.f32.xlu0 (!%p4144_p4), %v3630_v29  ;;  %v4145_v31 = vld [vmem:[%s6661_s27] ss:$0 sm:$0xff] (!%p4144_p4) }
0x1195   : > { %v4277_v2 = vpop.f32.mrb[61].mxu0 }
0x1196   : > { %3639 = vst [vmem:[#allocation2 + $0x28] sm:$0xff] %v3631_v34  ;;  %v4278_v38 = vadd.f32 %v4277_v2, %v4276_v35  ;;  %v4279_v37 = vpop.f32.mrb[62].mxu0  ;;  %3658 = vadd.xlane.f32.xlu1 (!%p4144_p4), %v3631_v34 }
0x1197   : > { %v4280_v3 = vpop.f32.mrb[63].mxu0 }
0x1198   : > { %v3620_v47 = vadd.f32 %v4278_v38, %v4127_v49  ;;  %v4281_v50 = vadd.f32 %v4280_v3, %v4279_v37  ;;  %3645 = sbr.rel (%p4144_p4) target bundleno = 4822 (0x12d6), region = 116  ;;  %v4146_v37 = vld [vmem:[%s6662_s18] ss:$0 sm:$0xff] (!%p4144_p4) }
0x119a   : > { %v3632_v52 = vadd.f32 %v3620_v47, %v6263_v58  ;;  %v3623_v24 = vadd.f32 %v4281_v50, %v4127_v49 }
0x119c   : > { %3640 = vst [vmem:[#allocation2 + $0x30] sm:$0xff] %v3632_v52  ;;  %v3633_v53 = vadd.f32 %v3623_v24, %v6266_v32  ;;  %3660 = vadd.xlane.f32.xlu0 (!%p4144_p4), %v3632_v52 }
0x119e   : > { %3641 = vst [vmem:[#allocation2 + $0x38] sm:$0xff] %v3633_v53  ;;  %3662 = vadd.xlane.f32.xlu1 (!%p4144_p4), %v3633_v53 }
0x11fc   : > { %v3649_v1 = vpop.xlane.xlu0 %3648 }
0x11fd   : > { %v3664_v12 = vmul.f32 0.0078125, %v3649_v1 }
0x11ff   : > { %v6486_v44 = vsub.f32 %v3626_v51, %v3664_v12 }
0x1200   : > { %v3651_v32 = vpop.xlane.xlu0 %3650 }
0x1201   : > { %v3665_v40 = vmul.f32 0.0078125, %v3651_v32  ;;  %v3680_v7 = vmul.f32 %v6486_v44, %v6486_v44 }
0x1203   : > { %v6492_v33 = vsub.f32 %v3627_v42, %v3665_v40  ;;  %3688 = vadd.xlane.f32.xlu0 %v3680_v7 }
0x1204   : > { %v3653_v59 = vpop.xlane.xlu1 %3652 }
0x1205   : > { %v3666_v58 = vmul.f32 0.0078125, %v3653_v59  ;;  %v3681_v13 = vmul.f32 %v6492_v33, %v6492_v33 }
0x1207   : > { %v6488_v55 = vsub.f32 %v3628_v17, %v3666_v58  ;;  %3690 = vadd.xlane.f32.xlu1 %v3681_v13 }
0x1208   : > { %v3655_v26 = vpop.xlane.xlu1 %3654 }
0x1209   : > { %v3667_v54 = vmul.f32 0.0078125, %v3655_v26  ;;  %v3682_v27 = vmul.f32 %v6488_v55, %v6488_v55 }
0x120b   : > { %v6494_v14 = vsub.f32 %v3629_v25, %v3667_v54  ;;  %3692 = vadd.xlane.f32.xlu0 %v3682_v27 }
0x120d   : > { %v3683_v21 = vmul.f32 %v6494_v14, %v6494_v14 }
0x120f   : > { %3694 = vadd.xlane.f32.xlu1 %v3683_v21 }
0x1221   : > { %v3657_v5 = vpop.xlane.xlu0 %3656 }
0x1222   : > { %v3668_v11 = vmul.f32 0.0078125, %v3657_v5 }
0x1223   : > { %v3659_v48 = vpop.xlane.xlu1 %3658 }
0x1224   : > { %v3669_v60 = vmul.f32 0.0078125, %v3659_v48  ;;  %v6500_v45 = vsub.f32 %v3630_v29, %v3668_v11 }
0x1226   : > { %v6502_v8 = vsub.f32 %v3631_v34, %v3669_v60  ;;  %v3684_v41 = vmul.f32 %v6500_v45, %v6500_v45 }
0x1228   : > { %3696 = vadd.xlane.f32.xlu0 %v3684_v41  ;;  %v3685_v22 = vmul.f32 %v6502_v8, %v6502_v8 }
0x1229   : > { %v3661_v20 = vpop.xlane.xlu0 %3660 }
0x122a   : > { %v3670_v49 = vmul.f32 0.0078125, %v3661_v20  ;;  %3698 = vadd.xlane.f32.xlu1 %v3685_v22 }
0x122b   : > { %v3663_v19 = vpop.xlane.xlu1 %3662 }
0x122c   : > { %v3671_v39 = vmul.f32 0.0078125, %v3663_v19  ;;  %v6508_v36 = vsub.f32 %v3632_v52, %v3670_v49 }
0x122e   : > { %v6510_v57 = vsub.f32 %v3633_v53, %v3671_v39  ;;  %v3686_v30 = vmul.f32 %v6508_v36, %v6508_v36 }
0x1230   : > { %3700 = vadd.xlane.f32.xlu0 %v3686_v30  ;;  %v3687_v51 = vmul.f32 %v6510_v57, %v6510_v57 }
0x1232   : > { %3702 = vadd.xlane.f32.xlu1 %v3687_v51 }
0x1290   : > { %v3689_v62 = vpop.xlane.xlu0 %3688 }
0x1291   : > { %v3704_v42 = vmul.f32 0.0078125, %v3689_v62 }
0x1293   : > { %v3712_v10 = vadd.f32 1e-05, %v3704_v42 }
0x1294   : > { %v3691_v4 = vpop.xlane.xlu1 %3690 }
0x1295   : > { %4868 = vrsqrt.f32 %v3712_v10  ;;  %v3705_v63 = vmul.f32 0.0078125, %v3691_v4 }
0x1297   : > { %v3713_v6 = vadd.f32 1e-05, %v3705_v63 }
0x1298   : > { %v3693_v56 = vpop.xlane.xlu0 %3692 }
0x1299   : > { %v3706_v18 = vmul.f32 0.0078125, %v3693_v56  ;;  %4870 = vrsqrt.f32 %v3713_v6 }
0x129b   : > { %v3714_v43 = vadd.f32 1e-05, %v3706_v18 }
0x129c   : > { %v3695_v17 = vpop.xlane.xlu1 %3694 }
0x129d   : > { %v3707_v25 = vmul.f32 0.0078125, %v3695_v17  ;;  %4872 = vrsqrt.f32 %v3714_v43 }
0x129f   : > { %v3715_v15 = vadd.f32 1e-05, %v3707_v25  ;;  %v4869_v29 = vpop.eup %4868 }
0x12a0   : > { %v3728_v2 = vmul.f32 %v4869_v29, %v6486_v44 }
0x12a1   : > { %4874 = vrsqrt.f32 %v3715_v15 }
0x12a2   : > { %v3742_v47 = vmul.f32 %v4145_v31, %v3728_v2 }
0x12a3   : > { %v4871_v50 = vpop.eup %4870 }
0x12a4   : > { %v3756_v53 = vadd.f32 %v4146_v37, %v3742_v47  ;;  %v3729_v1 = vmul.f32 %v4871_v50, %v6492_v33 }
0x12a6   : > { %3764 = vst [vmem:[#allocation16] sm:$0xff] %v3756_v53  ;;  %v3743_v12 = vmul.f32 %v4145_v31, %v3729_v1 }
0x12a7   : > { %v4873_v24 = vpop.eup %4872 }
0x12a8   : > { %v3730_v59 = vmul.f32 %v4873_v24, %v6488_v55  ;;  %v3757_v26 = vadd.f32 %v4146_v37, %v3743_v12 }
0x12aa   : > { %v3744_v44 = vmul.f32 %v4145_v31, %v3730_v59  ;;  %3765 = vst [vmem:[#allocation16 + $0x8] sm:$0xff] %v3757_v26 }
0x12ab   : > { %v4875_v58 = vpop.eup %4874 }
0x12ac   : > { %v3731_v40 = vmul.f32 %v4875_v58, %v6494_v14  ;;  %v3758_v7 = vadd.f32 %v4146_v37, %v3744_v44 }
0x12ae   : > { %v3745_v27 = vmul.f32 %v4145_v31, %v3731_v40  ;;  %3766 = vst [vmem:[#allocation16 + $0x10] sm:$0xff] %v3758_v7 }
0x12b0   : > { %v3759_v11 = vadd.f32 %v4146_v37, %v3745_v27 }
0x12b2   : > { %3767 = vst [vmem:[#allocation16 + $0x18] sm:$0xff] %v3759_v11 }
0x12b5   : > { %v3697_v46 = vpop.xlane.xlu0 %3696 }
0x12b6   : > { %v3708_v28 = vmul.f32 0.0078125, %v3697_v46 }
0x12b7   : > { %v3699_v16 = vpop.xlane.xlu1 %3698 }
0x12b8   : > { %v3716_v9 = vadd.f32 1e-05, %v3708_v28  ;;  %v3709_v61 = vmul.f32 0.0078125, %v3699_v16 }
0x12ba   : > { %4876 = vrsqrt.f32 %v3716_v9  ;;  %v3717_v34 = vadd.f32 1e-05, %v3709_v61 }
0x12bc   : > { %4878 = vrsqrt.f32 %v3717_v34 }
0x12bd   : > { %v3701_v0 = vpop.xlane.xlu0 %3700 }
0x12be   : > { %v3710_v23 = vmul.f32 0.0078125, %v3701_v0 }
0x12bf   : > { %v3703_v38 = vpop.xlane.xlu1 %3702 }
0x12c0   : > { %v3718_v35 = vadd.f32 1e-05, %v3710_v23  ;;  %v3711_v3 = vmul.f32 0.0078125, %v3703_v38 }
0x12c2   : > { %4880 = vrsqrt.f32 %v3718_v35  ;;  %v3719_v52 = vadd.f32 1e-05, %v3711_v3 }
0x12c4   : > { %4882 = vrsqrt.f32 %v3719_v52  ;;  %v4877_v32 = vpop.eup %4876 }
0x12c5   : > { %v3732_v54 = vmul.f32 %v4877_v32, %v6500_v45 }
0x12c6   : > { %v4879_v5 = vpop.eup %4878 }
0x12c7   : > { %v3746_v48 = vmul.f32 %v4145_v31, %v3732_v54  ;;  %v3733_v55 = vmul.f32 %v4879_v5, %v6502_v8 }
0x12c9   : > { %v3760_v13 = vadd.f32 %v4146_v37, %v3746_v48  ;;  %v3747_v21 = vmul.f32 %v4145_v31, %v3733_v55 }
0x12cb   : > { %3768 = vst [vmem:[#allocation16 + $0x20] sm:$0xff] %v3760_v13  ;;  %v3761_v19 = vadd.f32 %v4146_v37, %v3747_v21 }
0x12cc   : > { %v4881_v33 = vpop.eup %4880 }
0x12cd   : > { %v3734_v60 = vmul.f32 %v4881_v33, %v6508_v36  ;;  %3769 = vst [vmem:[#allocation16 + $0x28] sm:$0xff] %v3761_v19 }
0x12ce   : > { %v4883_v20 = vpop.eup %4882 }
0x12cf   : > { %v3748_v14 = vmul.f32 %v4145_v31, %v3734_v60  ;;  %v3735_v45 = vmul.f32 %v4883_v20, %v6510_v57 }
0x12d1   : > { %v3762_v49 = vadd.f32 %v4146_v37, %v3748_v14  ;;  %v3749_v41 = vmul.f32 %v4145_v31, %v3735_v45 }
0x12d3   : > { %3770 = vst [vmem:[#allocation16 + $0x30] sm:$0xff] %v3762_v49  ;;  %v3763_v39 = vadd.f32 %v4146_v37, %v3749_v41 }
0x12d5   : > { %3771 = vst [vmem:[#allocation16 + $0x38] sm:$0xff] %v3763_v39 }
0x12d6 PF: > { %p4524_p8 = scmp.eq.s32.totalorder %s5468_s26, 1  ;;  %s5203_s24 = smov [#allocation16]  }
0x12d7   : > { %s3781_s10 = sshll.u32 %s5203_s24, 4  ;;  %s3782_s10 = int_to_ptr.vmem [resolvable:$true] %s3781_s10 }
0x12d8   : > { %s5092_s30 = scalar_lea.vmem %s3782_s10, 1024  ;;  %p5099_p6 = scmp.lt.s32.totalorder %s3782_s10, %s3782_s10 }
0x12d9   : > { %p5093_p9 = scmp.ne.s32.totalorder %s3782_s10, %s5092_s30  ;;  %p5100_p11 = scmp.lt.s32.totalorder %s5092_s30, %s5092_s30 }
0x12db   : > { %p5094_p5 = pnand %p5093_p9, %p4524_p8  ;;  %p5101_p12 = por %p5100_p11, %p5099_p6 }
0x12dd   : > { %p5095_p13 = pneg %p5094_p5 }
0x12df   : > { %p5102_p7 = pnand %p5101_p12, %p5095_p13 }
0x12e1   : > { %5105 = shalt.err (!%p5102_p7)
}
0x12e2   : > { %s6663_s0 = sld [smem:[#allocation40_spill]] }
0x12e8   : > { %s5106_s2 = scalar_lea.hbm %s6663_s0, 1024 }
0x12e9   : > { %p5107_p2 = scmp.ne.s32.totalorder %s6663_s0, %s5106_s2  ;;  %p5112_p10 = scmp.lt.u32.totalorder %s5106_s2, %s6663_s0 }
0x12eb   : > { %p5108_p1 = pnand %p5107_p2, %p4524_p8 }
0x12ed   : > { %p5109_p0 = pneg %p5108_p1 }
0x12ef   : > { %p5114_p3 = pnand %p5112_p10, %p5109_p0 }
0x12f1   : > { %5117 = shalt.err (!%p5114_p3)
}
0x12f2   : > { %s5204_s29 = smov 128   ;;  %s5205_s23 = smov 8  }
0x12f3   : > { %4495 = dma.vmem_to_hbm [thread:$0]  (%p4524_p8), %s3782_s10, 1024, %s6663_s0, [#allocation6], %s5204_s29, %s5204_s29, %s5205_s23  }
0x12f4   : > { %5159 = dma.done.wait (%p4524_p8), [#allocation6], 1024  }
0x12f5   : > { %5161 = vsyncadd (%p4524_p8), [#allocation6], 4294966272 }
0x12f6 PF: > { %s6664_s4 = sld [smem:[#allocation24_spill]]  ;;  %s6665_s9 = sld [smem:[#allocation22_spill]] }
0x12f7   : > { %s6666_s20 = sld [smem:[#allocation26_spill]]  ;;  %s6667_s21 = sld [smem:[#allocation23_spill]] }
0x12f8   : > { %s6668_s22 = sld [smem:[#allocation25_spill]]  ;;  %s6669_s18 = smov %s5168_s19 }
0x12fc   : > { %s36_s23 = sadd.s32 1, %s6664_s4   ;;  %s6670_s19 = smov %s6665_s9 }
0x12fd   : > { %p33_p4 = scmp.ge.s32.totalorder %s36_s23, 4  }
0x12ff   :  { %35 = sbr.rel (!%p33_p4) target bundleno = 25 (0x19), region = 209 }
0x1306   :  { %3797 = vsyncpa [#allocation5], 1 }
0x1307   :  { %3799 = vsyncpa [#allocation5 + $0x1], 1 }
0x1308   :  { %3800 = vsyncpa [#allocation8], 1 }
0x1309   :  { %3802 = vsyncpa [#allocation8 + $0x1], 1 }
0x130a   :  { %3803 = vsyncpa [#allocation11], 1 }
0x130b   :  { %3805 = vsyncpa [#allocation11 + $0x1], 1 }
0x130c   :  { %3806 = vsyncpa [#allocation14], 1 }
0x130d   :  { %3808 = vsyncpa [#allocation14 + $0x1], 1 }
0x130e   :  { %3809 = vsyncpa [#allocation6], 1 }
0x130f   :  { %3811 = vsyncpa [#allocation6 + $0x1], 1 }

</bundles_post_ra>
